<compile_context>
chip_gen: v7x
topology: tpu7x:2x2x1
jax: 0.10.0
libtpu: 0.0.40
codegen_flags: <defaults>
</compile_context>

<pallas_src>
import functools

import jax
import jax.numpy as jnp
from jax.experimental import pallas as pl
from jax.experimental.pallas import tpu as pltpu

MARGIN = 128        # lane margin around each flat image; multiple of 128, >= pitch+1
CHUNK = 256         # conv output lanes per step; multiple of 128 (keeps vregs < 64)
ROWS_PER_BAND = 4   # source rows handled per pixel-shuffle scatter matmul


def _round_up(x, m):
    return (x + m - 1) // m * m


def _cdiv(a, b):
    return -(-a // b)


def _flat_sizes(H, W):
    """Flat-layout geometry for an (H, W) image: pitch = W + 2 lanes per row
    (W pixels + 2 zero junk columns that double as conv zero padding), rows
    concatenated, zero MARGIN on both sides."""
    pitch = W + 2
    P = H * pitch
    Pr = _round_up(P, CHUNK)
    return pitch, P, Pr, MARGIN + Pr + MARGIN


def _flat_mask(H, W, pitch, Pr):
    """1.0 on real pixels, 0.0 on junk columns / tail (shape (1, Pr))."""
    m = jnp.zeros((H, pitch), jnp.float32).at[:, :W].set(1.0)
    return jnp.pad(m.reshape(1, H * pitch), ((0, 0), (0, Pr - H * pitch)))


def _to_flat(x_nchw, c_pad):
    """(N, C, H, W) NCHW -> flat layout (N, c_pad, L); zero margins/junk/pad chans."""
    N, C, H, W = x_nchw.shape
    _, P, _, L = _flat_sizes(H, W)
    xf = jnp.pad(x_nchw.astype(jnp.float32),
                 ((0, 0), (0, c_pad - C), (0, 0), (0, 2))).reshape(N, c_pad, P)
    return jnp.pad(xf, ((0, 0), (0, 0), (MARGIN, L - MARGIN - P)))


def _out_to_nchw(out_flat, H, W):
    """Lane-dense kernel output (N, 3, Pr) -> NCHW (N, 3, H, W)."""
    N = out_flat.shape[0]
    pitch = W + 2
    return out_flat[:, :, :H * pitch].reshape(N, 3, H, pitch)[:, :, :, :W]


# ----------------------------------------------------------------------------
# In-kernel 3x3 conv (stride 1, pad 1) on a flat-layout VMEM-resident image:
# one fused K = 9*Cin matmul per CHUNK of output lanes.
# ----------------------------------------------------------------------------
def _conv3x3_flat(src_ref, w_ref, b_ref, dst_ref, *, H, W, pitch, dst_base,
                  activation, mask_ref=None):
    """src_ref : (Cin_p, L_src)  flat buffer (margins + junk columns are zero)
    w_ref   : (Cout, 9*Cin_p) taps, column = (3*ky + kx)*Cin_p + cin
    b_ref   : (Cout, 1)
    dst_ref : (Cout, L_dst) ; chunk c stored at [dst_base + c*CHUNK, ...)
    mask_ref: optional (1, Pr) validity mask (zeroes junk columns / tail)."""
    P = H * pitch
    n_chunks = _cdiv(P, CHUNK)
    cout = w_ref.shape[0]
    # Hoisted out of the chunk loop: weight load and the bias broadcast.
    w = w_ref[...]
    bias = jnp.broadcast_to(b_ref[...], (cout, CHUNK))
    offs = [MARGIN + (ky - 1) * pitch + (kx - 1)
            for ky in range(3) for kx in range(3)]
    for c in range(n_chunks):
        c0 = c * CHUNK
        # Stack the 9 lane-shifted patches along sublanes -> single MXU dot
        # with internal accumulation over K = 9*Cin_p.
        patch = jnp.concatenate(
            [src_ref[:, o + c0:o + c0 + CHUNK] for o in offs], axis=0)
        acc = jnp.dot(w, patch, preferred_element_type=jnp.float32) + bias
        if activation == "relu":
            acc = jnp.maximum(acc, 0.0)
        elif activation == "sigmoid":
            acc = jax.nn.sigmoid(acc)
        if mask_ref is not None:
            acc = acc * mask_ref[:, c0:c0 + CHUNK]   # keep padding exact 0
        dst_ref[:, dst_base + c0:dst_base + c0 + CHUNK] = acc


# ----------------------------------------------------------------------------
# Fused UpsampleBlock kernel: conv1+ReLU -> conv2 -> PixelShuffle(2) ->
# conv3+sigmoid, everything resident in VMEM.
# ----------------------------------------------------------------------------
def _upsample_block_kernel(x_ref, w1_ref, b1_ref, w2_ref, b2_ref, w3_ref,
                           b3_ref, s0_ref, s1_ref, m1_ref,
                           xnext_ref, out_ref, h1_ref, h2_ref, *, H, W, C1):
    p1 = W + 2
    p2 = 2 * W + 2
    P2 = (2 * H) * p2
    L1 = h1_ref.shape[1]
    L2 = xnext_ref.shape[1]

    # Zero only the never-written lanes that act as conv zero padding (left /
    # right margins of h1, left margin + tail of xnext).  conv1's mask and the
    # pitch-wide shuffle row stores supply the remaining exact zeros.
    zmarg = jnp.zeros((C1, MARGIN), jnp.float32)
    h1_ref[:, :MARGIN] = zmarg
    h1_ref[:, L1 - MARGIN:] = zmarg
    xnext_ref[:, :MARGIN] = zmarg
    xnext_ref[:, MARGIN + P2:] = jnp.zeros((C1, L2 - MARGIN - P2), jnp.float32)

    # conv1 + ReLU : x -> h1 (masked so junk columns / tail are exact zeros,
    # they are re-read by conv2 as zero padding).
    _conv3x3_flat(x_ref, w1_ref, b1_ref, h1_ref, mask_ref=m1_ref,
                  H=H, W=W, pitch=p1, dst_base=MARGIN, activation="relu")
    # conv2 : h1 -> h2.  No mask: the shuffle only reads real-pixel lanes.
    # h2 scratch is intentionally never zeroed; every lane the shuffle reads
    # is re-written by conv2 on every grid step.
    _conv3x3_flat(h1_ref, w2_ref, b2_ref, h2_ref, mask_ref=None,
                  H=H, W=W, pitch=p1, dst_base=MARGIN, activation="none")

    # PixelShuffle(2).  conv2's output channels were pre-permuted rx-major:
    #   kernel channel k = rx*2*C1 + ry*C1 + c  <->  torch channel 4c+2ry+rx
    # so the rx=0 / rx=1 phase blocks are contiguous sublane slices.  For each
    # band of `rb` source rows we build (rb*2*C1, W) operands and scatter the
    # columns with two constant (W, p2) matmuls; the last two columns of
    # s0/s1 are all-zero, so every row store is p2 wide and writes xnext's
    # junk columns with exact zeros for free.
    s0 = s0_ref[...]
    s1 = s1_ref[...]
    for h0 in range(0, H, ROWS_PER_BAND):
        rb = min(ROWS_PER_BAND, H - h0)
        srcs = [MARGIN + (h0 + j) * p1 for j in range(rb)]
        a = jnp.concatenate([h2_ref[0:2 * C1, s:s + W] for s in srcs], axis=0)
        b = jnp.concatenate([h2_ref[2 * C1:4 * C1, s:s + W] for s in srcs],
                            axis=0)
        band = (jnp.dot(a, s0, preferred_element_type=jnp.float32)
                + jnp.dot(b, s1, preferred_element_type=jnp.float32))
        for j in range(rb):
            for ry in range(2):
                r = 2 * (h0 + j) + ry
                xnext_ref[:, MARGIN + r * p2:MARGIN + (r + 1) * p2] = (
                    band[(2 * j + ry) * C1:(2 * j + ry + 1) * C1, :])

    # conv3 + sigmoid : xnext -> out (lane-dense flat output; unflattened by a
    # tiny JAX reshape in the wrapper).
    _conv3x3_flat(xnext_ref, w3_ref, b3_ref, out_ref, mask_ref=None,
                  H=2 * H, W=2 * W, pitch=p2, dst_base=0, activation="sigmoid")


def upsample_block(x_flat, kparams, *, H, W, Cin_p, C1):
    """One UpsampleBlock as a single pallas_call.
    x_flat: (N, Cin_p, L1) flat-layout input.
    Returns (x_next_flat (N, C1, L2), out_flat (N, 3, Pr2))."""
    N = x_flat.shape[0]
    C2 = 4 * C1
    p1, P1, Pr1, L1 = _flat_sizes(H, W)
    p2, P2, Pr2, L2 = _flat_sizes(2 * H, 2 * W)
    assert p2 + 1 <= MARGIN, "block input width too large for the fixed MARGIN"
    assert x_flat.shape == (N, Cin_p, L1), (x_flat.shape, (N, Cin_p, L1))

    w1, b1, w2, b2, w3, b3 = kparams
    # Column-scatter matrices for the width interleave of PixelShuffle(2);
    # the two all-zero tail columns write xnext's junk columns for free.
    cols = jnp.arange(p2)[None, :]
    rows = jnp.arange(W)[:, None]
    s0 = (cols == 2 * rows).astype(jnp.float32)        # (W, p2): w -> lane 2w
    s1 = (cols == 2 * rows + 1).astype(jnp.float32)    # (W, p2): w -> lane 2w+1
    m1 = _flat_mask(H, W, p1, Pr1)

    kern = functools.partial(_upsample_block_kernel, H=H, W=W, C1=C1)
    x_next, out_flat = pl.pallas_call(
        kern,
        out_shape=(jax.ShapeDtypeStruct((N, C1, L2), jnp.float32),
                   jax.ShapeDtypeStruct((N, 3, Pr2), jnp.float32)),
        grid=(N,),
        in_specs=[
            pl.BlockSpec((None, Cin_p, L1), lambda n: (n, 0, 0)),
            pl.BlockSpec((C1, 9 * Cin_p), lambda n: (0, 0)),
            pl.BlockSpec((C1, 1), lambda n: (0, 0)),
            pl.BlockSpec((C2, 9 * C1), lambda n: (0, 0)),
            pl.BlockSpec((C2, 1), lambda n: (0, 0)),
            pl.BlockSpec((3, 9 * C1), lambda n: (0, 0)),
            pl.BlockSpec((3, 1), lambda n: (0, 0)),
            pl.BlockSpec((W, p2), lambda n: (0, 0)),
            pl.BlockSpec((W, p2), lambda n: (0, 0)),
            pl.BlockSpec((1, Pr1), lambda n: (0, 0)),
        ],
        out_specs=(
            pl.BlockSpec((None, C1, L2), lambda n: (n, 0, 0)),
            pl.BlockSpec((None, 3, Pr2), lambda n: (n, 0, 0)),
        ),
        scratch_shapes=[
            pltpu.VMEM((C1, L1), jnp.float32),   # h1 = conv1 output (flat)
            pltpu.VMEM((C2, L1), jnp.float32),   # h2 = conv2 output (flat)
        ],
        compiler_params=pltpu.CompilerParams(
            dimension_semantics=("parallel",),     # batch across v7x TCs
            vmem_limit_bytes=64 * 1024 * 1024),
    )(x_flat, w1, b1, w2, b2, w3, b3, s0, s1, m1)
    return x_next, out_flat


# ----------------------------------------------------------------------------
# Parameters (PyTorch-default-style uniform init) + module wrapper
# ----------------------------------------------------------------------------
def _init_conv(key, cin, cout):
    kw, kb = jax.random.split(key)
    bound = 1.0 / float(cin * 9) ** 0.5
    w = jax.random.uniform(kw, (cout, cin, 3, 3), jnp.float32, -bound, bound)
    b = jax.random.uniform(kb, (cout,), jnp.float32, -bound, bound)
    return w, b


def _to_cat_layout(w, cin_pad):
    """torch OIHW (Cout, Cin, 3, 3) -> (Cout, 9*cin_pad), col = (3*ky+kx)*cin_pad+cin."""
    cout, cin = w.shape[0], w.shape[1]
    wp = jnp.pad(w, ((0, 0), (0, cin_pad - cin), (0, 0), (0, 0)))
    return jnp.transpose(wp, (0, 2, 3, 1)).reshape(cout, 9 * cin_pad)


class UpsampleCascade:
    """JAX/Pallas equivalent of UpsampleCascadeModule (block_type='upsample')."""

    def __init__(self, in_channels, out_channels, depth, scale_factor=2,
                 key=jax.random.PRNGKey(42)):
        assert scale_factor == 2, "Pallas kernel implements PixelShuffle(2)"
        assert out_channels % 8 == 0, "kernel assumes out_channels % 8 == 0"
        self.depth = depth
        self.out_channels = out_channels
        self.cin_pad = _round_up(in_channels, 8)
        C1 = out_channels
        # Permute conv2's output channels rx-major / ry / c so the in-kernel
        # pixel shuffle reads two contiguous channel blocks (torch ch = 4c+2ry+rx).
        perm = jnp.array(
            [4 * (k % C1) + 2 * ((k // C1) % 2) + (k // (2 * C1))
             for k in range(4 * C1)], dtype=jnp.int32)
        self.torch_params = []    # PyTorch layout (used by the reference check)
        self.kernel_params = []   # fused (Cout, 9*Cin) kernel layout
        for i in range(depth):
            cin = in_channels if i == 0 else out_channels
            cin_p = self.cin_pad if i == 0 else out_channels
            key, k1, k2, k3 = jax.random.split(key, 4)
            w1, b1 = _init_conv(k1, cin, C1)
            w2, b2 = _init_conv(k2, C1, C1 * (2 ** scale_factor))
            w3, b3 = _init_conv(k3, C1, 3)
            self.torch_params.append((w1, b1, w2, b2, w3, b3))
            self.kernel_params.append((
                _to_cat_layout(w1, cin_p), b1.reshape(-1, 1),
                _to_cat_layout(w2[perm], C1), b2[perm].reshape(-1, 1),
                _to_cat_layout(w3, C1), b3.reshape(-1, 1),
            ))

    def __call__(self, x_nchw):
        N, Cin, H, W = x_nchw.shape
        x_flat = _to_flat(x_nchw, self.cin_pad)   # one-time layout glue
        outs = []
        cin_p = self.cin_pad
        for i in range(self.depth):
            x_flat, out_flat = upsample_block(
                x_flat, self.kernel_params[i],
                H=H, W=W, Cin_p=cin_p, C1=self.out_channels)
            H, W = 2 * H, 2 * W
            cin_p = self.out_channels
            outs.append(_out_to_nchw(out_flat, H, W))
        return outs


# ----------------------------------------------------------------------------
# Plain-JAX reference of the PyTorch graph (for a numerical self-check)
# ----------------------------------------------------------------------------
def _reference_forward(x, torch_params, depth, r=2):
    def conv(x, w, b):
        y = jax.lax.conv_general_dilated(
            x, w, window_strides=(1, 1), padding=((1, 1), (1, 1)),
            dimension_numbers=("NCHW", "OIHW", "NCHW"))
        return y + b[None, :, None, None]

    outs = []
    for i in range(depth):
        w1, b1, w2, b2, w3, b3 = torch_params[i]
        h = jax.nn.relu(conv(x, w1, b1))
        h = conv(h, w2, b2)
        N, C, Hh, Ww = h.shape
        c = C // (r * r)
        x = h.reshape(N, c, r, r, Hh, Ww).transpose(0, 1, 4, 2, 5, 3).reshape(
            N, c, Hh * r, Ww * r)
        outs.append(jax.nn.sigmoid(conv(x, w3, b3)))
    return outs


if __name__ == "__main__":
    in_channels, out_channels, depth = 4, 8, 2
    x = jax.random.normal(jax.random.PRNGKey(0), (2, in_channels, 16, 16),
                          jnp.float32)

    model = UpsampleCascade(in_channels, out_channels, depth, scale_factor=2)
    outs = model(x)
    outs = [jax.block_until_ready(o) for o in outs]

    # Shape checks (matches the PyTorch module's return convention)
    assert outs[0].shape == (2, 3, 32, 32), outs[0].shape
    assert outs[1].shape == (2, 3, 64, 64), outs[1].shape
    for o in outs:
        assert bool(jnp.all((o > 0.0) & (o < 1.0)))

    # Numerical check against a plain-JAX (XLA) reference of the same graph.
    refs = _reference_forward(x, model.torch_params, depth)
    for o, ref in zip(outs, refs):
        err = float(jnp.max(jnp.abs(o - ref)))
        assert err < 1e-2, f"max abs err vs reference = {err}"

    print("KERNEL_OK")
</pallas_src>

<mosaic_0001>
module attributes {stable_mosaic.version = 11 : i64} {
  func.func @_upsample_block_kernel(%arg0: i32, %arg1: memref<1x8x768xf32, #tpu.memory_space<vmem>>, %arg2: memref<8x72xf32, #tpu.memory_space<vmem>>, %arg3: memref<8x1xf32, #tpu.memory_space<vmem>>, %arg4: memref<32x72xf32, #tpu.memory_space<vmem>>, %arg5: memref<32x1xf32, #tpu.memory_space<vmem>>, %arg6: memref<3x72xf32, #tpu.memory_space<vmem>>, %arg7: memref<3x1xf32, #tpu.memory_space<vmem>>, %arg8: memref<16x34xf32, #tpu.memory_space<vmem>>, %arg9: memref<16x34xf32, #tpu.memory_space<vmem>>, %arg10: memref<1x512xf32, #tpu.memory_space<vmem>>, %arg11: memref<1x8x1536xf32, #tpu.memory_space<vmem>>, %arg12: memref<1x3x1280xf32, #tpu.memory_space<vmem>>, %arg13: memref<8x768xf32, #tpu.memory_space<vmem>>, %arg14: memref<32x768xf32, #tpu.memory_space<vmem>>) attributes {dimension_semantics = [#tpu.dimension_semantics<parallel>], iteration_bounds = array<i64: 2>, scalar_prefetch = 0 : i64, scratch_operands = 2 : i64, tpu.core_type = #tpu.core_type<tc>, window_params = [{transform_indices = @transform_0, window_bounds = array<i64: 1, 8, 768>}, {pipeline_mode = #tpu.pipeline_mode<synchronous>, transform_indices = @transform_1, window_bounds = array<i64: 8, 72>}, {pipeline_mode = #tpu.pipeline_mode<synchronous>, transform_indices = @transform_2, window_bounds = array<i64: 8, 1>}, {pipeline_mode = #tpu.pipeline_mode<synchronous>, transform_indices = @transform_3, window_bounds = array<i64: 32, 72>}, {pipeline_mode = #tpu.pipeline_mode<synchronous>, transform_indices = @transform_4, window_bounds = array<i64: 32, 1>}, {pipeline_mode = #tpu.pipeline_mode<synchronous>, transform_indices = @transform_5, window_bounds = array<i64: 3, 72>}, {pipeline_mode = #tpu.pipeline_mode<synchronous>, transform_indices = @transform_6, window_bounds = array<i64: 3, 1>}, {pipeline_mode = #tpu.pipeline_mode<synchronous>, transform_indices = @transform_7, window_bounds = array<i64: 16, 34>}, {pipeline_mode = #tpu.pipeline_mode<synchronous>, transform_indices = @transform_8, window_bounds = array<i64: 16, 34>}, {pipeline_mode = #tpu.pipeline_mode<synchronous>, transform_indices = @transform_9, window_bounds = array<i64: 1, 512>}, {transform_indices = @transform_10, window_bounds = array<i64: 1, 8, 1536>}, {transform_indices = @transform_11, window_bounds = array<i64: 1, 3, 1280>}]} {
    %cst = arith.constant 0.000000e+00 : f32
    %0 = vector.broadcast %cst : f32 to vector<8x128xf32>
    %c0 = arith.constant 0 : index
    %c0_0 = arith.constant 0 : index
    %1 = vector.load %arg13[%c0, %c0_0] : memref<8x768xf32, #tpu.memory_space<vmem>>, vector<8x128xf32>
    tpu.vector_store %arg13[%c0, %c0_0], %0 {strides = array<i32>} : memref<8x768xf32, #tpu.memory_space<vmem>>, vector<8x128xf32>,
    %c0_1 = arith.constant 0 : index
    %c640 = arith.constant 640 : index
    %2 = vector.load %arg13[%c0_1, %c640] : memref<8x768xf32, #tpu.memory_space<vmem>>, vector<8x128xf32>
    tpu.vector_store %arg13[%c0_1, %c640], %0 {strides = array<i32>} : memref<8x768xf32, #tpu.memory_space<vmem>>, vector<8x128xf32>,
    %c0_2 = arith.constant 0 : index
    %c0_3 = arith.constant 0 : index
    %c0_4 = arith.constant 0 : index
    %3 = vector.load %arg11[%c0_2, %c0_3, %c0_4] : memref<1x8x1536xf32, #tpu.memory_space<vmem>>, vector<1x8x128xf32>
    %4 = vector.shape_cast %3 : vector<1x8x128xf32> to vector<8x128xf32>
    %5 = vector.shape_cast %0 : vector<8x128xf32> to vector<1x8x128xf32>
    tpu.vector_store %arg11[%c0_2, %c0_3, %c0_4], %5 {strides = array<i32>} : memref<1x8x1536xf32, #tpu.memory_space<vmem>>, vector<1x8x128xf32>,
    %cst_5 = arith.constant 0.000000e+00 : f32
    %6 = vector.broadcast %cst_5 : f32 to vector<8x320xf32>
    %c0_6 = arith.constant 0 : index
    %c0_7 = arith.constant 0 : index
    %c1216 = arith.constant 1216 : index
    %7 = vector.load %arg11[%c0_6, %c0_7, %c1216] : memref<1x8x1536xf32, #tpu.memory_space<vmem>>, vector<1x8x320xf32>
    %8 = vector.shape_cast %7 : vector<1x8x320xf32> to vector<8x320xf32>
    %9 = vector.shape_cast %6 : vector<8x320xf32> to vector<1x8x320xf32>
    tpu.vector_store %arg11[%c0_6, %c0_7, %c1216], %9 {strides = array<i32>} : memref<1x8x1536xf32, #tpu.memory_space<vmem>>, vector<1x8x320xf32>,
    %c0_8 = arith.constant 0 : index
    %c0_9 = arith.constant 0 : index
    %10 = vector.load %arg2[%c0_8, %c0_9] : memref<8x72xf32, #tpu.memory_space<vmem>>, vector<8x72xf32>
    %c0_10 = arith.constant 0 : index
    %c0_11 = arith.constant 0 : index
    %11 = vector.load %arg3[%c0_10, %c0_11] : memref<8x1xf32, #tpu.memory_space<vmem>>, vector<8x1xf32>
    %12 = vector.shape_cast %11 : vector<8x1xf32> to vector<8x1xf32>
    %13 = vector.broadcast %12 : vector<8x1xf32> to vector<8x256xf32>
    %c0_12 = arith.constant 0 : index
    %c0_13 = arith.constant 0 : index
    %c109 = arith.constant 109 : index
    %14 = vector.load %arg1[%c0_12, %c0_13, %c109] : memref<1x8x768xf32, #tpu.memory_space<vmem>>, vector<1x8x256xf32>
    %15 = vector.shape_cast %14 : vector<1x8x256xf32> to vector<8x256xf32>
    %c0_14 = arith.constant 0 : index
    %c0_15 = arith.constant 0 : index
    %c110 = arith.constant 110 : index
    %16 = vector.load %arg1[%c0_14, %c0_15, %c110] : memref<1x8x768xf32, #tpu.memory_space<vmem>>, vector<1x8x256xf32>
    %17 = vector.shape_cast %16 : vector<1x8x256xf32> to vector<8x256xf32>
    %c0_16 = arith.constant 0 : index
    %c0_17 = arith.constant 0 : index
    %c111 = arith.constant 111 : index
    %18 = vector.load %arg1[%c0_16, %c0_17, %c111] : memref<1x8x768xf32, #tpu.memory_space<vmem>>, vector<1x8x256xf32>
    %19 = vector.shape_cast %18 : vector<1x8x256xf32> to vector<8x256xf32>
    %c0_18 = arith.constant 0 : index
    %c0_19 = arith.constant 0 : index
    %c127 = arith.constant 127 : index
    %20 = vector.load %arg1[%c0_18, %c0_19, %c127] : memref<1x8x768xf32, #tpu.memory_space<vmem>>, vector<1x8x256xf32>
    %21 = vector.shape_cast %20 : vector<1x8x256xf32> to vector<8x256xf32>
    %c0_20 = arith.constant 0 : index
    %c0_21 = arith.constant 0 : index
    %c128 = arith.constant 128 : index
    %22 = vector.load %arg1[%c0_20, %c0_21, %c128] : memref<1x8x768xf32, #tpu.memory_space<vmem>>, vector<1x8x256xf32>
    %23 = vector.shape_cast %22 : vector<1x8x256xf32> to vector<8x256xf32>
    %c0_22 = arith.constant 0 : index
    %c0_23 = arith.constant 0 : index
    %c129 = arith.constant 129 : index
    %24 = vector.load %arg1[%c0_22, %c0_23, %c129] : memref<1x8x768xf32, #tpu.memory_space<vmem>>, vector<1x8x256xf32>
    %25 = vector.shape_cast %24 : vector<1x8x256xf32> to vector<8x256xf32>
    %c0_24 = arith.constant 0 : index
    %c0_25 = arith.constant 0 : index
    %c145 = arith.constant 145 : index
    %26 = vector.load %arg1[%c0_24, %c0_25, %c145] : memref<1x8x768xf32, #tpu.memory_space<vmem>>, vector<1x8x256xf32>
    %27 = vector.shape_cast %26 : vector<1x8x256xf32> to vector<8x256xf32>
    %c0_26 = arith.constant 0 : index
    %c0_27 = arith.constant 0 : index
    %c146 = arith.constant 146 : index
    %28 = vector.load %arg1[%c0_26, %c0_27, %c146] : memref<1x8x768xf32, #tpu.memory_space<vmem>>, vector<1x8x256xf32>
    %29 = vector.shape_cast %28 : vector<1x8x256xf32> to vector<8x256xf32>
    %c0_28 = arith.constant 0 : index
    %c0_29 = arith.constant 0 : index
    %c147 = arith.constant 147 : index
    %30 = vector.load %arg1[%c0_28, %c0_29, %c147] : memref<1x8x768xf32, #tpu.memory_space<vmem>>, vector<1x8x256xf32>
    %31 = vector.shape_cast %30 : vector<1x8x256xf32> to vector<8x256xf32>
    %32 = tpu.concatenate %15, %17, %19, %21, %23, %25, %27, %29, %31 in 0 : vector<8x256xf32>, vector<8x256xf32>, vector<8x256xf32>, vector<8x256xf32>, vector<8x256xf32>, vector<8x256xf32>, vector<8x256xf32>, vector<8x256xf32>, vector<8x256xf32> -> vector<72x256xf32>
    %cst_30 = arith.constant dense<0.000000e+00> : vector<8x256xf32>
    %33 = tpu.matmul %10, %32, %cst_30 {dimension_numbers = #tpu.dot_dimension_numbers<[1], [0], [0], [1], [0, 0, 1, 1], [], []>} : vector<8x72xf32>, vector<72x256xf32>, vector<8x256xf32> -> vector<8x256xf32>
    %34 = arith.addf %33, %13 : vector<8x256xf32>
    %cst_31 = arith.constant 0.000000e+00 : f32
    %35 = vector.broadcast %cst_31 : f32 to vector<8x256xf32>
    %36 = arith.maximumf %34, %35 : vector<8x256xf32>
    %c0_32 = arith.constant 0 : index
    %c0_33 = arith.constant 0 : index
    %37 = vector.load %arg10[%c0_32, %c0_33] : memref<1x512xf32, #tpu.memory_space<vmem>>, vector<1x256xf32>
    %38 = vector.broadcast %37 : vector<1x256xf32> to vector<8x256xf32>
    %39 = arith.mulf %36, %38 : vector<8x256xf32>
    %c0_34 = arith.constant 0 : index
    %c128_35 = arith.constant 128 : index
    %40 = vector.load %arg13[%c0_34, %c128_35] : memref<8x768xf32, #tpu.memory_space<vmem>>, vector<8x256xf32>
    tpu.vector_store %arg13[%c0_34, %c128_35], %39 {strides = array<i32>} : memref<8x768xf32, #tpu.memory_space<vmem>>, vector<8x256xf32>,
    %c0_36 = arith.constant 0 : index
    %c0_37 = arith.constant 0 : index
    %c365 = arith.constant 365 : index
    %41 = vector.load %arg1[%c0_36, %c0_37, %c365] : memref<1x8x768xf32, #tpu.memory_space<vmem>>, vector<1x8x256xf32>
    %42 = vector.shape_cast %41 : vector<1x8x256xf32> to vector<8x256xf32>
    %c0_38 = arith.constant 0 : index
    %c0_39 = arith.constant 0 : index
    %c366 = arith.constant 366 : index
    %43 = vector.load %arg1[%c0_38, %c0_39, %c366] : memref<1x8x768xf32, #tpu.memory_space<vmem>>, vector<1x8x256xf32>
    %44 = vector.shape_cast %43 : vector<1x8x256xf32> to vector<8x256xf32>
    %c0_40 = arith.constant 0 : index
    %c0_41 = arith.constant 0 : index
    %c367 = arith.constant 367 : index
    %45 = vector.load %arg1[%c0_40, %c0_41, %c367] : memref<1x8x768xf32, #tpu.memory_space<vmem>>, vector<1x8x256xf32>
    %46 = vector.shape_cast %45 : vector<1x8x256xf32> to vector<8x256xf32>
    %c0_42 = arith.constant 0 : index
    %c0_43 = arith.constant 0 : index
    %c383 = arith.constant 383 : index
    %47 = vector.load %arg1[%c0_42, %c0_43, %c383] : memref<1x8x768xf32, #tpu.memory_space<vmem>>, vector<1x8x256xf32>
    %48 = vector.shape_cast %47 : vector<1x8x256xf32> to vector<8x256xf32>
    %c0_44 = arith.constant 0 : index
    %c0_45 = arith.constant 0 : index
    %c384 = arith.constant 384 : index
    %49 = vector.load %arg1[%c0_44, %c0_45, %c384] : memref<1x8x768xf32, #tpu.memory_space<vmem>>, vector<1x8x256xf32>
    %50 = vector.shape_cast %49 : vector<1x8x256xf32> to vector<8x256xf32>
    %c0_46 = arith.constant 0 : index
    %c0_47 = arith.constant 0 : index
    %c385 = arith.constant 385 : index
    %51 = vector.load %arg1[%c0_46, %c0_47, %c385] : memref<1x8x768xf32, #tpu.memory_space<vmem>>, vector<1x8x256xf32>
    %52 = vector.shape_cast %51 : vector<1x8x256xf32> to vector<8x256xf32>
    %c0_48 = arith.constant 0 : index
    %c0_49 = arith.constant 0 : index
    %c401 = arith.constant 401 : index
    %53 = vector.load %arg1[%c0_48, %c0_49, %c401] : memref<1x8x768xf32, #tpu.memory_space<vmem>>, vector<1x8x256xf32>
    %54 = vector.shape_cast %53 : vector<1x8x256xf32> to vector<8x256xf32>
    %c0_50 = arith.constant 0 : index
    %c0_51 = arith.constant 0 : index
    %c402 = arith.constant 402 : index
    %55 = vector.load %arg1[%c0_50, %c0_51, %c402] : memref<1x8x768xf32, #tpu.memory_space<vmem>>, vector<1x8x256xf32>
    %56 = vector.shape_cast %55 : vector<1x8x256xf32> to vector<8x256xf32>
    %c0_52 = arith.constant 0 : index
    %c0_53 = arith.constant 0 : index
    %c403 = arith.constant 403 : index
    %57 = vector.load %arg1[%c0_52, %c0_53, %c403] : memref<1x8x768xf32, #tpu.memory_space<vmem>>, vector<1x8x256xf32>
    %58 = vector.shape_cast %57 : vector<1x8x256xf32> to vector<8x256xf32>
    %59 = tpu.concatenate %42, %44, %46, %48, %50, %52, %54, %56, %58 in 0 : vector<8x256xf32>, vector<8x256xf32>, vector<8x256xf32>, vector<8x256xf32>, vector<8x256xf32>, vector<8x256xf32>, vector<8x256xf32>, vector<8x256xf32>, vector<8x256xf32> -> vector<72x256xf32>
    %cst_54 = arith.constant dense<0.000000e+00> : vector<8x256xf32>
    %60 = tpu.matmul %10, %59, %cst_54 {dimension_numbers = #tpu.dot_dimension_numbers<[1], [0], [0], [1], [0, 0, 1, 1], [], []>} : vector<8x72xf32>, vector<72x256xf32>, vector<8x256xf32> -> vector<8x256xf32>
    %61 = arith.addf %60, %13 : vector<8x256xf32>
    %cst_55 = arith.constant 0.000000e+00 : f32
    %62 = vector.broadcast %cst_55 : f32 to vector<8x256xf32>
    %63 = arith.maximumf %61, %62 : vector<8x256xf32>
    %c0_56 = arith.constant 0 : index
    %c256 = arith.constant 256 : index
    %64 = vector.load %arg10[%c0_56, %c256] : memref<1x512xf32, #tpu.memory_space<vmem>>, vector<1x256xf32>
    %65 = vector.broadcast %64 : vector<1x256xf32> to vector<8x256xf32>
    %66 = arith.mulf %63, %65 : vector<8x256xf32>
    %c0_57 = arith.constant 0 : index
    %c384_58 = arith.constant 384 : index
    %67 = vector.load %arg13[%c0_57, %c384_58] : memref<8x768xf32, #tpu.memory_space<vmem>>, vector<8x256xf32>
    tpu.vector_store %arg13[%c0_57, %c384_58], %66 {strides = array<i32>} : memref<8x768xf32, #tpu.memory_space<vmem>>, vector<8x256xf32>,
    %c0_59 = arith.constant 0 : index
    %c0_60 = arith.constant 0 : index
    %68 = vector.load %arg4[%c0_59, %c0_60] : memref<32x72xf32, #tpu.memory_space<vmem>>, vector<32x72xf32>
    %c0_61 = arith.constant 0 : index
    %c0_62 = arith.constant 0 : index
    %69 = vector.load %arg5[%c0_61, %c0_62] : memref<32x1xf32, #tpu.memory_space<vmem>>, vector<32x1xf32>
    %70 = vector.shape_cast %69 : vector<32x1xf32> to vector<32x1xf32>
    %71 = vector.broadcast %70 : vector<32x1xf32> to vector<32x256xf32>
    %c0_63 = arith.constant 0 : index
    %c109_64 = arith.constant 109 : index
    %72 = vector.load %arg13[%c0_63, %c109_64] : memref<8x768xf32, #tpu.memory_space<vmem>>, vector<8x256xf32>
    %c0_65 = arith.constant 0 : index
    %c110_66 = arith.constant 110 : index
    %73 = vector.load %arg13[%c0_65, %c110_66] : memref<8x768xf32, #tpu.memory_space<vmem>>, vector<8x256xf32>
    %c0_67 = arith.constant 0 : index
    %c111_68 = arith.constant 111 : index
    %74 = vector.load %arg13[%c0_67, %c111_68] : memref<8x768xf32, #tpu.memory_space<vmem>>, vector<8x256xf32>
    %c0_69 = arith.constant 0 : index
    %c127_70 = arith.constant 127 : index
    %75 = vector.load %arg13[%c0_69, %c127_70] : memref<8x768xf32, #tpu.memory_space<vmem>>, vector<8x256xf32>
    %c0_71 = arith.constant 0 : index
    %c128_72 = arith.constant 128 : index
    %76 = vector.load %arg13[%c0_71, %c128_72] : memref<8x768xf32, #tpu.memory_space<vmem>>, vector<8x256xf32>
    %c0_73 = arith.constant 0 : index
    %c129_74 = arith.constant 129 : index
    %77 = vector.load %arg13[%c0_73, %c129_74] : memref<8x768xf32, #tpu.memory_space<vmem>>, vector<8x256xf32>
    %c0_75 = arith.constant 0 : index
    %c145_76 = arith.constant 145 : index
    %78 = vector.load %arg13[%c0_75, %c145_76] : memref<8x768xf32, #tpu.memory_space<vmem>>, vector<8x256xf32>
    %c0_77 = arith.constant 0 : index
    %c146_78 = arith.constant 146 : index
    %79 = vector.load %arg13[%c0_77, %c146_78] : memref<8x768xf32, #tpu.memory_space<vmem>>, vector<8x256xf32>
    %c0_79 = arith.constant 0 : index
    %c147_80 = arith.constant 147 : index
    %80 = vector.load %arg13[%c0_79, %c147_80] : memref<8x768xf32, #tpu.memory_space<vmem>>, vector<8x256xf32>
    %81 = tpu.concatenate %72, %73, %74, %75, %76, %77, %78, %79, %80 in 0 : vector<8x256xf32>, vector<8x256xf32>, vector<8x256xf32>, vector<8x256xf32>, vector<8x256xf32>, vector<8x256xf32>, vector<8x256xf32>, vector<8x256xf32>, vector<8x256xf32> -> vector<72x256xf32>
    %cst_81 = arith.constant dense<0.000000e+00> : vector<32x256xf32>
    %82 = tpu.matmul %68, %81, %cst_81 {dimension_numbers = #tpu.dot_dimension_numbers<[1], [0], [0], [1], [0, 0, 1, 1], [], []>} : vector<32x72xf32>, vector<72x256xf32>, vector<32x256xf32> -> vector<32x256xf32>
    %83 = arith.addf %82, %71 : vector<32x256xf32>
    %c0_82 = arith.constant 0 : index
    %c128_83 = arith.constant 128 : index
    %84 = vector.load %arg14[%c0_82, %c128_83] : memref<32x768xf32, #tpu.memory_space<vmem>>, vector<32x256xf32>
    tpu.vector_store %arg14[%c0_82, %c128_83], %83 {strides = array<i32>} : memref<32x768xf32, #tpu.memory_space<vmem>>, vector<32x256xf32>,
    %c0_84 = arith.constant 0 : index
    %c365_85 = arith.constant 365 : index
    %85 = vector.load %arg13[%c0_84, %c365_85] : memref<8x768xf32, #tpu.memory_space<vmem>>, vector<8x256xf32>
    %c0_86 = arith.constant 0 : index
    %c366_87 = arith.constant 366 : index
    %86 = vector.load %arg13[%c0_86, %c366_87] : memref<8x768xf32, #tpu.memory_space<vmem>>, vector<8x256xf32>
    %c0_88 = arith.constant 0 : index
    %c367_89 = arith.constant 367 : index
    %87 = vector.load %arg13[%c0_88, %c367_89] : memref<8x768xf32, #tpu.memory_space<vmem>>, vector<8x256xf32>
    %c0_90 = arith.constant 0 : index
    %c383_91 = arith.constant 383 : index
    %88 = vector.load %arg13[%c0_90, %c383_91] : memref<8x768xf32, #tpu.memory_space<vmem>>, vector<8x256xf32>
    %c0_92 = arith.constant 0 : index
    %c384_93 = arith.constant 384 : index
    %89 = vector.load %arg13[%c0_92, %c384_93] : memref<8x768xf32, #tpu.memory_space<vmem>>, vector<8x256xf32>
    %c0_94 = arith.constant 0 : index
    %c385_95 = arith.constant 385 : index
    %90 = vector.load %arg13[%c0_94, %c385_95] : memref<8x768xf32, #tpu.memory_space<vmem>>, vector<8x256xf32>
    %c0_96 = arith.constant 0 : index
    %c401_97 = arith.constant 401 : index
    %91 = vector.load %arg13[%c0_96, %c401_97] : memref<8x768xf32, #tpu.memory_space<vmem>>, vector<8x256xf32>
    %c0_98 = arith.constant 0 : index
    %c402_99 = arith.constant 402 : index
    %92 = vector.load %arg13[%c0_98, %c402_99] : memref<8x768xf32, #tpu.memory_space<vmem>>, vector<8x256xf32>
    %c0_100 = arith.constant 0 : index
    %c403_101 = arith.constant 403 : index
    %93 = vector.load %arg13[%c0_100, %c403_101] : memref<8x768xf32, #tpu.memory_space<vmem>>, vector<8x256xf32>
    %94 = tpu.concatenate %85, %86, %87, %88, %89, %90, %91, %92, %93 in 0 : vector<8x256xf32>, vector<8x256xf32>, vector<8x256xf32>, vector<8x256xf32>, vector<8x256xf32>, vector<8x256xf32>, vector<8x256xf32>, vector<8x256xf32>, vector<8x256xf32> -> vector<72x256xf32>
    %cst_102 = arith.constant dense<0.000000e+00> : vector<32x256xf32>
    %95 = tpu.matmul %68, %94, %cst_102 {dimension_numbers = #tpu.dot_dimension_numbers<[1], [0], [0], [1], [0, 0, 1, 1], [], []>} : vector<32x72xf32>, vector<72x256xf32>, vector<32x256xf32> -> vector<32x256xf32>
    %96 = arith.addf %95, %71 : vector<32x256xf32>
    %c0_103 = arith.constant 0 : index
    %c384_104 = arith.constant 384 : index
    %97 = vector.load %arg14[%c0_103, %c384_104] : memref<32x768xf32, #tpu.memory_space<vmem>>, vector<32x256xf32>
    tpu.vector_store %arg14[%c0_103, %c384_104], %96 {strides = array<i32>} : memref<32x768xf32, #tpu.memory_space<vmem>>, vector<32x256xf32>,
    %c0_105 = arith.constant 0 : index
    %c0_106 = arith.constant 0 : index
    %98 = vector.load %arg8[%c0_105, %c0_106] : memref<16x34xf32, #tpu.memory_space<vmem>>, vector<16x34xf32>
    %c0_107 = arith.constant 0 : index
    %c0_108 = arith.constant 0 : index
    %99 = vector.load %arg9[%c0_107, %c0_108] : memref<16x34xf32, #tpu.memory_space<vmem>>, vector<16x34xf32>
    %c0_109 = arith.constant 0 : index
    %c128_110 = arith.constant 128 : index
    %100 = vector.load %arg14[%c0_109, %c128_110] : memref<32x768xf32, #tpu.memory_space<vmem>>, vector<16x16xf32>
    %c0_111 = arith.constant 0 : index
    %c146_112 = arith.constant 146 : index
    %101 = vector.load %arg14[%c0_111, %c146_112] : memref<32x768xf32, #tpu.memory_space<vmem>>, vector<16x16xf32>
    %c0_113 = arith.constant 0 : index
    %c164 = arith.constant 164 : index
    %102 = vector.load %arg14[%c0_113, %c164] : memref<32x768xf32, #tpu.memory_space<vmem>>, vector<16x16xf32>
    %c0_114 = arith.constant 0 : index
    %c182 = arith.constant 182 : index
    %103 = vector.load %arg14[%c0_114, %c182] : memref<32x768xf32, #tpu.memory_space<vmem>>, vector<16x16xf32>
    %104 = tpu.concatenate %100, %101, %102, %103 in 0 : vector<16x16xf32>, vector<16x16xf32>, vector<16x16xf32>, vector<16x16xf32> -> vector<64x16xf32>
    %c16 = arith.constant 16 : index
    %c128_115 = arith.constant 128 : index
    %105 = vector.load %arg14[%c16, %c128_115] : memref<32x768xf32, #tpu.memory_space<vmem>>, vector<16x16xf32>
    %c16_116 = arith.constant 16 : index
    %c146_117 = arith.constant 146 : index
    %106 = vector.load %arg14[%c16_116, %c146_117] : memref<32x768xf32, #tpu.memory_space<vmem>>, vector<16x16xf32>
    %c16_118 = arith.constant 16 : index
    %c164_119 = arith.constant 164 : index
    %107 = vector.load %arg14[%c16_118, %c164_119] : memref<32x768xf32, #tpu.memory_space<vmem>>, vector<16x16xf32>
    %c16_120 = arith.constant 16 : index
    %c182_121 = arith.constant 182 : index
    %108 = vector.load %arg14[%c16_120, %c182_121] : memref<32x768xf32, #tpu.memory_space<vmem>>, vector<16x16xf32>
    %109 = tpu.concatenate %105, %106, %107, %108 in 0 : vector<16x16xf32>, vector<16x16xf32>, vector<16x16xf32>, vector<16x16xf32> -> vector<64x16xf32>
    %cst_122 = arith.constant dense<0.000000e+00> : vector<64x34xf32>
    %110 = tpu.matmul %104, %98, %cst_122 {dimension_numbers = #tpu.dot_dimension_numbers<[1], [0], [0], [1], [0, 0, 1, 1], [], []>} : vector<64x16xf32>, vector<16x34xf32>, vector<64x34xf32> -> vector<64x34xf32>
    %cst_123 = arith.constant dense<0.000000e+00> : vector<64x34xf32>
    %111 = tpu.matmul %109, %99, %cst_123 {dimension_numbers = #tpu.dot_dimension_numbers<[1], [0], [0], [1], [0, 0, 1, 1], [], []>} : vector<64x16xf32>, vector<16x34xf32>, vector<64x34xf32> -> vector<64x34xf32>
    %112 = arith.addf %110, %111 : vector<64x34xf32>
    %113 = vector.extract_strided_slice %112 {offsets = [0, 0], sizes = [8, 34], strides = [1, 1]} : vector<64x34xf32> to vector<8x34xf32>
    %c0_124 = arith.constant 0 : index
    %c0_125 = arith.constant 0 : index
    %c128_126 = arith.constant 128 : index
    %114 = vector.load %arg11[%c0_124, %c0_125, %c128_126] : memref<1x8x1536xf32, #tpu.memory_space<vmem>>, vector<1x8x34xf32>
    %115 = vector.shape_cast %114 : vector<1x8x34xf32> to vector<8x34xf32>
    %116 = vector.shape_cast %113 : vector<8x34xf32> to vector<1x8x34xf32>
    tpu.vector_store %arg11[%c0_124, %c0_125, %c128_126], %116 {strides = array<i32>} : memref<1x8x1536xf32, #tpu.memory_space<vmem>>, vector<1x8x34xf32>,
    %117 = vector.extract_strided_slice %112 {offsets = [8, 0], sizes = [8, 34], strides = [1, 1]} : vector<64x34xf32> to vector<8x34xf32>
    %c0_127 = arith.constant 0 : index
    %c0_128 = arith.constant 0 : index
    %c162 = arith.constant 162 : index
    %118 = vector.load %arg11[%c0_127, %c0_128, %c162] : memref<1x8x1536xf32, #tpu.memory_space<vmem>>, vector<1x8x34xf32>
    %119 = vector.shape_cast %118 : vector<1x8x34xf32> to vector<8x34xf32>
    %120 = vector.shape_cast %117 : vector<8x34xf32> to vector<1x8x34xf32>
    tpu.vector_store %arg11[%c0_127, %c0_128, %c162], %120 {strides = array<i32>} : memref<1x8x1536xf32, #tpu.memory_space<vmem>>, vector<1x8x34xf32>,
    %121 = vector.extract_strided_slice %112 {offsets = [16, 0], sizes = [8, 34], strides = [1, 1]} : vector<64x34xf32> to vector<8x34xf32>
    %c0_129 = arith.constant 0 : index
    %c0_130 = arith.constant 0 : index
    %c196 = arith.constant 196 : index
    %122 = vector.load %arg11[%c0_129, %c0_130, %c196] : memref<1x8x1536xf32, #tpu.memory_space<vmem>>, vector<1x8x34xf32>
    %123 = vector.shape_cast %122 : vector<1x8x34xf32> to vector<8x34xf32>
    %124 = vector.shape_cast %121 : vector<8x34xf32> to vector<1x8x34xf32>
    tpu.vector_store %arg11[%c0_129, %c0_130, %c196], %124 {strides = array<i32>} : memref<1x8x1536xf32, #tpu.memory_space<vmem>>, vector<1x8x34xf32>,
    %125 = vector.extract_strided_slice %112 {offsets = [24, 0], sizes = [8, 34], strides = [1, 1]} : vector<64x34xf32> to vector<8x34xf32>
    %c0_131 = arith.constant 0 : index
    %c0_132 = arith.constant 0 : index
    %c230 = arith.constant 230 : index
    %126 = vector.load %arg11[%c0_131, %c0_132, %c230] : memref<1x8x1536xf32, #tpu.memory_space<vmem>>, vector<1x8x34xf32>
    %127 = vector.shape_cast %126 : vector<1x8x34xf32> to vector<8x34xf32>
    %128 = vector.shape_cast %125 : vector<8x34xf32> to vector<1x8x34xf32>
    tpu.vector_store %arg11[%c0_131, %c0_132, %c230], %128 {strides = array<i32>} : memref<1x8x1536xf32, #tpu.memory_space<vmem>>, vector<1x8x34xf32>,
    %129 = vector.extract_strided_slice %112 {offsets = [32, 0], sizes = [8, 34], strides = [1, 1]} : vector<64x34xf32> to vector<8x34xf32>
    %c0_133 = arith.constant 0 : index
    %c0_134 = arith.constant 0 : index
    %c264 = arith.constant 264 : index
    %130 = vector.load %arg11[%c0_133, %c0_134, %c264] : memref<1x8x1536xf32, #tpu.memory_space<vmem>>, vector<1x8x34xf32>
    %131 = vector.shape_cast %130 : vector<1x8x34xf32> to vector<8x34xf32>
    %132 = vector.shape_cast %129 : vector<8x34xf32> to vector<1x8x34xf32>
    tpu.vector_store %arg11[%c0_133, %c0_134, %c264], %132 {strides = array<i32>} : memref<1x8x1536xf32, #tpu.memory_space<vmem>>, vector<1x8x34xf32>,
    %133 = vector.extract_strided_slice %112 {offsets = [40, 0], sizes = [8, 34], strides = [1, 1]} : vector<64x34xf32> to vector<8x34xf32>
    %c0_135 = arith.constant 0 : index
    %c0_136 = arith.constant 0 : index
    %c298 = arith.constant 298 : index
    %134 = vector.load %arg11[%c0_135, %c0_136, %c298] : memref<1x8x1536xf32, #tpu.memory_space<vmem>>, vector<1x8x34xf32>
    %135 = vector.shape_cast %134 : vector<1x8x34xf32> to vector<8x34xf32>
    %136 = vector.shape_cast %133 : vector<8x34xf32> to vector<1x8x34xf32>
    tpu.vector_store %arg11[%c0_135, %c0_136, %c298], %136 {strides = array<i32>} : memref<1x8x1536xf32, #tpu.memory_space<vmem>>, vector<1x8x34xf32>,
    %137 = vector.extract_strided_slice %112 {offsets = [48, 0], sizes = [8, 34], strides = [1, 1]} : vector<64x34xf32> to vector<8x34xf32>
    %c0_137 = arith.constant 0 : index
    %c0_138 = arith.constant 0 : index
    %c332 = arith.constant 332 : index
    %138 = vector.load %arg11[%c0_137, %c0_138, %c332] : memref<1x8x1536xf32, #tpu.memory_space<vmem>>, vector<1x8x34xf32>
    %139 = vector.shape_cast %138 : vector<1x8x34xf32> to vector<8x34xf32>
    %140 = vector.shape_cast %137 : vector<8x34xf32> to vector<1x8x34xf32>
    tpu.vector_store %arg11[%c0_137, %c0_138, %c332], %140 {strides = array<i32>} : memref<1x8x1536xf32, #tpu.memory_space<vmem>>, vector<1x8x34xf32>,
    %141 = vector.extract_strided_slice %112 {offsets = [56, 0], sizes = [8, 34], strides = [1, 1]} : vector<64x34xf32> to vector<8x34xf32>
    %c0_139 = arith.constant 0 : index
    %c0_140 = arith.constant 0 : index
    %c366_141 = arith.constant 366 : index
    %142 = vector.load %arg11[%c0_139, %c0_140, %c366_141] : memref<1x8x1536xf32, #tpu.memory_space<vmem>>, vector<1x8x34xf32>
    %143 = vector.shape_cast %142 : vector<1x8x34xf32> to vector<8x34xf32>
    %144 = vector.shape_cast %141 : vector<8x34xf32> to vector<1x8x34xf32>
    tpu.vector_store %arg11[%c0_139, %c0_140, %c366_141], %144 {strides = array<i32>} : memref<1x8x1536xf32, #tpu.memory_space<vmem>>, vector<1x8x34xf32>,
    %c0_142 = arith.constant 0 : index
    %c200 = arith.constant 200 : index
    %145 = vector.load %arg14[%c0_142, %c200] : memref<32x768xf32, #tpu.memory_space<vmem>>, vector<16x16xf32>
    %c0_143 = arith.constant 0 : index
    %c218 = arith.constant 218 : index
    %146 = vector.load %arg14[%c0_143, %c218] : memref<32x768xf32, #tpu.memory_space<vmem>>, vector<16x16xf32>
    %c0_144 = arith.constant 0 : index
    %c236 = arith.constant 236 : index
    %147 = vector.load %arg14[%c0_144, %c236] : memref<32x768xf32, #tpu.memory_space<vmem>>, vector<16x16xf32>
    %c0_145 = arith.constant 0 : index
    %c254 = arith.constant 254 : index
    %148 = vector.load %arg14[%c0_145, %c254] : memref<32x768xf32, #tpu.memory_space<vmem>>, vector<16x16xf32>
    %149 = tpu.concatenate %145, %146, %147, %148 in 0 : vector<16x16xf32>, vector<16x16xf32>, vector<16x16xf32>, vector<16x16xf32> -> vector<64x16xf32>
    %c16_146 = arith.constant 16 : index
    %c200_147 = arith.constant 200 : index
    %150 = vector.load %arg14[%c16_146, %c200_147] : memref<32x768xf32, #tpu.memory_space<vmem>>, vector<16x16xf32>
    %c16_148 = arith.constant 16 : index
    %c218_149 = arith.constant 218 : index
    %151 = vector.load %arg14[%c16_148, %c218_149] : memref<32x768xf32, #tpu.memory_space<vmem>>, vector<16x16xf32>
    %c16_150 = arith.constant 16 : index
    %c236_151 = arith.constant 236 : index
    %152 = vector.load %arg14[%c16_150, %c236_151] : memref<32x768xf32, #tpu.memory_space<vmem>>, vector<16x16xf32>
    %c16_152 = arith.constant 16 : index
    %c254_153 = arith.constant 254 : index
    %153 = vector.load %arg14[%c16_152, %c254_153] : memref<32x768xf32, #tpu.memory_space<vmem>>, vector<16x16xf32>
    %154 = tpu.concatenate %150, %151, %152, %153 in 0 : vector<16x16xf32>, vector<16x16xf32>, vector<16x16xf32>, vector<16x16xf32> -> vector<64x16xf32>
    %cst_154 = arith.constant dense<0.000000e+00> : vector<64x34xf32>
    %155 = tpu.matmul %149, %98, %cst_154 {dimension_numbers = #tpu.dot_dimension_numbers<[1], [0], [0], [1], [0, 0, 1, 1], [], []>} : vector<64x16xf32>, vector<16x34xf32>, vector<64x34xf32> -> vector<64x34xf32>
    %cst_155 = arith.constant dense<0.000000e+00> : vector<64x34xf32>
    %156 = tpu.matmul %154, %99, %cst_155 {dimension_numbers = #tpu.dot_dimension_numbers<[1], [0], [0], [1], [0, 0, 1, 1], [], []>} : vector<64x16xf32>, vector<16x34xf32>, vector<64x34xf32> -> vector<64x34xf32>
    %157 = arith.addf %155, %156 : vector<64x34xf32>
    %158 = vector.extract_strided_slice %157 {offsets = [0, 0], sizes = [8, 34], strides = [1, 1]} : vector<64x34xf32> to vector<8x34xf32>
    %c0_156 = arith.constant 0 : index
    %c0_157 = arith.constant 0 : index
    %c400 = arith.constant 400 : index
    %159 = vector.load %arg11[%c0_156, %c0_157, %c400] : memref<1x8x1536xf32, #tpu.memory_space<vmem>>, vector<1x8x34xf32>
    %160 = vector.shape_cast %159 : vector<1x8x34xf32> to vector<8x34xf32>
    %161 = vector.shape_cast %158 : vector<8x34xf32> to vector<1x8x34xf32>
    tpu.vector_store %arg11[%c0_156, %c0_157, %c400], %161 {strides = array<i32>} : memref<1x8x1536xf32, #tpu.memory_space<vmem>>, vector<1x8x34xf32>,
    %162 = vector.extract_strided_slice %157 {offsets = [8, 0], sizes = [8, 34], strides = [1, 1]} : vector<64x34xf32> to vector<8x34xf32>
    %c0_158 = arith.constant 0 : index
    %c0_159 = arith.constant 0 : index
    %c434 = arith.constant 434 : index
    %163 = vector.load %arg11[%c0_158, %c0_159, %c434] : memref<1x8x1536xf32, #tpu.memory_space<vmem>>, vector<1x8x34xf32>
    %164 = vector.shape_cast %163 : vector<1x8x34xf32> to vector<8x34xf32>
    %165 = vector.shape_cast %162 : vector<8x34xf32> to vector<1x8x34xf32>
    tpu.vector_store %arg11[%c0_158, %c0_159, %c434], %165 {strides = array<i32>} : memref<1x8x1536xf32, #tpu.memory_space<vmem>>, vector<1x8x34xf32>,
    %166 = vector.extract_strided_slice %157 {offsets = [16, 0], sizes = [8, 34], strides = [1, 1]} : vector<64x34xf32> to vector<8x34xf32>
    %c0_160 = arith.constant 0 : index
    %c0_161 = arith.constant 0 : index
    %c468 = arith.constant 468 : index
    %167 = vector.load %arg11[%c0_160, %c0_161, %c468] : memref<1x8x1536xf32, #tpu.memory_space<vmem>>, vector<1x8x34xf32>
    %168 = vector.shape_cast %167 : vector<1x8x34xf32> to vector<8x34xf32>
    %169 = vector.shape_cast %166 : vector<8x34xf32> to vector<1x8x34xf32>
    tpu.vector_store %arg11[%c0_160, %c0_161, %c468], %169 {strides = array<i32>} : memref<1x8x1536xf32, #tpu.memory_space<vmem>>, vector<1x8x34xf32>,
    %170 = vector.extract_strided_slice %157 {offsets = [24, 0], sizes = [8, 34], strides = [1, 1]} : vector<64x34xf32> to vector<8x34xf32>
    %c0_162 = arith.constant 0 : index
    %c0_163 = arith.constant 0 : index
    %c502 = arith.constant 502 : index
    %171 = vector.load %arg11[%c0_162, %c0_163, %c502] : memref<1x8x1536xf32, #tpu.memory_space<vmem>>, vector<1x8x34xf32>
    %172 = vector.shape_cast %171 : vector<1x8x34xf32> to vector<8x34xf32>
    %173 = vector.shape_cast %170 : vector<8x34xf32> to vector<1x8x34xf32>
    tpu.vector_store %arg11[%c0_162, %c0_163, %c502], %173 {strides = array<i32>} : memref<1x8x1536xf32, #tpu.memory_space<vmem>>, vector<1x8x34xf32>,
    %174 = vector.extract_strided_slice %157 {offsets = [32, 0], sizes = [8, 34], strides = [1, 1]} : vector<64x34xf32> to vector<8x34xf32>
    %c0_164 = arith.constant 0 : index
    %c0_165 = arith.constant 0 : index
    %c536 = arith.constant 536 : index
    %175 = vector.load %arg11[%c0_164, %c0_165, %c536] : memref<1x8x1536xf32, #tpu.memory_space<vmem>>, vector<1x8x34xf32>
    %176 = vector.shape_cast %175 : vector<1x8x34xf32> to vector<8x34xf32>
    %177 = vector.shape_cast %174 : vector<8x34xf32> to vector<1x8x34xf32>
    tpu.vector_store %arg11[%c0_164, %c0_165, %c536], %177 {strides = array<i32>} : memref<1x8x1536xf32, #tpu.memory_space<vmem>>, vector<1x8x34xf32>,
    %178 = vector.extract_strided_slice %157 {offsets = [40, 0], sizes = [8, 34], strides = [1, 1]} : vector<64x34xf32> to vector<8x34xf32>
    %c0_166 = arith.constant 0 : index
    %c0_167 = arith.constant 0 : index
    %c570 = arith.constant 570 : index
    %179 = vector.load %arg11[%c0_166, %c0_167, %c570] : memref<1x8x1536xf32, #tpu.memory_space<vmem>>, vector<1x8x34xf32>
    %180 = vector.shape_cast %179 : vector<1x8x34xf32> to vector<8x34xf32>
    %181 = vector.shape_cast %178 : vector<8x34xf32> to vector<1x8x34xf32>
    tpu.vector_store %arg11[%c0_166, %c0_167, %c570], %181 {strides = array<i32>} : memref<1x8x1536xf32, #tpu.memory_space<vmem>>, vector<1x8x34xf32>,
    %182 = vector.extract_strided_slice %157 {offsets = [48, 0], sizes = [8, 34], strides = [1, 1]} : vector<64x34xf32> to vector<8x34xf32>
    %c0_168 = arith.constant 0 : index
    %c0_169 = arith.constant 0 : index
    %c604 = arith.constant 604 : index
    %183 = vector.load %arg11[%c0_168, %c0_169, %c604] : memref<1x8x1536xf32, #tpu.memory_space<vmem>>, vector<1x8x34xf32>
    %184 = vector.shape_cast %183 : vector<1x8x34xf32> to vector<8x34xf32>
    %185 = vector.shape_cast %182 : vector<8x34xf32> to vector<1x8x34xf32>
    tpu.vector_store %arg11[%c0_168, %c0_169, %c604], %185 {strides = array<i32>} : memref<1x8x1536xf32, #tpu.memory_space<vmem>>, vector<1x8x34xf32>,
    %186 = vector.extract_strided_slice %157 {offsets = [56, 0], sizes = [8, 34], strides = [1, 1]} : vector<64x34xf32> to vector<8x34xf32>
    %c0_170 = arith.constant 0 : index
    %c0_171 = arith.constant 0 : index
    %c638 = arith.constant 638 : index
    %187 = vector.load %arg11[%c0_170, %c0_171, %c638] : memref<1x8x1536xf32, #tpu.memory_space<vmem>>, vector<1x8x34xf32>
    %188 = vector.shape_cast %187 : vector<1x8x34xf32> to vector<8x34xf32>
    %189 = vector.shape_cast %186 : vector<8x34xf32> to vector<1x8x34xf32>
    tpu.vector_store %arg11[%c0_170, %c0_171, %c638], %189 {strides = array<i32>} : memref<1x8x1536xf32, #tpu.memory_space<vmem>>, vector<1x8x34xf32>,
    %c0_172 = arith.constant 0 : index
    %c272 = arith.constant 272 : index
    %190 = vector.load %arg14[%c0_172, %c272] : memref<32x768xf32, #tpu.memory_space<vmem>>, vector<16x16xf32>
    %c0_173 = arith.constant 0 : index
    %c290 = arith.constant 290 : index
    %191 = vector.load %arg14[%c0_173, %c290] : memref<32x768xf32, #tpu.memory_space<vmem>>, vector<16x16xf32>
    %c0_174 = arith.constant 0 : index
    %c308 = arith.constant 308 : index
    %192 = vector.load %arg14[%c0_174, %c308] : memref<32x768xf32, #tpu.memory_space<vmem>>, vector<16x16xf32>
    %c0_175 = arith.constant 0 : index
    %c326 = arith.constant 326 : index
    %193 = vector.load %arg14[%c0_175, %c326] : memref<32x768xf32, #tpu.memory_space<vmem>>, vector<16x16xf32>
    %194 = tpu.concatenate %190, %191, %192, %193 in 0 : vector<16x16xf32>, vector<16x16xf32>, vector<16x16xf32>, vector<16x16xf32> -> vector<64x16xf32>
    %c16_176 = arith.constant 16 : index
    %c272_177 = arith.constant 272 : index
    %195 = vector.load %arg14[%c16_176, %c272_177] : memref<32x768xf32, #tpu.memory_space<vmem>>, vector<16x16xf32>
    %c16_178 = arith.constant 16 : index
    %c290_179 = arith.constant 290 : index
    %196 = vector.load %arg14[%c16_178, %c290_179] : memref<32x768xf32, #tpu.memory_space<vmem>>, vector<16x16xf32>
    %c16_180 = arith.constant 16 : index
    %c308_181 = arith.constant 308 : index
    %197 = vector.load %arg14[%c16_180, %c308_181] : memref<32x768xf32, #tpu.memory_space<vmem>>, vector<16x16xf32>
    %c16_182 = arith.constant 16 : index
    %c326_183 = arith.constant 326 : index
    %198 = vector.load %arg14[%c16_182, %c326_183] : memref<32x768xf32, #tpu.memory_space<vmem>>, vector<16x16xf32>
    %199 = tpu.concatenate %195, %196, %197, %198 in 0 : vector<16x16xf32>, vector<16x16xf32>, vector<16x16xf32>, vector<16x16xf32> -> vector<64x16xf32>
    %cst_184 = arith.constant dense<0.000000e+00> : vector<64x34xf32>
    %200 = tpu.matmul %194, %98, %cst_184 {dimension_numbers = #tpu.dot_dimension_numbers<[1], [0], [0], [1], [0, 0, 1, 1], [], []>} : vector<64x16xf32>, vector<16x34xf32>, vector<64x34xf32> -> vector<64x34xf32>
    %cst_185 = arith.constant dense<0.000000e+00> : vector<64x34xf32>
    %201 = tpu.matmul %199, %99, %cst_185 {dimension_numbers = #tpu.dot_dimension_numbers<[1], [0], [0], [1], [0, 0, 1, 1], [], []>} : vector<64x16xf32>, vector<16x34xf32>, vector<64x34xf32> -> vector<64x34xf32>
    %202 = arith.addf %200, %201 : vector<64x34xf32>
    %203 = vector.extract_strided_slice %202 {offsets = [0, 0], sizes = [8, 34], strides = [1, 1]} : vector<64x34xf32> to vector<8x34xf32>
    %c0_186 = arith.constant 0 : index
    %c0_187 = arith.constant 0 : index
    %c672 = arith.constant 672 : index
    %204 = vector.load %arg11[%c0_186, %c0_187, %c672] : memref<1x8x1536xf32, #tpu.memory_space<vmem>>, vector<1x8x34xf32>
    %205 = vector.shape_cast %204 : vector<1x8x34xf32> to vector<8x34xf32>
    %206 = vector.shape_cast %203 : vector<8x34xf32> to vector<1x8x34xf32>
    tpu.vector_store %arg11[%c0_186, %c0_187, %c672], %206 {strides = array<i32>} : memref<1x8x1536xf32, #tpu.memory_space<vmem>>, vector<1x8x34xf32>,
    %207 = vector.extract_strided_slice %202 {offsets = [8, 0], sizes = [8, 34], strides = [1, 1]} : vector<64x34xf32> to vector<8x34xf32>
    %c0_188 = arith.constant 0 : index
    %c0_189 = arith.constant 0 : index
    %c706 = arith.constant 706 : index
    %208 = vector.load %arg11[%c0_188, %c0_189, %c706] : memref<1x8x1536xf32, #tpu.memory_space<vmem>>, vector<1x8x34xf32>
    %209 = vector.shape_cast %208 : vector<1x8x34xf32> to vector<8x34xf32>
    %210 = vector.shape_cast %207 : vector<8x34xf32> to vector<1x8x34xf32>
    tpu.vector_store %arg11[%c0_188, %c0_189, %c706], %210 {strides = array<i32>} : memref<1x8x1536xf32, #tpu.memory_space<vmem>>, vector<1x8x34xf32>,
    %211 = vector.extract_strided_slice %202 {offsets = [16, 0], sizes = [8, 34], strides = [1, 1]} : vector<64x34xf32> to vector<8x34xf32>
    %c0_190 = arith.constant 0 : index
    %c0_191 = arith.constant 0 : index
    %c740 = arith.constant 740 : index
    %212 = vector.load %arg11[%c0_190, %c0_191, %c740] : memref<1x8x1536xf32, #tpu.memory_space<vmem>>, vector<1x8x34xf32>
    %213 = vector.shape_cast %212 : vector<1x8x34xf32> to vector<8x34xf32>
    %214 = vector.shape_cast %211 : vector<8x34xf32> to vector<1x8x34xf32>
    tpu.vector_store %arg11[%c0_190, %c0_191, %c740], %214 {strides = array<i32>} : memref<1x8x1536xf32, #tpu.memory_space<vmem>>, vector<1x8x34xf32>,
    %215 = vector.extract_strided_slice %202 {offsets = [24, 0], sizes = [8, 34], strides = [1, 1]} : vector<64x34xf32> to vector<8x34xf32>
    %c0_192 = arith.constant 0 : index
    %c0_193 = arith.constant 0 : index
    %c774 = arith.constant 774 : index
    %216 = vector.load %arg11[%c0_192, %c0_193, %c774] : memref<1x8x1536xf32, #tpu.memory_space<vmem>>, vector<1x8x34xf32>
    %217 = vector.shape_cast %216 : vector<1x8x34xf32> to vector<8x34xf32>
    %218 = vector.shape_cast %215 : vector<8x34xf32> to vector<1x8x34xf32>
    tpu.vector_store %arg11[%c0_192, %c0_193, %c774], %218 {strides = array<i32>} : memref<1x8x1536xf32, #tpu.memory_space<vmem>>, vector<1x8x34xf32>,
    %219 = vector.extract_strided_slice %202 {offsets = [32, 0], sizes = [8, 34], strides = [1, 1]} : vector<64x34xf32> to vector<8x34xf32>
    %c0_194 = arith.constant 0 : index
    %c0_195 = arith.constant 0 : index
    %c808 = arith.constant 808 : index
    %220 = vector.load %arg11[%c0_194, %c0_195, %c808] : memref<1x8x1536xf32, #tpu.memory_space<vmem>>, vector<1x8x34xf32>
    %221 = vector.shape_cast %220 : vector<1x8x34xf32> to vector<8x34xf32>
    %222 = vector.shape_cast %219 : vector<8x34xf32> to vector<1x8x34xf32>
    tpu.vector_store %arg11[%c0_194, %c0_195, %c808], %222 {strides = array<i32>} : memref<1x8x1536xf32, #tpu.memory_space<vmem>>, vector<1x8x34xf32>,
    %223 = vector.extract_strided_slice %202 {offsets = [40, 0], sizes = [8, 34], strides = [1, 1]} : vector<64x34xf32> to vector<8x34xf32>
    %c0_196 = arith.constant 0 : index
    %c0_197 = arith.constant 0 : index
    %c842 = arith.constant 842 : index
    %224 = vector.load %arg11[%c0_196, %c0_197, %c842] : memref<1x8x1536xf32, #tpu.memory_space<vmem>>, vector<1x8x34xf32>
    %225 = vector.shape_cast %224 : vector<1x8x34xf32> to vector<8x34xf32>
    %226 = vector.shape_cast %223 : vector<8x34xf32> to vector<1x8x34xf32>
    tpu.vector_store %arg11[%c0_196, %c0_197, %c842], %226 {strides = array<i32>} : memref<1x8x1536xf32, #tpu.memory_space<vmem>>, vector<1x8x34xf32>,
    %227 = vector.extract_strided_slice %202 {offsets = [48, 0], sizes = [8, 34], strides = [1, 1]} : vector<64x34xf32> to vector<8x34xf32>
    %c0_198 = arith.constant 0 : index
    %c0_199 = arith.constant 0 : index
    %c876 = arith.constant 876 : index
    %228 = vector.load %arg11[%c0_198, %c0_199, %c876] : memref<1x8x1536xf32, #tpu.memory_space<vmem>>, vector<1x8x34xf32>
    %229 = vector.shape_cast %228 : vector<1x8x34xf32> to vector<8x34xf32>
    %230 = vector.shape_cast %227 : vector<8x34xf32> to vector<1x8x34xf32>
    tpu.vector_store %arg11[%c0_198, %c0_199, %c876], %230 {strides = array<i32>} : memref<1x8x1536xf32, #tpu.memory_space<vmem>>, vector<1x8x34xf32>,
    %231 = vector.extract_strided_slice %202 {offsets = [56, 0], sizes = [8, 34], strides = [1, 1]} : vector<64x34xf32> to vector<8x34xf32>
    %c0_200 = arith.constant 0 : index
    %c0_201 = arith.constant 0 : index
    %c910 = arith.constant 910 : index
    %232 = vector.load %arg11[%c0_200, %c0_201, %c910] : memref<1x8x1536xf32, #tpu.memory_space<vmem>>, vector<1x8x34xf32>
    %233 = vector.shape_cast %232 : vector<1x8x34xf32> to vector<8x34xf32>
    %234 = vector.shape_cast %231 : vector<8x34xf32> to vector<1x8x34xf32>
    tpu.vector_store %arg11[%c0_200, %c0_201, %c910], %234 {strides = array<i32>} : memref<1x8x1536xf32, #tpu.memory_space<vmem>>, vector<1x8x34xf32>,
    %c0_202 = arith.constant 0 : index
    %c344 = arith.constant 344 : index
    %235 = vector.load %arg14[%c0_202, %c344] : memref<32x768xf32, #tpu.memory_space<vmem>>, vector<16x16xf32>
    %c0_203 = arith.constant 0 : index
    %c362 = arith.constant 362 : index
    %236 = vector.load %arg14[%c0_203, %c362] : memref<32x768xf32, #tpu.memory_space<vmem>>, vector<16x16xf32>
    %c0_204 = arith.constant 0 : index
    %c380 = arith.constant 380 : index
    %237 = vector.load %arg14[%c0_204, %c380] : memref<32x768xf32, #tpu.memory_space<vmem>>, vector<16x16xf32>
    %c0_205 = arith.constant 0 : index
    %c398 = arith.constant 398 : index
    %238 = vector.load %arg14[%c0_205, %c398] : memref<32x768xf32, #tpu.memory_space<vmem>>, vector<16x16xf32>
    %239 = tpu.concatenate %235, %236, %237, %238 in 0 : vector<16x16xf32>, vector<16x16xf32>, vector<16x16xf32>, vector<16x16xf32> -> vector<64x16xf32>
    %c16_206 = arith.constant 16 : index
    %c344_207 = arith.constant 344 : index
    %240 = vector.load %arg14[%c16_206, %c344_207] : memref<32x768xf32, #tpu.memory_space<vmem>>, vector<16x16xf32>
    %c16_208 = arith.constant 16 : index
    %c362_209 = arith.constant 362 : index
    %241 = vector.load %arg14[%c16_208, %c362_209] : memref<32x768xf32, #tpu.memory_space<vmem>>, vector<16x16xf32>
    %c16_210 = arith.constant 16 : index
    %c380_211 = arith.constant 380 : index
    %242 = vector.load %arg14[%c16_210, %c380_211] : memref<32x768xf32, #tpu.memory_space<vmem>>, vector<16x16xf32>
    %c16_212 = arith.constant 16 : index
    %c398_213 = arith.constant 398 : index
    %243 = vector.load %arg14[%c16_212, %c398_213] : memref<32x768xf32, #tpu.memory_space<vmem>>, vector<16x16xf32>
    %244 = tpu.concatenate %240, %241, %242, %243 in 0 : vector<16x16xf32>, vector<16x16xf32>, vector<16x16xf32>, vector<16x16xf32> -> vector<64x16xf32>
    %cst_214 = arith.constant dense<0.000000e+00> : vector<64x34xf32>
    %245 = tpu.matmul %239, %98, %cst_214 {dimension_numbers = #tpu.dot_dimension_numbers<[1], [0], [0], [1], [0, 0, 1, 1], [], []>} : vector<64x16xf32>, vector<16x34xf32>, vector<64x34xf32> -> vector<64x34xf32>
    %cst_215 = arith.constant dense<0.000000e+00> : vector<64x34xf32>
    %246 = tpu.matmul %244, %99, %cst_215 {dimension_numbers = #tpu.dot_dimension_numbers<[1], [0], [0], [1], [0, 0, 1, 1], [], []>} : vector<64x16xf32>, vector<16x34xf32>, vector<64x34xf32> -> vector<64x34xf32>
    %247 = arith.addf %245, %246 : vector<64x34xf32>
    %248 = vector.extract_strided_slice %247 {offsets = [0, 0], sizes = [8, 34], strides = [1, 1]} : vector<64x34xf32> to vector<8x34xf32>
    %c0_216 = arith.constant 0 : index
    %c0_217 = arith.constant 0 : index
    %c944 = arith.constant 944 : index
    %249 = vector.load %arg11[%c0_216, %c0_217, %c944] : memref<1x8x1536xf32, #tpu.memory_space<vmem>>, vector<1x8x34xf32>
    %250 = vector.shape_cast %249 : vector<1x8x34xf32> to vector<8x34xf32>
    %251 = vector.shape_cast %248 : vector<8x34xf32> to vector<1x8x34xf32>
    tpu.vector_store %arg11[%c0_216, %c0_217, %c944], %251 {strides = array<i32>} : memref<1x8x1536xf32, #tpu.memory_space<vmem>>, vector<1x8x34xf32>,
    %252 = vector.extract_strided_slice %247 {offsets = [8, 0], sizes = [8, 34], strides = [1, 1]} : vector<64x34xf32> to vector<8x34xf32>
    %c0_218 = arith.constant 0 : index
    %c0_219 = arith.constant 0 : index
    %c978 = arith.constant 978 : index
    %253 = vector.load %arg11[%c0_218, %c0_219, %c978] : memref<1x8x1536xf32, #tpu.memory_space<vmem>>, vector<1x8x34xf32>
    %254 = vector.shape_cast %253 : vector<1x8x34xf32> to vector<8x34xf32>
    %255 = vector.shape_cast %252 : vector<8x34xf32> to vector<1x8x34xf32>
    tpu.vector_store %arg11[%c0_218, %c0_219, %c978], %255 {strides = array<i32>} : memref<1x8x1536xf32, #tpu.memory_space<vmem>>, vector<1x8x34xf32>,
    %256 = vector.extract_strided_slice %247 {offsets = [16, 0], sizes = [8, 34], strides = [1, 1]} : vector<64x34xf32> to vector<8x34xf32>
    %c0_220 = arith.constant 0 : index
    %c0_221 = arith.constant 0 : index
    %c1012 = arith.constant 1012 : index
    %257 = vector.load %arg11[%c0_220, %c0_221, %c1012] : memref<1x8x1536xf32, #tpu.memory_space<vmem>>, vector<1x8x34xf32>
    %258 = vector.shape_cast %257 : vector<1x8x34xf32> to vector<8x34xf32>
    %259 = vector.shape_cast %256 : vector<8x34xf32> to vector<1x8x34xf32>
    tpu.vector_store %arg11[%c0_220, %c0_221, %c1012], %259 {strides = array<i32>} : memref<1x8x1536xf32, #tpu.memory_space<vmem>>, vector<1x8x34xf32>,
    %260 = vector.extract_strided_slice %247 {offsets = [24, 0], sizes = [8, 34], strides = [1, 1]} : vector<64x34xf32> to vector<8x34xf32>
    %c0_222 = arith.constant 0 : index
    %c0_223 = arith.constant 0 : index
    %c1046 = arith.constant 1046 : index
    %261 = vector.load %arg11[%c0_222, %c0_223, %c1046] : memref<1x8x1536xf32, #tpu.memory_space<vmem>>, vector<1x8x34xf32>
    %262 = vector.shape_cast %261 : vector<1x8x34xf32> to vector<8x34xf32>
    %263 = vector.shape_cast %260 : vector<8x34xf32> to vector<1x8x34xf32>
    tpu.vector_store %arg11[%c0_222, %c0_223, %c1046], %263 {strides = array<i32>} : memref<1x8x1536xf32, #tpu.memory_space<vmem>>, vector<1x8x34xf32>,
    %264 = vector.extract_strided_slice %247 {offsets = [32, 0], sizes = [8, 34], strides = [1, 1]} : vector<64x34xf32> to vector<8x34xf32>
    %c0_224 = arith.constant 0 : index
    %c0_225 = arith.constant 0 : index
    %c1080 = arith.constant 1080 : index
    %265 = vector.load %arg11[%c0_224, %c0_225, %c1080] : memref<1x8x1536xf32, #tpu.memory_space<vmem>>, vector<1x8x34xf32>
    %266 = vector.shape_cast %265 : vector<1x8x34xf32> to vector<8x34xf32>
    %267 = vector.shape_cast %264 : vector<8x34xf32> to vector<1x8x34xf32>
    tpu.vector_store %arg11[%c0_224, %c0_225, %c1080], %267 {strides = array<i32>} : memref<1x8x1536xf32, #tpu.memory_space<vmem>>, vector<1x8x34xf32>,
    %268 = vector.extract_strided_slice %247 {offsets = [40, 0], sizes = [8, 34], strides = [1, 1]} : vector<64x34xf32> to vector<8x34xf32>
    %c0_226 = arith.constant 0 : index
    %c0_227 = arith.constant 0 : index
    %c1114 = arith.constant 1114 : index
    %269 = vector.load %arg11[%c0_226, %c0_227, %c1114] : memref<1x8x1536xf32, #tpu.memory_space<vmem>>, vector<1x8x34xf32>
    %270 = vector.shape_cast %269 : vector<1x8x34xf32> to vector<8x34xf32>
    %271 = vector.shape_cast %268 : vector<8x34xf32> to vector<1x8x34xf32>
    tpu.vector_store %arg11[%c0_226, %c0_227, %c1114], %271 {strides = array<i32>} : memref<1x8x1536xf32, #tpu.memory_space<vmem>>, vector<1x8x34xf32>,
    %272 = vector.extract_strided_slice %247 {offsets = [48, 0], sizes = [8, 34], strides = [1, 1]} : vector<64x34xf32> to vector<8x34xf32>
    %c0_228 = arith.constant 0 : index
    %c0_229 = arith.constant 0 : index
    %c1148 = arith.constant 1148 : index
    %273 = vector.load %arg11[%c0_228, %c0_229, %c1148] : memref<1x8x1536xf32, #tpu.memory_space<vmem>>, vector<1x8x34xf32>
    %274 = vector.shape_cast %273 : vector<1x8x34xf32> to vector<8x34xf32>
    %275 = vector.shape_cast %272 : vector<8x34xf32> to vector<1x8x34xf32>
    tpu.vector_store %arg11[%c0_228, %c0_229, %c1148], %275 {strides = array<i32>} : memref<1x8x1536xf32, #tpu.memory_space<vmem>>, vector<1x8x34xf32>,
    %276 = vector.extract_strided_slice %247 {offsets = [56, 0], sizes = [8, 34], strides = [1, 1]} : vector<64x34xf32> to vector<8x34xf32>
    %c0_230 = arith.constant 0 : index
    %c0_231 = arith.constant 0 : index
    %c1182 = arith.constant 1182 : index
    %277 = vector.load %arg11[%c0_230, %c0_231, %c1182] : memref<1x8x1536xf32, #tpu.memory_space<vmem>>, vector<1x8x34xf32>
    %278 = vector.shape_cast %277 : vector<1x8x34xf32> to vector<8x34xf32>
    %279 = vector.shape_cast %276 : vector<8x34xf32> to vector<1x8x34xf32>
    tpu.vector_store %arg11[%c0_230, %c0_231, %c1182], %279 {strides = array<i32>} : memref<1x8x1536xf32, #tpu.memory_space<vmem>>, vector<1x8x34xf32>,
    %c0_232 = arith.constant 0 : index
    %c0_233 = arith.constant 0 : index
    %280 = vector.load %arg6[%c0_232, %c0_233] : memref<3x72xf32, #tpu.memory_space<vmem>>, vector<3x72xf32>
    %c0_234 = arith.constant 0 : index
    %c0_235 = arith.constant 0 : index
    %281 = vector.load %arg7[%c0_234, %c0_235] : memref<3x1xf32, #tpu.memory_space<vmem>>, vector<3x1xf32>
    %282 = vector.shape_cast %281 : vector<3x1xf32> to vector<3x1xf32>
    %283 = vector.broadcast %282 : vector<3x1xf32> to vector<3x256xf32>
    %c0_236 = arith.constant 0 : index
    %c0_237 = arith.constant 0 : index
    %c93 = arith.constant 93 : index
    %284 = vector.load %arg11[%c0_236, %c0_237, %c93] : memref<1x8x1536xf32, #tpu.memory_space<vmem>>, vector<1x8x256xf32>
    %285 = vector.shape_cast %284 : vector<1x8x256xf32> to vector<8x256xf32>
    %c0_238 = arith.constant 0 : index
    %c0_239 = arith.constant 0 : index
    %c94 = arith.constant 94 : index
    %286 = vector.load %arg11[%c0_238, %c0_239, %c94] : memref<1x8x1536xf32, #tpu.memory_space<vmem>>, vector<1x8x256xf32>
    %287 = vector.shape_cast %286 : vector<1x8x256xf32> to vector<8x256xf32>
    %c0_240 = arith.constant 0 : index
    %c0_241 = arith.constant 0 : index
    %c95 = arith.constant 95 : index
    %288 = vector.load %arg11[%c0_240, %c0_241, %c95] : memref<1x8x1536xf32, #tpu.memory_space<vmem>>, vector<1x8x256xf32>
    %289 = vector.shape_cast %288 : vector<1x8x256xf32> to vector<8x256xf32>
    %c0_242 = arith.constant 0 : index
    %c0_243 = arith.constant 0 : index
    %c127_244 = arith.constant 127 : index
    %290 = vector.load %arg11[%c0_242, %c0_243, %c127_244] : memref<1x8x1536xf32, #tpu.memory_space<vmem>>, vector<1x8x256xf32>
    %291 = vector.shape_cast %290 : vector<1x8x256xf32> to vector<8x256xf32>
    %c0_245 = arith.constant 0 : index
    %c0_246 = arith.constant 0 : index
    %c128_247 = arith.constant 128 : index
    %292 = vector.load %arg11[%c0_245, %c0_246, %c128_247] : memref<1x8x1536xf32, #tpu.memory_space<vmem>>, vector<1x8x256xf32>
    %293 = vector.shape_cast %292 : vector<1x8x256xf32> to vector<8x256xf32>
    %c0_248 = arith.constant 0 : index
    %c0_249 = arith.constant 0 : index
    %c129_250 = arith.constant 129 : index
    %294 = vector.load %arg11[%c0_248, %c0_249, %c129_250] : memref<1x8x1536xf32, #tpu.memory_space<vmem>>, vector<1x8x256xf32>
    %295 = vector.shape_cast %294 : vector<1x8x256xf32> to vector<8x256xf32>
    %c0_251 = arith.constant 0 : index
    %c0_252 = arith.constant 0 : index
    %c161 = arith.constant 161 : index
    %296 = vector.load %arg11[%c0_251, %c0_252, %c161] : memref<1x8x1536xf32, #tpu.memory_space<vmem>>, vector<1x8x256xf32>
    %297 = vector.shape_cast %296 : vector<1x8x256xf32> to vector<8x256xf32>
    %c0_253 = arith.constant 0 : index
    %c0_254 = arith.constant 0 : index
    %c162_255 = arith.constant 162 : index
    %298 = vector.load %arg11[%c0_253, %c0_254, %c162_255] : memref<1x8x1536xf32, #tpu.memory_space<vmem>>, vector<1x8x256xf32>
    %299 = vector.shape_cast %298 : vector<1x8x256xf32> to vector<8x256xf32>
    %c0_256 = arith.constant 0 : index
    %c0_257 = arith.constant 0 : index
    %c163 = arith.constant 163 : index
    %300 = vector.load %arg11[%c0_256, %c0_257, %c163] : memref<1x8x1536xf32, #tpu.memory_space<vmem>>, vector<1x8x256xf32>
    %301 = vector.shape_cast %300 : vector<1x8x256xf32> to vector<8x256xf32>
    %302 = tpu.concatenate %285, %287, %289, %291, %293, %295, %297, %299, %301 in 0 : vector<8x256xf32>, vector<8x256xf32>, vector<8x256xf32>, vector<8x256xf32>, vector<8x256xf32>, vector<8x256xf32>, vector<8x256xf32>, vector<8x256xf32>, vector<8x256xf32> -> vector<72x256xf32>
    %cst_258 = arith.constant dense<0.000000e+00> : vector<3x256xf32>
    %303 = tpu.matmul %280, %302, %cst_258 {dimension_numbers = #tpu.dot_dimension_numbers<[1], [0], [0], [1], [0, 0, 1, 1], [], []>} : vector<3x72xf32>, vector<72x256xf32>, vector<3x256xf32> -> vector<3x256xf32>
    %304 = arith.addf %303, %283 : vector<3x256xf32>
    %305 = arith.negf %304 : vector<3x256xf32>
    %306 = math.exp %305 : vector<3x256xf32>
    %cst_259 = arith.constant 1.000000e+00 : f32
    %307 = vector.broadcast %cst_259 : f32 to vector<3x256xf32>
    %308 = arith.addf %307, %306 : vector<3x256xf32>
    %309 = arith.divf %307, %308 : vector<3x256xf32>
    %c0_260 = arith.constant 0 : index
    %c0_261 = arith.constant 0 : index
    %c0_262 = arith.constant 0 : index
    %310 = vector.load %arg12[%c0_260, %c0_261, %c0_262] : memref<1x3x1280xf32, #tpu.memory_space<vmem>>, vector<1x3x256xf32>
    %311 = vector.shape_cast %310 : vector<1x3x256xf32> to vector<3x256xf32>
    %312 = vector.shape_cast %309 : vector<3x256xf32> to vector<1x3x256xf32>
    tpu.vector_store %arg12[%c0_260, %c0_261, %c0_262], %312 {strides = array<i32>} : memref<1x3x1280xf32, #tpu.memory_space<vmem>>, vector<1x3x256xf32>,
    %c0_263 = arith.constant 0 : index
    %c0_264 = arith.constant 0 : index
    %c349 = arith.constant 349 : index
    %313 = vector.load %arg11[%c0_263, %c0_264, %c349] : memref<1x8x1536xf32, #tpu.memory_space<vmem>>, vector<1x8x256xf32>
    %314 = vector.shape_cast %313 : vector<1x8x256xf32> to vector<8x256xf32>
    %c0_265 = arith.constant 0 : index
    %c0_266 = arith.constant 0 : index
    %c350 = arith.constant 350 : index
    %315 = vector.load %arg11[%c0_265, %c0_266, %c350] : memref<1x8x1536xf32, #tpu.memory_space<vmem>>, vector<1x8x256xf32>
    %316 = vector.shape_cast %315 : vector<1x8x256xf32> to vector<8x256xf32>
    %c0_267 = arith.constant 0 : index
    %c0_268 = arith.constant 0 : index
    %c351 = arith.constant 351 : index
    %317 = vector.load %arg11[%c0_267, %c0_268, %c351] : memref<1x8x1536xf32, #tpu.memory_space<vmem>>, vector<1x8x256xf32>
    %318 = vector.shape_cast %317 : vector<1x8x256xf32> to vector<8x256xf32>
    %c0_269 = arith.constant 0 : index
    %c0_270 = arith.constant 0 : index
    %c383_271 = arith.constant 383 : index
    %319 = vector.load %arg11[%c0_269, %c0_270, %c383_271] : memref<1x8x1536xf32, #tpu.memory_space<vmem>>, vector<1x8x256xf32>
    %320 = vector.shape_cast %319 : vector<1x8x256xf32> to vector<8x256xf32>
    %c0_272 = arith.constant 0 : index
    %c0_273 = arith.constant 0 : index
    %c384_274 = arith.constant 384 : index
    %321 = vector.load %arg11[%c0_272, %c0_273, %c384_274] : memref<1x8x1536xf32, #tpu.memory_space<vmem>>, vector<1x8x256xf32>
    %322 = vector.shape_cast %321 : vector<1x8x256xf32> to vector<8x256xf32>
    %c0_275 = arith.constant 0 : index
    %c0_276 = arith.constant 0 : index
    %c385_277 = arith.constant 385 : index
    %323 = vector.load %arg11[%c0_275, %c0_276, %c385_277] : memref<1x8x1536xf32, #tpu.memory_space<vmem>>, vector<1x8x256xf32>
    %324 = vector.shape_cast %323 : vector<1x8x256xf32> to vector<8x256xf32>
    %c0_278 = arith.constant 0 : index
    %c0_279 = arith.constant 0 : index
    %c417 = arith.constant 417 : index
    %325 = vector.load %arg11[%c0_278, %c0_279, %c417] : memref<1x8x1536xf32, #tpu.memory_space<vmem>>, vector<1x8x256xf32>
    %326 = vector.shape_cast %325 : vector<1x8x256xf32> to vector<8x256xf32>
    %c0_280 = arith.constant 0 : index
    %c0_281 = arith.constant 0 : index
    %c418 = arith.constant 418 : index
    %327 = vector.load %arg11[%c0_280, %c0_281, %c418] : memref<1x8x1536xf32, #tpu.memory_space<vmem>>, vector<1x8x256xf32>
    %328 = vector.shape_cast %327 : vector<1x8x256xf32> to vector<8x256xf32>
    %c0_282 = arith.constant 0 : index
    %c0_283 = arith.constant 0 : index
    %c419 = arith.constant 419 : index
    %329 = vector.load %arg11[%c0_282, %c0_283, %c419] : memref<1x8x1536xf32, #tpu.memory_space<vmem>>, vector<1x8x256xf32>
    %330 = vector.shape_cast %329 : vector<1x8x256xf32> to vector<8x256xf32>
    %331 = tpu.concatenate %314, %316, %318, %320, %322, %324, %326, %328, %330 in 0 : vector<8x256xf32>, vector<8x256xf32>, vector<8x256xf32>, vector<8x256xf32>, vector<8x256xf32>, vector<8x256xf32>, vector<8x256xf32>, vector<8x256xf32>, vector<8x256xf32> -> vector<72x256xf32>
    %cst_284 = arith.constant dense<0.000000e+00> : vector<3x256xf32>
    %332 = tpu.matmul %280, %331, %cst_284 {dimension_numbers = #tpu.dot_dimension_numbers<[1], [0], [0], [1], [0, 0, 1, 1], [], []>} : vector<3x72xf32>, vector<72x256xf32>, vector<3x256xf32> -> vector<3x256xf32>
    %333 = arith.addf %332, %283 : vector<3x256xf32>
    %334 = arith.negf %333 : vector<3x256xf32>
    %335 = math.exp %334 : vector<3x256xf32>
    %cst_285 = arith.constant 1.000000e+00 : f32
    %336 = vector.broadcast %cst_285 : f32 to vector<3x256xf32>
    %337 = arith.addf %336, %335 : vector<3x256xf32>
    %338 = arith.divf %336, %337 : vector<3x256xf32>
    %c0_286 = arith.constant 0 : index
    %c0_287 = arith.constant 0 : index
    %c256_288 = arith.constant 256 : index
    %339 = vector.load %arg12[%c0_286, %c0_287, %c256_288] : memref<1x3x1280xf32, #tpu.memory_space<vmem>>, vector<1x3x256xf32>
    %340 = vector.shape_cast %339 : vector<1x3x256xf32> to vector<3x256xf32>
    %341 = vector.shape_cast %338 : vector<3x256xf32> to vector<1x3x256xf32>
    tpu.vector_store %arg12[%c0_286, %c0_287, %c256_288], %341 {strides = array<i32>} : memref<1x3x1280xf32, #tpu.memory_space<vmem>>, vector<1x3x256xf32>,
    %c0_289 = arith.constant 0 : index
    %c0_290 = arith.constant 0 : index
    %c605 = arith.constant 605 : index
    %342 = vector.load %arg11[%c0_289, %c0_290, %c605] : memref<1x8x1536xf32, #tpu.memory_space<vmem>>, vector<1x8x256xf32>
    %343 = vector.shape_cast %342 : vector<1x8x256xf32> to vector<8x256xf32>
    %c0_291 = arith.constant 0 : index
    %c0_292 = arith.constant 0 : index
    %c606 = arith.constant 606 : index
    %344 = vector.load %arg11[%c0_291, %c0_292, %c606] : memref<1x8x1536xf32, #tpu.memory_space<vmem>>, vector<1x8x256xf32>
    %345 = vector.shape_cast %344 : vector<1x8x256xf32> to vector<8x256xf32>
    %c0_293 = arith.constant 0 : index
    %c0_294 = arith.constant 0 : index
    %c607 = arith.constant 607 : index
    %346 = vector.load %arg11[%c0_293, %c0_294, %c607] : memref<1x8x1536xf32, #tpu.memory_space<vmem>>, vector<1x8x256xf32>
    %347 = vector.shape_cast %346 : vector<1x8x256xf32> to vector<8x256xf32>
    %c0_295 = arith.constant 0 : index
    %c0_296 = arith.constant 0 : index
    %c639 = arith.constant 639 : index
    %348 = vector.load %arg11[%c0_295, %c0_296, %c639] : memref<1x8x1536xf32, #tpu.memory_space<vmem>>, vector<1x8x256xf32>
    %349 = vector.shape_cast %348 : vector<1x8x256xf32> to vector<8x256xf32>
    %c0_297 = arith.constant 0 : index
    %c0_298 = arith.constant 0 : index
    %c640_299 = arith.constant 640 : index
    %350 = vector.load %arg11[%c0_297, %c0_298, %c640_299] : memref<1x8x1536xf32, #tpu.memory_space<vmem>>, vector<1x8x256xf32>
    %351 = vector.shape_cast %350 : vector<1x8x256xf32> to vector<8x256xf32>
    %c0_300 = arith.constant 0 : index
    %c0_301 = arith.constant 0 : index
    %c641 = arith.constant 641 : index
    %352 = vector.load %arg11[%c0_300, %c0_301, %c641] : memref<1x8x1536xf32, #tpu.memory_space<vmem>>, vector<1x8x256xf32>
    %353 = vector.shape_cast %352 : vector<1x8x256xf32> to vector<8x256xf32>
    %c0_302 = arith.constant 0 : index
    %c0_303 = arith.constant 0 : index
    %c673 = arith.constant 673 : index
    %354 = vector.load %arg11[%c0_302, %c0_303, %c673] : memref<1x8x1536xf32, #tpu.memory_space<vmem>>, vector<1x8x256xf32>
    %355 = vector.shape_cast %354 : vector<1x8x256xf32> to vector<8x256xf32>
    %c0_304 = arith.constant 0 : index
    %c0_305 = arith.constant 0 : index
    %c674 = arith.constant 674 : index
    %356 = vector.load %arg11[%c0_304, %c0_305, %c674] : memref<1x8x1536xf32, #tpu.memory_space<vmem>>, vector<1x8x256xf32>
    %357 = vector.shape_cast %356 : vector<1x8x256xf32> to vector<8x256xf32>
    %c0_306 = arith.constant 0 : index
    %c0_307 = arith.constant 0 : index
    %c675 = arith.constant 675 : index
    %358 = vector.load %arg11[%c0_306, %c0_307, %c675] : memref<1x8x1536xf32, #tpu.memory_space<vmem>>, vector<1x8x256xf32>
    %359 = vector.shape_cast %358 : vector<1x8x256xf32> to vector<8x256xf32>
    %360 = tpu.concatenate %343, %345, %347, %349, %351, %353, %355, %357, %359 in 0 : vector<8x256xf32>, vector<8x256xf32>, vector<8x256xf32>, vector<8x256xf32>, vector<8x256xf32>, vector<8x256xf32>, vector<8x256xf32>, vector<8x256xf32>, vector<8x256xf32> -> vector<72x256xf32>
    %cst_308 = arith.constant dense<0.000000e+00> : vector<3x256xf32>
    %361 = tpu.matmul %280, %360, %cst_308 {dimension_numbers = #tpu.dot_dimension_numbers<[1], [0], [0], [1], [0, 0, 1, 1], [], []>} : vector<3x72xf32>, vector<72x256xf32>, vector<3x256xf32> -> vector<3x256xf32>
    %362 = arith.addf %361, %283 : vector<3x256xf32>
    %363 = arith.negf %362 : vector<3x256xf32>
    %364 = math.exp %363 : vector<3x256xf32>
    %cst_309 = arith.constant 1.000000e+00 : f32
    %365 = vector.broadcast %cst_309 : f32 to vector<3x256xf32>
    %366 = arith.addf %365, %364 : vector<3x256xf32>
    %367 = arith.divf %365, %366 : vector<3x256xf32>
    %c0_310 = arith.constant 0 : index
    %c0_311 = arith.constant 0 : index
    %c512 = arith.constant 512 : index
    %368 = vector.load %arg12[%c0_310, %c0_311, %c512] : memref<1x3x1280xf32, #tpu.memory_space<vmem>>, vector<1x3x256xf32>
    %369 = vector.shape_cast %368 : vector<1x3x256xf32> to vector<3x256xf32>
    %370 = vector.shape_cast %367 : vector<3x256xf32> to vector<1x3x256xf32>
    tpu.vector_store %arg12[%c0_310, %c0_311, %c512], %370 {strides = array<i32>} : memref<1x3x1280xf32, #tpu.memory_space<vmem>>, vector<1x3x256xf32>,
    %c0_312 = arith.constant 0 : index
    %c0_313 = arith.constant 0 : index
    %c861 = arith.constant 861 : index
    %371 = vector.load %arg11[%c0_312, %c0_313, %c861] : memref<1x8x1536xf32, #tpu.memory_space<vmem>>, vector<1x8x256xf32>
    %372 = vector.shape_cast %371 : vector<1x8x256xf32> to vector<8x256xf32>
    %c0_314 = arith.constant 0 : index
    %c0_315 = arith.constant 0 : index
    %c862 = arith.constant 862 : index
    %373 = vector.load %arg11[%c0_314, %c0_315, %c862] : memref<1x8x1536xf32, #tpu.memory_space<vmem>>, vector<1x8x256xf32>
    %374 = vector.shape_cast %373 : vector<1x8x256xf32> to vector<8x256xf32>
    %c0_316 = arith.constant 0 : index
    %c0_317 = arith.constant 0 : index
    %c863 = arith.constant 863 : index
    %375 = vector.load %arg11[%c0_316, %c0_317, %c863] : memref<1x8x1536xf32, #tpu.memory_space<vmem>>, vector<1x8x256xf32>
    %376 = vector.shape_cast %375 : vector<1x8x256xf32> to vector<8x256xf32>
    %c0_318 = arith.constant 0 : index
    %c0_319 = arith.constant 0 : index
    %c895 = arith.constant 895 : index
    %377 = vector.load %arg11[%c0_318, %c0_319, %c895] : memref<1x8x1536xf32, #tpu.memory_space<vmem>>, vector<1x8x256xf32>
    %378 = vector.shape_cast %377 : vector<1x8x256xf32> to vector<8x256xf32>
    %c0_320 = arith.constant 0 : index
    %c0_321 = arith.constant 0 : index
    %c896 = arith.constant 896 : index
    %379 = vector.load %arg11[%c0_320, %c0_321, %c896] : memref<1x8x1536xf32, #tpu.memory_space<vmem>>, vector<1x8x256xf32>
    %380 = vector.shape_cast %379 : vector<1x8x256xf32> to vector<8x256xf32>
    %c0_322 = arith.constant 0 : index
    %c0_323 = arith.constant 0 : index
    %c897 = arith.constant 897 : index
    %381 = vector.load %arg11[%c0_322, %c0_323, %c897] : memref<1x8x1536xf32, #tpu.memory_space<vmem>>, vector<1x8x256xf32>
    %382 = vector.shape_cast %381 : vector<1x8x256xf32> to vector<8x256xf32>
    %c0_324 = arith.constant 0 : index
    %c0_325 = arith.constant 0 : index
    %c929 = arith.constant 929 : index
    %383 = vector.load %arg11[%c0_324, %c0_325, %c929] : memref<1x8x1536xf32, #tpu.memory_space<vmem>>, vector<1x8x256xf32>
    %384 = vector.shape_cast %383 : vector<1x8x256xf32> to vector<8x256xf32>
    %c0_326 = arith.constant 0 : index
    %c0_327 = arith.constant 0 : index
    %c930 = arith.constant 930 : index
    %385 = vector.load %arg11[%c0_326, %c0_327, %c930] : memref<1x8x1536xf32, #tpu.memory_space<vmem>>, vector<1x8x256xf32>
    %386 = vector.shape_cast %385 : vector<1x8x256xf32> to vector<8x256xf32>
    %c0_328 = arith.constant 0 : index
    %c0_329 = arith.constant 0 : index
    %c931 = arith.constant 931 : index
    %387 = vector.load %arg11[%c0_328, %c0_329, %c931] : memref<1x8x1536xf32, #tpu.memory_space<vmem>>, vector<1x8x256xf32>
    %388 = vector.shape_cast %387 : vector<1x8x256xf32> to vector<8x256xf32>
    %389 = tpu.concatenate %372, %374, %376, %378, %380, %382, %384, %386, %388 in 0 : vector<8x256xf32>, vector<8x256xf32>, vector<8x256xf32>, vector<8x256xf32>, vector<8x256xf32>, vector<8x256xf32>, vector<8x256xf32>, vector<8x256xf32>, vector<8x256xf32> -> vector<72x256xf32>
    %cst_330 = arith.constant dense<0.000000e+00> : vector<3x256xf32>
    %390 = tpu.matmul %280, %389, %cst_330 {dimension_numbers = #tpu.dot_dimension_numbers<[1], [0], [0], [1], [0, 0, 1, 1], [], []>} : vector<3x72xf32>, vector<72x256xf32>, vector<3x256xf32> -> vector<3x256xf32>
    %391 = arith.addf %390, %283 : vector<3x256xf32>
    %392 = arith.negf %391 : vector<3x256xf32>
    %393 = math.exp %392 : vector<3x256xf32>
    %cst_331 = arith.constant 1.000000e+00 : f32
    %394 = vector.broadcast %cst_331 : f32 to vector<3x256xf32>
    %395 = arith.addf %394, %393 : vector<3x256xf32>
    %396 = arith.divf %394, %395 : vector<3x256xf32>
    %c0_332 = arith.constant 0 : index
    %c0_333 = arith.constant 0 : index
    %c768 = arith.constant 768 : index
    %397 = vector.load %arg12[%c0_332, %c0_333, %c768] : memref<1x3x1280xf32, #tpu.memory_space<vmem>>, vector<1x3x256xf32>
    %398 = vector.shape_cast %397 : vector<1x3x256xf32> to vector<3x256xf32>
    %399 = vector.shape_cast %396 : vector<3x256xf32> to vector<1x3x256xf32>
    tpu.vector_store %arg12[%c0_332, %c0_333, %c768], %399 {strides = array<i32>} : memref<1x3x1280xf32, #tpu.memory_space<vmem>>, vector<1x3x256xf32>,
    %c0_334 = arith.constant 0 : index
    %c0_335 = arith.constant 0 : index
    %c1117 = arith.constant 1117 : index
    %400 = vector.load %arg11[%c0_334, %c0_335, %c1117] : memref<1x8x1536xf32, #tpu.memory_space<vmem>>, vector<1x8x256xf32>
    %401 = vector.shape_cast %400 : vector<1x8x256xf32> to vector<8x256xf32>
    %c0_336 = arith.constant 0 : index
    %c0_337 = arith.constant 0 : index
    %c1118 = arith.constant 1118 : index
    %402 = vector.load %arg11[%c0_336, %c0_337, %c1118] : memref<1x8x1536xf32, #tpu.memory_space<vmem>>, vector<1x8x256xf32>
    %403 = vector.shape_cast %402 : vector<1x8x256xf32> to vector<8x256xf32>
    %c0_338 = arith.constant 0 : index
    %c0_339 = arith.constant 0 : index
    %c1119 = arith.constant 1119 : index
    %404 = vector.load %arg11[%c0_338, %c0_339, %c1119] : memref<1x8x1536xf32, #tpu.memory_space<vmem>>, vector<1x8x256xf32>
    %405 = vector.shape_cast %404 : vector<1x8x256xf32> to vector<8x256xf32>
    %c0_340 = arith.constant 0 : index
    %c0_341 = arith.constant 0 : index
    %c1151 = arith.constant 1151 : index
    %406 = vector.load %arg11[%c0_340, %c0_341, %c1151] : memref<1x8x1536xf32, #tpu.memory_space<vmem>>, vector<1x8x256xf32>
    %407 = vector.shape_cast %406 : vector<1x8x256xf32> to vector<8x256xf32>
    %c0_342 = arith.constant 0 : index
    %c0_343 = arith.constant 0 : index
    %c1152 = arith.constant 1152 : index
    %408 = vector.load %arg11[%c0_342, %c0_343, %c1152] : memref<1x8x1536xf32, #tpu.memory_space<vmem>>, vector<1x8x256xf32>
    %409 = vector.shape_cast %408 : vector<1x8x256xf32> to vector<8x256xf32>
    %c0_344 = arith.constant 0 : index
    %c0_345 = arith.constant 0 : index
    %c1153 = arith.constant 1153 : index
    %410 = vector.load %arg11[%c0_344, %c0_345, %c1153] : memref<1x8x1536xf32, #tpu.memory_space<vmem>>, vector<1x8x256xf32>
    %411 = vector.shape_cast %410 : vector<1x8x256xf32> to vector<8x256xf32>
    %c0_346 = arith.constant 0 : index
    %c0_347 = arith.constant 0 : index
    %c1185 = arith.constant 1185 : index
    %412 = vector.load %arg11[%c0_346, %c0_347, %c1185] : memref<1x8x1536xf32, #tpu.memory_space<vmem>>, vector<1x8x256xf32>
    %413 = vector.shape_cast %412 : vector<1x8x256xf32> to vector<8x256xf32>
    %c0_348 = arith.constant 0 : index
    %c0_349 = arith.constant 0 : index
    %c1186 = arith.constant 1186 : index
    %414 = vector.load %arg11[%c0_348, %c0_349, %c1186] : memref<1x8x1536xf32, #tpu.memory_space<vmem>>, vector<1x8x256xf32>
    %415 = vector.shape_cast %414 : vector<1x8x256xf32> to vector<8x256xf32>
    %c0_350 = arith.constant 0 : index
    %c0_351 = arith.constant 0 : index
    %c1187 = arith.constant 1187 : index
    %416 = vector.load %arg11[%c0_350, %c0_351, %c1187] : memref<1x8x1536xf32, #tpu.memory_space<vmem>>, vector<1x8x256xf32>
    %417 = vector.shape_cast %416 : vector<1x8x256xf32> to vector<8x256xf32>
    %418 = tpu.concatenate %401, %403, %405, %407, %409, %411, %413, %415, %417 in 0 : vector<8x256xf32>, vector<8x256xf32>, vector<8x256xf32>, vector<8x256xf32>, vector<8x256xf32>, vector<8x256xf32>, vector<8x256xf32>, vector<8x256xf32>, vector<8x256xf32> -> vector<72x256xf32>
    %cst_352 = arith.constant dense<0.000000e+00> : vector<3x256xf32>
    %419 = tpu.matmul %280, %418, %cst_352 {dimension_numbers = #tpu.dot_dimension_numbers<[1], [0], [0], [1], [0, 0, 1, 1], [], []>} : vector<3x72xf32>, vector<72x256xf32>, vector<3x256xf32> -> vector<3x256xf32>
    %420 = arith.addf %419, %283 : vector<3x256xf32>
    %421 = arith.negf %420 : vector<3x256xf32>
    %422 = math.exp %421 : vector<3x256xf32>
    %cst_353 = arith.constant 1.000000e+00 : f32
    %423 = vector.broadcast %cst_353 : f32 to vector<3x256xf32>
    %424 = arith.addf %423, %422 : vector<3x256xf32>
    %425 = arith.divf %423, %424 : vector<3x256xf32>
    %c0_354 = arith.constant 0 : index
    %c0_355 = arith.constant 0 : index
    %c1024 = arith.constant 1024 : index
    %426 = vector.load %arg12[%c0_354, %c0_355, %c1024] : memref<1x3x1280xf32, #tpu.memory_space<vmem>>, vector<1x3x256xf32>
    %427 = vector.shape_cast %426 : vector<1x3x256xf32> to vector<3x256xf32>
    %428 = vector.shape_cast %425 : vector<3x256xf32> to vector<1x3x256xf32>
    tpu.vector_store %arg12[%c0_354, %c0_355, %c1024], %428 {strides = array<i32>} : memref<1x3x1280xf32, #tpu.memory_space<vmem>>, vector<1x3x256xf32>,
    return
  }
  func.func @transform_0(%arg0: i32) -> (i32, i32, i32) {
    %c0_i32 = arith.constant 0 : i32
    %c0_i32_0 = arith.constant 0 : i32
    %c0_i32_1 = arith.constant 0 : i32
    return %arg0, %c0_i32, %c0_i32_0 : i32, i32, i32
  }
  func.func @transform_1(%arg0: i32) -> (i32, i32) {
    %c0_i32 = arith.constant 0 : i32
    %c0_i32_0 = arith.constant 0 : i32
    %c0_i32_1 = arith.constant 0 : i32
    return %c0_i32, %c0_i32_0 : i32, i32
  }
  func.func @transform_2(%arg0: i32) -> (i32, i32) {
    %c0_i32 = arith.constant 0 : i32
    %c0_i32_0 = arith.constant 0 : i32
    %c0_i32_1 = arith.constant 0 : i32
    return %c0_i32, %c0_i32_0 : i32, i32
  }
  func.func @transform_3(%arg0: i32) -> (i32, i32) {
    %c0_i32 = arith.constant 0 : i32
    %c0_i32_0 = arith.constant 0 : i32
    %c0_i32_1 = arith.constant 0 : i32
    return %c0_i32, %c0_i32_0 : i32, i32
  }
  func.func @transform_4(%arg0: i32) -> (i32, i32) {
    %c0_i32 = arith.constant 0 : i32
    %c0_i32_0 = arith.constant 0 : i32
    %c0_i32_1 = arith.constant 0 : i32
    return %c0_i32, %c0_i32_0 : i32, i32
  }
  func.func @transform_5(%arg0: i32) -> (i32, i32) {
    %c0_i32 = arith.constant 0 : i32
    %c0_i32_0 = arith.constant 0 : i32
    %c0_i32_1 = arith.constant 0 : i32
    return %c0_i32, %c0_i32_0 : i32, i32
  }
  func.func @transform_6(%arg0: i32) -> (i32, i32) {
    %c0_i32 = arith.constant 0 : i32
    %c0_i32_0 = arith.constant 0 : i32
    %c0_i32_1 = arith.constant 0 : i32
    return %c0_i32, %c0_i32_0 : i32, i32
  }
  func.func @transform_7(%arg0: i32) -> (i32, i32) {
    %c0_i32 = arith.constant 0 : i32
    %c0_i32_0 = arith.constant 0 : i32
    %c0_i32_1 = arith.constant 0 : i32
    return %c0_i32, %c0_i32_0 : i32, i32
  }
  func.func @transform_8(%arg0: i32) -> (i32, i32) {
    %c0_i32 = arith.constant 0 : i32
    %c0_i32_0 = arith.constant 0 : i32
    %c0_i32_1 = arith.constant 0 : i32
    return %c0_i32, %c0_i32_0 : i32, i32
  }
  func.func @transform_9(%arg0: i32) -> (i32, i32) {
    %c0_i32 = arith.constant 0 : i32
    %c0_i32_0 = arith.constant 0 : i32
    %c0_i32_1 = arith.constant 0 : i32
    return %c0_i32, %c0_i32_0 : i32, i32
  }
  func.func @transform_10(%arg0: i32) -> (i32, i32, i32) {
    %c0_i32 = arith.constant 0 : i32
    %c0_i32_0 = arith.constant 0 : i32
    %c0_i32_1 = arith.constant 0 : i32
    return %arg0, %c0_i32, %c0_i32_0 : i32, i32, i32
  }
  func.func @transform_11(%arg0: i32) -> (i32, i32, i32) {
    %c0_i32 = arith.constant 0 : i32
    %c0_i32_0 = arith.constant 0 : i32
    %c0_i32_1 = arith.constant 0 : i32
    return %arg0, %c0_i32, %c0_i32_0 : i32, i32, i32
  }
}

</mosaic_0001>

<bundles_post_ra>
// kernel: tpu_custom_call.1
= control target key start
LH: loop header
LB: loop body
LE: loop exit
PB: predicated region body
PF: predicated region fallthrough
CT: control target
= control target key end

     0   :  { %s8846_s0 = inlined_call_operand.hbm [shape: f32[2,8,768], index: 0, kind: input, shape index: {}]   ;;  %s8847_s1 = inlined_call_operand.hbm [shape: f32[8,72], index: 1, kind: input, shape index: {}]   ;;  %s8848_s2 = inlined_call_operand.hbm [shape: f32[8,1], index: 2, kind: input, shape index: {}]   ;;  %s8849_s3 = inlined_call_operand.hbm [shape: f32[32,72], index: 3, kind: input, shape index: {}]   ;;  %s8850_s4 = inlined_call_operand.hbm [shape: f32[32,1], index: 4, kind: input, shape index: {}]   ;;  %s8851_s5 = inlined_call_operand.hbm [shape: f32[3,72], index: 5, kind: input, shape index: {}]   ;;  %s8852_s6 = inlined_call_operand.hbm [shape: f32[3,1], index: 6, kind: input, shape index: {}]   ;;  %s8853_s7 = inlined_call_operand.hbm [shape: f32[16,34], index: 7, kind: input, shape index: {}]   ;;  %s8854_s8 = inlined_call_operand.hbm [shape: f32[16,34], index: 8, kind: input, shape index: {}]   ;;  %s8855_s9 = inlined_call_operand.hbm [shape: f32[1,512], index: 9, kind: input, shape index: {}]   ;;  %s8856_s10 = inlined_call_operand.hbm [shape: f32[2,8,1536], index: 10, kind: output, shape index: {0}]   ;;  %s8857_s11 = inlined_call_operand.hbm [shape: f32[2,3,1280], index: 11, kind: output, shape index: {1}]  }
   0x1   :  { %8879 = sst [smem:[#allocation32_spill]] %s8847_s1 }
   0x2   :  { %8880 = sst [smem:[#allocation33_spill]] %s8848_s2 }
   0x3   :  { %8881 = sst [smem:[#allocation34_spill]] %s8849_s3 }
   0x4   :  { %8882 = sst [smem:[#allocation35_spill]] %s8851_s5 }
   0x5   :  { %8883 = sst [smem:[#allocation36_spill]] %s8857_s11 }
   0x6   :  { %17 = vsyncpa [#allocation5], 0 }
   0x7   :  { %19 = vsyncpa [#allocation5 + $0x1], 0 }
   0x8   :  { %20 = vsyncpa [#allocation8], 0 }
   0x9   :  { %21 = vsyncpa [#allocation11], 0 }
   0xa   :  { %22 = vsyncpa [#allocation14], 0 }
   0xb   :  { %23 = vsyncpa [#allocation17], 0 }
   0xc   :  { %24 = vsyncpa [#allocation20], 0 }
   0xd   :  { %25 = vsyncpa [#allocation6], 0 }
   0xe   :  { %27 = vsyncpa [#allocation6 + $0x1], 0 }
   0xf   :  { %28 = vsyncpa [#allocation23], 0 }
  0x10   :  { %30 = vsyncpa [#allocation23 + $0x1], 0  ;;  %s6802_s17 = smov 0   ;;  %s6804_s18 = smov 0  }
  0x11   :  { %s6806_s19 = smov 0   ;;  %s6808_s20 = smov 0  }
  0x12 LB: > { %s6685_s21 = smov [#allocation7]   ;;  %s6823_s23 = sadd.s32 4294967295, %s6683_s20   ;;  %s6683_s20 = sphi %s6808_s20, %s8924_s20   ;;  %s6679_s19 = sphi %s6806_s19, %s8923_s19   ;;  %s6675_s18 = sphi %s6804_s18, %s8922_s18   ;;  %s6671_s17 = sphi %s6802_s17, %s8921_s17  }
  0x13   : > { %s321_s22 = sshll.u32 %s6685_s21, 4  ;;  %p4537_p0 = scmp.ge.s32.totalorder %s6683_s20, 1  ;;  %s322_s22 = int_to_ptr.vmem [resolvable:$true] %s321_s22 }
  0x14   : > { %p8858_p1 = scmp.eq.s32.totalorder %s6823_s23, 0  ;;  %p308_p2 = scmp.lt.s32.totalorder %s6683_s20, 3 }
  0x15   : > { %s6686_s25 = smov [#allocation10]   ;;  %s6687_s28 = smov [#allocation13]  }
  0x16   : > { %p6828_p3 = pnand %p4537_p0, %p308_p2  ;;  %s342_s26 = sshll.u32 %s6686_s25, 4  ;;  %s6835_s26 = int_to_ptr.vmem [resolvable:$true] %s342_s26 }
  0x17   : > { %s369_s29 = sshll.u32 %s6687_s28, 4  ;;  %s8886_s1 = sld [smem:[#allocation32_spill]]  ;;  %s6843_s29 = int_to_ptr.vmem [resolvable:$true] %s369_s29 }
  0x18   : > { %s8884_s24 = scalar_select %p6828_p3, 1, 0 }
  0x19   : > { %p5119_p5 = pneg %p6828_p3 }
  0x1b   : > { %p6839_p6 = pnand %p5119_p5, %p8858_p1 }
  0x1d   : > { %s6283_s13 = scalar_lea.hbm %s8886_s1, 128  ;;  %p6853_p8 = pneg %p6839_p6 }
  0x1e   : > { %p6284_p7 = scmp.ne.s32.totalorder %s8886_s1, %s6283_s13  ;;  %p6290_p11 = scmp.lt.u32.totalorder %s6283_s13, %s8886_s1 }
  0x20   : > { %p6286_p9 = pnand %p6853_p8, %p6284_p7 }
  0x22   : > { %p6287_p10 = pneg %p6286_p9 }
  0x24   : > { %p6292_p12 = pnand %p6290_p11, %p6287_p10 }
  0x26   : > { %6295 = shalt.err (!%p6292_p12)
}
  0x27   : > { %s6296_s28 = scalar_lea.vmem %s322_s22, 128  ;;  %p6304_p5 = scmp.lt.s32.totalorder %s322_s22, %s322_s22 }
  0x28   : > { %p6297_p13 = scmp.ne.s32.totalorder %s322_s22, %s6296_s28  ;;  %p6305_p4 = scmp.lt.s32.totalorder %s6296_s28, %s6296_s28 }
  0x2a   : > { %p6299_p0 = pnand %p6297_p13, %p6853_p8  ;;  %p6306_p1 = por %p6305_p4, %p6304_p5 }
  0x2c   : > { %p6300_p2 = pneg %p6299_p0 }
  0x2e   : > { %p6307_p3 = pnand %p6306_p1, %p6300_p2 }
  0x30   : > { %6310 = shalt.err (!%p6307_p3)
}
  0x31   : > { %5122 = dma.hbm_to_vmem [thread:$0]  (!%p6839_p6), %s8886_s1, 128, %s322_s22, [#allocation8]  }
  0x32   : > { %s8888_s3 = sld [smem:[#allocation34_spill]] }
  0x38   : > { %s6311_s15 = scalar_lea.hbm %s8888_s3, 512 }
  0x39   : > { %p6312_p7 = scmp.ne.s32.totalorder %s8888_s3, %s6311_s15  ;;  %p6318_p1 = scmp.lt.u32.totalorder %s6311_s15, %s8888_s3 }
  0x3b   : > { %p6314_p9 = pnand %p6312_p7, %p6853_p8 }
  0x3d   : > { %p6315_p4 = pneg %p6314_p9 }
  0x3f   : > { %p6320_p3 = pnand %p6318_p1, %p6315_p4 }
  0x41   : > { %6323 = shalt.err (!%p6320_p3)
}
  0x42   : > { %s6324_s22 = scalar_lea.vmem %s6835_s26, 512  ;;  %p6332_p13 = scmp.lt.s32.totalorder %s6835_s26, %s6835_s26 }
  0x43   : > { %p6325_p10 = scmp.ne.s32.totalorder %s6835_s26, %s6324_s22  ;;  %p6333_p0 = scmp.lt.s32.totalorder %s6324_s22, %s6324_s22 }
  0x45   : > { %p6327_p11 = pnand %p6325_p10, %p6853_p8  ;;  %p6334_p2 = por %p6333_p0, %p6332_p13 }
  0x47   : > { %p6328_p12 = pneg %p6327_p11 }
  0x49   : > { %p6335_p5 = pnand %p6334_p2, %p6328_p12 }
  0x4b   : > { %6338 = shalt.err (!%p6335_p5)
}
  0x4c   : > { %s8861_s30 = smov 128   ;;  %s8863_s11 = smov 8  }
  0x4d   : > { %5128 = dma.hbm_to_vmem [thread:$0]  (!%p6839_p6), %s8888_s3, 512, %s6835_s26, [#allocation11], %s8861_s30, %s8861_s30, %s8863_s11  }
  0x4e   : > { %s8889_s5 = sld [smem:[#allocation35_spill]] }
  0x54   : > { %s6339_s21 = scalar_lea.hbm %s8889_s5, 64 }
  0x55   : > { %p6340_p7 = scmp.ne.s32.totalorder %s8889_s5, %s6339_s21  ;;  %p6346_p1 = scmp.lt.u32.totalorder %s6339_s21, %s8889_s5 }
  0x57   : > { %p6342_p9 = pnand %p6340_p7, %p6853_p8 }
  0x59   : > { %p6343_p4 = pneg %p6342_p9 }
  0x5b   : > { %p6348_p3 = pnand %p6346_p1, %p6343_p4 }
  0x5d   : > { %6351 = shalt.err (!%p6348_p3)
}
  0x5e   : > { %s6352_s26 = scalar_lea.vmem %s6843_s29, 64  ;;  %p6360_p13 = scmp.lt.s32.totalorder %s6843_s29, %s6843_s29 }
  0x5f   : > { %p6353_p10 = scmp.ne.s32.totalorder %s6843_s29, %s6352_s26  ;;  %p6361_p0 = scmp.lt.s32.totalorder %s6352_s26, %s6352_s26 }
  0x61   : > { %p6355_p11 = pnand %p6353_p10, %p6853_p8  ;;  %p6362_p2 = por %p6361_p0, %p6360_p13 }
  0x63   : > { %p6356_p12 = pneg %p6355_p11 }
  0x65   : > { %p6363_p5 = pnand %p6362_p2, %p6356_p12 }
  0x67   : > { %6366 = shalt.err (!%p6363_p5)
}
  0x68   : > { %5134 = dma.hbm_to_vmem [thread:$0]  (!%p6839_p6), %s8889_s5, 64, %s6843_s29, [#allocation14]  }
  0x69   : > { %s6690_s13 = smov [#allocation16]   ;;  %s6691_s15 = smov [#allocation9]  }
  0x6a   : > { %s390_s14 = sshll.u32 %s6690_s13, 4  ;;  %s332_s21 = sshll.u32 %s6691_s15, 4  ;;  %s391_s14 = int_to_ptr.vmem [resolvable:$true] %s390_s14  ;;  %s333_s21 = int_to_ptr.vmem [resolvable:$true] %s332_s21 }
  0x6b   : > { %s6367_s22 = scalar_lea.hbm %s8853_s7, 256 }
  0x6c   : > { %p6368_p7 = scmp.ne.s32.totalorder %s8853_s7, %s6367_s22  ;;  %p6374_p1 = scmp.lt.u32.totalorder %s6367_s22, %s8853_s7 }
  0x6e   : > { %p6370_p9 = pnand %p6368_p7, %p6853_p8 }
  0x70   : > { %p6371_p4 = pneg %p6370_p9 }
  0x72   : > { %p6376_p3 = pnand %p6374_p1, %p6371_p4 }
  0x74   : > { %6379 = shalt.err (!%p6376_p3)
}
  0x75   : > { %s6380_s29 = scalar_lea.vmem %s391_s14, 256  ;;  %p6388_p13 = scmp.lt.s32.totalorder %s391_s14, %s391_s14 }
  0x76   : > { %p6381_p10 = scmp.ne.s32.totalorder %s391_s14, %s6380_s29  ;;  %p6389_p0 = scmp.lt.s32.totalorder %s6380_s29, %s6380_s29 }
  0x78   : > { %p6383_p11 = pnand %p6381_p10, %p6853_p8  ;;  %p6390_p2 = por %p6389_p0, %p6388_p13 }
  0x7a   : > { %p6384_p12 = pneg %p6383_p11 }
  0x7c   : > { %p6391_p5 = pnand %p6390_p2, %p6384_p12 }
  0x7e   : > { %6394 = shalt.err (!%p6391_p5)
}
  0x7f   : > { %s8890_s30 = smov 8   ;;  %s8891_s12 = smov 128  }
  0x80   : > { %5140 = dma.hbm_to_vmem [thread:$0]  (!%p6839_p6), %s8853_s7, 256, %s391_s14, [#allocation17], %s8891_s12, %s8891_s12, %s8890_s30  }
  0x81   : > { %s8892_s2 = sld [smem:[#allocation33_spill]] }
  0x87   : > { %s6395_s28 = scalar_lea.hbm %s8892_s2, 128 }
  0x88   : > { %p6396_p7 = scmp.ne.s32.totalorder %s8892_s2, %s6395_s28  ;;  %p6402_p1 = scmp.lt.u32.totalorder %s6395_s28, %s8892_s2 }
  0x8a   : > { %p6398_p9 = pnand %p6396_p7, %p6853_p8 }
  0x8c   : > { %p6399_p4 = pneg %p6398_p9 }
  0x8e   : > { %p6404_p3 = pnand %p6402_p1, %p6399_p4 }
  0x90   : > { %6407 = shalt.err (!%p6404_p3)
}
  0x91   : > { %s6408_s11 = scalar_lea.vmem %s333_s21, 128  ;;  %p6416_p13 = scmp.lt.s32.totalorder %s333_s21, %s333_s21 }
  0x92   : > { %p6409_p10 = scmp.ne.s32.totalorder %s333_s21, %s6408_s11  ;;  %p6417_p0 = scmp.lt.s32.totalorder %s6408_s11, %s6408_s11 }
  0x94   : > { %p6411_p11 = pnand %p6409_p10, %p6853_p8  ;;  %p6418_p2 = por %p6417_p0, %p6416_p13 }
  0x96   : > { %p6412_p12 = pneg %p6411_p11 }
  0x98   : > { %p6419_p5 = pnand %p6418_p2, %p6412_p12 }
  0x9a   : > { %6422 = shalt.err (!%p6419_p5)
}
  0x9b   : > { %5125 = dma.hbm_to_vmem [thread:$0]  (!%p6839_p6), %s8892_s2, 128, %s333_s21, [#allocation8]  }
  0x9c   : > { %s6692_s15 = smov [#allocation12]   ;;  %s6693_s28 = smov [#allocation15]  }
  0x9d   : > { %s355_s25 = sshll.u32 %s6692_s15, 4  ;;  %s380_s22 = sshll.u32 %s6693_s28, 4  ;;  %s356_s25 = int_to_ptr.vmem [resolvable:$true] %s355_s25  ;;  %s381_s22 = int_to_ptr.vmem [resolvable:$true] %s380_s22 }
  0x9e   : > { %s6423_s29 = scalar_lea.hbm %s8850_s4, 512 }
  0x9f   : > { %p6424_p7 = scmp.ne.s32.totalorder %s8850_s4, %s6423_s29  ;;  %p6430_p1 = scmp.lt.u32.totalorder %s6423_s29, %s8850_s4 }
  0xa1   : > { %p6426_p9 = pnand %p6424_p7, %p6853_p8 }
  0xa3   : > { %p6427_p4 = pneg %p6426_p9 }
  0xa5   : > { %p6432_p3 = pnand %p6430_p1, %p6427_p4 }
  0xa7   : > { %6435 = shalt.err (!%p6432_p3)
}
  0xa8   : > { %s6436_s21 = scalar_lea.vmem %s356_s25, 512  ;;  %p6444_p13 = scmp.lt.s32.totalorder %s356_s25, %s356_s25 }
  0xa9   : > { %p6437_p10 = scmp.ne.s32.totalorder %s356_s25, %s6436_s21  ;;  %p6445_p0 = scmp.lt.s32.totalorder %s6436_s21, %s6436_s21 }
  0xab   : > { %p6439_p11 = pnand %p6437_p10, %p6853_p8  ;;  %p6446_p2 = por %p6445_p0, %p6444_p13 }
  0xad   : > { %p6440_p12 = pneg %p6439_p11 }
  0xaf   : > { %p6447_p5 = pnand %p6446_p2, %p6440_p12 }
  0xb1   : > { %6450 = shalt.err (!%p6447_p5)
}
  0xb2   : > { %5131 = dma.hbm_to_vmem [thread:$0]  (!%p6839_p6), %s8850_s4, 512, %s356_s25, [#allocation11], %s8891_s12, %s8891_s12, %s8890_s30  }
  0xb3   : > { %s6451_s28 = scalar_lea.hbm %s8852_s6, 64 }
  0xb4   : > { %p6452_p7 = scmp.ne.s32.totalorder %s8852_s6, %s6451_s28  ;;  %p6458_p1 = scmp.lt.u32.totalorder %s6451_s28, %s8852_s6 }
  0xb6   : > { %p6454_p9 = pnand %p6452_p7, %p6853_p8 }
  0xb8   : > { %p6455_p4 = pneg %p6454_p9 }
  0xba   : > { %p6460_p3 = pnand %p6458_p1, %p6455_p4 }
  0xbc   : > { %6463 = shalt.err (!%p6460_p3)
}
  0xbd   : > { %s6464_s14 = scalar_lea.vmem %s381_s22, 64  ;;  %p6472_p13 = scmp.lt.s32.totalorder %s381_s22, %s381_s22 }
  0xbe   : > { %p6465_p10 = scmp.ne.s32.totalorder %s381_s22, %s6464_s14  ;;  %p6473_p0 = scmp.lt.s32.totalorder %s6464_s14, %s6464_s14 }
  0xc0   : > { %p6467_p11 = pnand %p6465_p10, %p6853_p8  ;;  %p6474_p2 = por %p6473_p0, %p6472_p13 }
  0xc2   : > { %p6468_p12 = pneg %p6467_p11 }
  0xc4   : > { %p6475_p5 = pnand %p6474_p2, %p6468_p12 }
  0xc6   : > { %6478 = shalt.err (!%p6475_p5)
}
  0xc7   : > { %5137 = dma.hbm_to_vmem [thread:$0]  (!%p6839_p6), %s8852_s6, 64, %s381_s22, [#allocation14]  }
  0xc8   : > { %s6694_s3 = smov [#allocation18]   ;;  %s6695_s13 = smov [#allocation19]  }
  0xc9   : > { %s403_s5 = sshll.u32 %s6694_s3, 4  ;;  %s417_s15 = sshll.u32 %s6695_s13, 4  ;;  %s404_s5 = int_to_ptr.vmem [resolvable:$true] %s403_s5  ;;  %s418_s15 = int_to_ptr.vmem [resolvable:$true] %s417_s15 }
  0xca   : > { %s6479_s1 = scalar_lea.hbm %s8854_s8, 256 }
  0xcb   : > { %p6480_p7 = scmp.ne.s32.totalorder %s8854_s8, %s6479_s1  ;;  %p6486_p1 = scmp.lt.u32.totalorder %s6479_s1, %s8854_s8 }
  0xcd   : > { %p6482_p9 = pnand %p6480_p7, %p6853_p8 }
  0xcf   : > { %p6483_p4 = pneg %p6482_p9 }
  0xd1   : > { %p6488_p3 = pnand %p6486_p1, %p6483_p4 }
  0xd3   : > { %6491 = shalt.err (!%p6488_p3)
}
  0xd4   : > { %s6492_s22 = scalar_lea.vmem %s404_s5, 256  ;;  %p6500_p13 = scmp.lt.s32.totalorder %s404_s5, %s404_s5 }
  0xd5   : > { %p6493_p10 = scmp.ne.s32.totalorder %s404_s5, %s6492_s22  ;;  %p6501_p0 = scmp.lt.s32.totalorder %s6492_s22, %s6492_s22 }
  0xd7   : > { %p6495_p11 = pnand %p6493_p10, %p6853_p8  ;;  %p6502_p2 = por %p6501_p0, %p6500_p13 }
  0xd9   : > { %p6496_p12 = pneg %p6495_p11 }
  0xdb   : > { %p6503_p5 = pnand %p6502_p2, %p6496_p12 }
  0xdd   : > { %6506 = shalt.err (!%p6503_p5)
}
  0xde   : > { %5143 = dma.hbm_to_vmem [thread:$0]  (!%p6839_p6), %s8854_s8, 256, %s404_s5, [#allocation17], %s8891_s12, %s8891_s12, %s8890_s30  }
  0xdf   : > { %s6507_s26 = scalar_lea.hbm %s8855_s9, 64 }
  0xe0   : > { %p6508_p7 = scmp.ne.s32.totalorder %s8855_s9, %s6507_s26  ;;  %p6514_p1 = scmp.lt.u32.totalorder %s6507_s26, %s8855_s9 }
  0xe2   : > { %p6510_p9 = pnand %p6508_p7, %p6853_p8 }
  0xe4   : > { %p6511_p4 = pneg %p6510_p9 }
  0xe6   : > { %p6516_p3 = pnand %p6514_p1, %p6511_p4 }
  0xe8   : > { %6519 = shalt.err (!%p6516_p3)
}
  0xe9   : > { %s6520_s25 = scalar_lea.vmem %s418_s15, 64  ;;  %p6528_p13 = scmp.lt.s32.totalorder %s418_s15, %s418_s15 }
  0xea   : > { %p6521_p10 = scmp.ne.s32.totalorder %s418_s15, %s6520_s25  ;;  %p6529_p0 = scmp.lt.s32.totalorder %s6520_s25, %s6520_s25 }
  0xec   : > { %p6523_p11 = pnand %p6521_p10, %p6853_p8  ;;  %p6530_p2 = por %p6529_p0, %p6528_p13 }
  0xee   : > { %p6524_p12 = pneg %p6523_p11 }
  0xf0   : > { %p6531_p5 = pnand %p6530_p2, %p6524_p12 }
  0xf2   : > { %6534 = shalt.err (!%p6531_p5)
}
  0xf3   : > { %5146 = dma.hbm_to_vmem [thread:$0]  (!%p6839_p6), %s8855_s9, 64, %s418_s15, [#allocation20]  }
  0xf4   : > { %s4536_s16 = sadd.s32 4294967294, %s6683_s20   ;;  %s7037_s27 = sadd.s32 1, %s6683_s20  }
  0xf5   : > { %s43_s5 = sadd.s32 1, %s6679_s19  ;;  %s40_s22 = ssub.s32 %s6683_s20, %s7037_s27 }
  0xf6   : > { %p50_p8 = scmp.ne.s32.totalorder %s6679_s19, %s6675_s18  ;;  %p41_p7 = scmp.eq.s32.totalorder %s40_s22, 0 }
  0xf7   : > { %p51_p9 = scmp.eq.s32.totalorder %s6683_s20, 0  ;;  %p56_p4 = scmp.ne.s32.totalorder %s6675_s18, %s6671_s17 }
  0xf8   : > { %p269_p1 = scmp.eq.s32.totalorder %s6823_s23, 1  ;;  %p8893_p10 = scmp.eq.s32.totalorder %s6823_s23, 0 }
  0xf9   : > { %s7049_s21 = scalar_select %p41_p7, %s6679_s19, %s43_s5  }
  0xfa   : > { %p52_p3 = por %p51_p9, %p50_p8  ;;  %p7053_p11 = por %p8893_p10, %p56_p4 }
  0xfb   : > { %p7057_p6 = por %p269_p1, %p50_p8  ;;  %p275_p12 = scmp.eq.s32.totalorder %s4536_s16, 1 }
  0xfc   : > { %p5167_p13 = scmp.lt.s32.totalorder %s6683_s20, 2  ;;  %s428_s13 = sand.u32 1, %s6679_s19  }
  0xfd   : > { %s8895_s15 = scalar_select %p7057_p6, 1, 0 }
  0xfe   : > { %p7063_p0 = por %p275_p12, %p56_p4  ;;  %s5070_s26 = smul.u32 48, %s428_s13 }
  0xff   : > { %p7067_p2 = pnand %p5167_p13, %p52_p3  ;;  %s5071_s29 = smul.u32 768, %s6683_s20 }
 0x100   : > { %s8896_s28 = scalar_select %p7063_p0, 1, 0 }
 0x101   : > { %s7075_s25 = scalar_lea.hbm %s8846_s0, %s5071_s29  ;;  %s432_s30 = scalar_lea.vmem [#allocation4], %s5070_s26 }
 0x102   : > { %s440_s12 = sshll.u32 %s432_s30, 4  ;;  %s429_s16 = scalar_lea.sflag [#allocation5], %s428_s13  ;;  %s7077_s12 = int_to_ptr.vmem [resolvable:$true] %s440_s12 }
 0x103   : > { %s6535_s5 = scalar_lea.hbm %s7075_s25, 768  ;;  %p6537_p8 = pneg %p7067_p2 }
 0x104   : > { %p6536_p5 = scmp.ne.s32.totalorder %s7075_s25, %s6535_s5  ;;  %s6540_s11 = scalar_lea.hbm %s8846_s0, 1536 }
 0x105   : > { %p6541_p4 = scmp.lt.u32.totalorder %s7075_s25, %s8846_s0  ;;  %p6542_p1 = scmp.lt.u32.totalorder %s6540_s11, %s6535_s5 }
 0x106   : > { %p6538_p7 = pnand %p6537_p8, %p6536_p5  ;;  %p6544_p10 = scmp.lt.u32.totalorder %s6535_s5, %s7075_s25 }
 0x107   : > { %p6543_p3 = por %p6542_p1, %p6541_p4 }
 0x108   : > { %p6539_p9 = pneg %p6538_p7 }
 0x109   : > { %p6545_p12 = por %p6544_p10, %p6543_p3 }
 0x10b   : > { %p6546_p13 = pnand %p6545_p12, %p6539_p9 }
 0x10d   : > { %6549 = shalt.err (!%p6546_p13)
}
 0x10e   : > { %s6550_s13 = scalar_lea.vmem %s7077_s12, 768  ;;  %s6696_s26 = smov [#allocation4]  }
 0x10f   : > { %p6551_p5 = scmp.ne.s32.totalorder %s7077_s12, %s6550_s13  ;;  %s6555_s30 = sshll.u32 %s6696_s26, 4  ;;  %s6556_s30 = int_to_ptr.vmem [resolvable:$false] %s6555_s30 }
 0x110   : > { %s6557_s2 = scalar_lea.vmem %s6556_s30, 1536  ;;  %p6558_p6 = scmp.lt.s32.totalorder %s7077_s12, %s6556_s30 }
 0x111   : > { %p6553_p7 = pnand %p6551_p5, %p6537_p8  ;;  %p6559_p4 = scmp.lt.s32.totalorder %s6557_s2, %s6550_s13 }
 0x113   : > { %p6554_p0 = pneg %p6553_p7  ;;  %p6560_p1 = por %p6559_p4, %p6558_p6 }
 0x115   : > { %p6561_p3 = pnand %p6560_p1, %p6554_p0 }
 0x117   : > { %6564 = shalt.err (!%p6561_p3)
}
 0x118   : > { %5150 = dma.hbm_to_vmem [thread:$0]  (!%p7067_p2), %s7075_s25, 768, %s7077_s12, %s429_s16  }
 0x119   : > { %p8898_p9 = scmp.ne.s32.totalorder %s8884_s24, 0 }
 0x11a   : > { %s7107_s5 = sand.u32 (!%p8898_p9), 1, %s6675_s18  }
 0x11b   : > { %449 = sbr.rel (%p8898_p9) target bundleno = 2845 (0xb1d), region = 60  ;;  %s452_s29 = scalar_lea.sflag (!%p8898_p9), [#allocation5], %s7107_s5 }
 0x11c   : > { %s5072_s22 = smul.u32 (!%p8898_p9), 48, %s7107_s5 }
 0x11e   : > { %s7111_s11 = scalar_lea.vmem (!%p8898_p9), [#allocation4], %s5072_s22 }
 0x122   : > { %6638 = dma.done.wait (%p7053_p11), %s452_s29, 768  }
 0x123   : > { %6640 = vsyncadd (%p7053_p11), %s452_s29, 4294966528  ;;  %p8899_p6 = scmp.eq.s32.totalorder %s6823_s23, 0 }
 0x125   : > { %6642 = dma.done.wait (%p8899_p6), [#allocation8], 256   ;;  %p8900_p0 = pmov %p8899_p6 }
 0x127   : > { %6644 = vsyncadd (%p8900_p0), [#allocation8], 4294967040  ;;  %p8901_p2 = pmov %p8900_p0 }
 0x128   : > { %p8902_p8 = pmov %p8900_p0 }
 0x129   : > { %6646 = dma.done.wait (%p8901_p2), [#allocation11], 1024  }
 0x12a   : > { %6648 = vsyncadd (%p8902_p8), [#allocation11], 4294966272  ;;  %p8903_p10 = pmov %p8900_p0 }
 0x12b   : > { %p8904_p12 = pmov %p8900_p0 }
 0x12c   : > { %6650 = dma.done.wait (%p8903_p10), [#allocation14], 128  }
 0x12d   : > { %6652 = vsyncadd (%p8904_p12), [#allocation14], 4294967168  ;;  %p8905_p11 = pmov %p8900_p0 }
 0x12e   : > { %p8906_p13 = pmov %p8900_p0 }
 0x12f   : > { %6654 = dma.done.wait (%p8905_p11), [#allocation17], 512  }
 0x130   : > { %6656 = vsyncadd (%p8906_p13), [#allocation17], 4294966784  ;;  %p8907_p5 = pmov %p8900_p0 }
 0x131   : > { %p8908_p7 = pmov %p8900_p0 }
 0x132   : > { %6658 = dma.done.wait (%p8907_p5), [#allocation20], 64  }
 0x133   : > { %6660 = vsyncadd (%p8908_p7), [#allocation20], 4294967232  ;;  %v550_v0 = vld [vmem:[%s7111_s11 + $0x8] sm:$0xff]  ;;  %v7139_v1 = vld [vmem:[%s7111_s11 + $0x10] sm:$0xff]  ;;  %s8875_s24 = smov 126   ;;  %s8877_s3 = smov 127  }
 0x134   : > { %v7142_v2 = vld [vmem:[%s7111_s11] sm:$0xff]  ;;  %v5274_v3 = vpack.i.bf16 %v7139_v1, %v550_v0  ;;  %v811_v4 = vld [vmem:[%s7111_s11 + $0x18] sm:$0xff]  ;;  %s6699_s1 = smov 110   ;;  %s6700_s25 = smov 108   ;;  %v815_v9 = vld [vmem:[%s7111_s11 + $0x28] sm:$0xff]  ;;  %vm562_vm0 = vcmask 1039360  }
 0x135   : > { %v5269_v5 = vpack.i.bf16 %v811_v4, %v7142_v2  ;;  %v812_v6 = vld [vmem:[%s7111_s11 + $0x20] sm:$0xff]  ;;  %s6701_s12 = smov 109   ;;  %v5304_v8 = vpack.i.bf16 %v811_v4, %v811_v4  ;;  %s6702_s16 = smov 92   ;;  %vm571_vm1 = vcmask 1031168   ;;  %vm580_vm2 = vcmask 900096  }
 0x136   : > { %5275 = vrot.lane.b32.xlu1 %v5274_v3, %s8875_s24  ;;  %5265 = vrot.lane.b32.xlu0 %v5274_v3, %s8877_s3  ;;  %v5309_v7 = vpack.i.bf16 %v7139_v1, %v812_v6  ;;  %s6703_s14 = smov 91   ;;  %v5349_v10 = vpack.i.bf16 %v815_v9, %v812_v6  ;;  %v5344_v11 = vpack.i.bf16 %v812_v6, %v811_v4  ;;  %s8866_s13 = smov 90   ;;  %vm587_vm3 = vcmask 891904  }
 0x137   : > { %s6705_s26 = smov 19   ;;  %vm596_vm4 = vcmask 883712   ;;  %vm605_vm5 = vcmask 752640   ;;  %vm614_vm6 = vcmask 744448   ;;  %vm623_vm7 = vcmask 736256   ;;  %s8872_s30 = smov 74  }
 0x138   : > { %vm680_vm8 = vcmask 154624   ;;  %vm717_vm9 = vcmask 588800   ;;  %vm1654_vm10 = vcmask 130048   ;;  %s6709_s2 = smov 112   ;;  %s8867_s22 = smov 56   ;;  %vm1968_vm11 = vcmask 605184  }
 0x139   : > { %s5073_s29 = smul.u32 96, %s7107_s5  ;;  %vm3137_vm12 = vcmask 474112   ;;  %vm1897_vm13 = vcmask 277504   ;;  %vm1903_vm14 = vcmask 556304   ;;  %vm1917_vm15 = vcmask 64512   ;;  %p8917_p1 = scmp.ne.s32.totalorder %s8895_s15, 0 }
 0x13a   : > { %5280 = vrot.lane.b32.xlu1 %v5274_v3, %s6699_s1  ;;  %5270 = vrot.lane.b32.xlu0 %v5269_v5, %s8877_s3 }
 0x13b   : > { %s7768_s11 = scalar_lea.vmem [#allocation21], %s5073_s29  ;;  %s6715_s29 = smov 35  }
 0x13e   : > { %5290 = vrot.lane.b32.xlu1 %v5269_v5, %s6699_s1  ;;  %5285 = vrot.lane.b32.xlu0 %v5269_v5, %s8875_s24 }
 0x142   : > { %5300 = vrot.lane.b32.xlu1 %v5274_v3, %s6700_s25  ;;  %5295 = vrot.lane.b32.xlu0 %v5274_v3, %s6701_s12 }
 0x146   : > { %5310 = vrot.lane.b32.xlu1 %v5309_v7, %s8877_s3  ;;  %5305 = vrot.lane.b32.xlu0 %v5304_v8, %s6700_s25 }
 0x14a   : > { %5320 = vrot.lane.b32.xlu1 %v5304_v8, %s6702_s16  ;;  %5315 = vrot.lane.b32.xlu0 %v5274_v3, %s6702_s16 }
 0x14e   : > { %5330 = vrot.lane.b32.xlu1 %v5304_v8, %s6703_s14  ;;  %5325 = vrot.lane.b32.xlu0 %v5274_v3, %s6703_s14 }
 0x152   : > { %5340 = vrot.lane.b32.xlu1 %v5309_v7, %s6699_s1  ;;  %5335 = vrot.lane.b32.xlu0 %v5309_v7, %s8875_s24 }
 0x156   : > { %5350 = vrot.lane.b32.xlu1 %v5349_v10, %s6700_s25  ;;  %5345 = vrot.lane.b32.xlu0 %v5344_v11, %s6701_s12 }
 0x15a   : > { %619 = vrot.lane.b32.xlu1 %v7139_v1, %s8866_s13  ;;  %617 = vrot.lane.b32.xlu0 %v550_v0, %s8866_s13 }
 0x15e   : > { %5355 = vrot.lane.b32.xlu1 %v5349_v10, %s6702_s16  ;;  %621 = vrot.lane.b32.xlu0 %v811_v4, %s8866_s13 }
 0x162   : > { %5360 = vrot.lane.b32.xlu0 %v5349_v10, %s6703_s14  ;;  %875 = vrot.lane.b32.xlu1 %v811_v4, %s8866_s13 }
 0x166   : > { %879 = vrot.lane.b32.xlu1 %v815_v9, %s8866_s13  ;;  %877 = vrot.lane.b32.xlu0 %v812_v6, %s8866_s13 }
 0x16a   : > { %5365 = vrot.lane.b32.xlu0 %v5274_v3, %s6705_s26  ;;  %5370 = vrot.lane.b32.xlu1 %v5344_v11, %s6705_s26 }
 0x1a8   : > { %v5276_v12 = vpop.permute.xlu1 %5275  ;;  %v5266_v13 = vpop.permute.xlu0 %5265 }
 0x1a9   : > { %v5268_v31 = vunpack.i.h.bf16 %v5266_v13  ;;  %v5267_v32 = vunpack.i.l.bf16 %v5266_v13  ;;  %v5278_v39 = vunpack.i.h.bf16 %v5276_v12  ;;  %v5277_v44 = vunpack.i.l.bf16 %v5276_v12 }
 0x1ab   : > { %v564_v42 = vsel %vm562_vm0, %v5267_v32, %v5268_v31  ;;  %v573_v52 = vsel %vm571_vm1, %v5277_v44, %v5278_v39 }
 0x1ac   : > { %v5281_v14 = vpop.permute.xlu1 %5280  ;;  %v7179_v15 = vpop.permute.xlu0 %5270  ;;  %v5389_v48 = vpack.i.bf16 %v5268_v31, %v564_v42  ;;  %v5399_v55 = vpack.i.bf16 %v5278_v39, %v573_v52 }
 0x1ad   : > { %v5272_v33 = vunpack.i.l.bf16 %v7179_v15  ;;  %v5283_v40 = vunpack.i.h.bf16 %v5281_v14  ;;  %v5282_v45 = vunpack.i.l.bf16 %v5281_v14  ;;  %v5273_v63 = vunpack.i.h.bf16 %v7179_v15 }
 0x1af   : > { %v563_v43 = vsel %vm562_vm0, %v5272_v33, %v5267_v32  ;;  %v582_v53 = vsel %vm580_vm2, %v5282_v45, %v5283_v40 }
 0x1b0   : > { %v7181_v16 = vpop.permute.xlu1 %5290  ;;  %v7183_v17 = vpop.permute.xlu0 %5285  ;;  %v5394_v49 = vpack.i.bf16 %v563_v43, %v7142_v2  ;;  %v5404_v56 = vpack.i.bf16 %v5283_v40, %v582_v53 }
 0x1b1   : > { %v5287_v46 = vunpack.i.l.bf16 %v7183_v17  ;;  %v5292_v50 = vunpack.i.l.bf16 %v7181_v16 }
 0x1b3   : > { %v572_v57 = vsel %vm571_vm1, %v5287_v46, %v5277_v44  ;;  %v581_v60 = vsel %vm580_vm2, %v5292_v50, %v5282_v45 }
 0x1b4   : > { %v7185_v18 = vpop.permute.xlu1 %5300  ;;  %v5296_v19 = vpop.permute.xlu0 %5295  ;;  %v5409_v2 = vpack.i.bf16 %v581_v60, %v572_v57 }
 0x1b5   : > { %v5302_v20 = vunpack.i.l.bf16 %v7185_v18  ;;  %v5297_v21 = vunpack.i.l.bf16 %v5296_v19  ;;  %v5298_v51 = vunpack.i.h.bf16 %v5296_v19  ;;  %v5303_v54 = vunpack.i.h.bf16 %v7185_v18 }
 0x1b7   : > { %v5374_v22 = vpack.i.bf16 %v5302_v20, %v5297_v21  ;;  %v588_v61 = vsel %vm587_vm3, %v5297_v21, %v5298_v51  ;;  %v597_v4 = vsel %vm596_vm4, %v5302_v20, %v5303_v54  ;;  %v5293_v20 = vunpack.i.h.bf16 %v7181_v16 }
 0x1b8   : > { %v7188_v23 = vpop.permute.xlu0 %5305  ;;  %v7197_v28 = vpop.permute.xlu1 %5310  ;;  %v5414_v3 = vpack.i.bf16 %v5298_v51, %v588_v61 }
 0x1b9   : > { %5375 = vrot.lane.b32.xlu0 %v5374_v22, %s6705_s26  ;;  %v5308_v35 = vunpack.i.h.bf16 %v7188_v23  ;;  %v5312_v58 = vunpack.i.l.bf16 %v7197_v28  ;;  %v5307_v59 = vunpack.i.l.bf16 %v7188_v23  ;;  %v5313_v0 = vunpack.i.h.bf16 %v7197_v28 }
 0x1bb   : > { %v598_v7 = vsel %vm596_vm4, %v5303_v54, %v5307_v59  ;;  %v826_v8 = vsel %vm562_vm0, %v5273_v63, %v5312_v58  ;;  %v825_v13 = vsel %vm562_vm0, %v5313_v0, %v5273_v63  ;;  %v6706_v0 = vmov 0.0  }
 0x1bc   : > { %v7191_v24 = vpop.permute.xlu0 %5315  ;;  %v7210_v36 = vpop.permute.xlu1 %5320  ;;  %v5419_v11 = vpack.i.bf16 %v598_v7, %v597_v4  ;;  %v5424_v12 = vpack.i.bf16 %v5312_v58, %v826_v8  ;;  %v5429_v21 = vpack.i.bf16 %v825_v13, %v7139_v1  ;;  %v5288_v1 = vunpack.i.h.bf16 %v7183_v17  ;;  %785 = vmatprep.mubr.f32.mxu0 %v6706_v0  ;;  %1037 = vmatprep.mubr.f32.mxu1 %v6706_v0 }
 0x1bd   : > { %v5317_v26 = vunpack.i.l.bf16 %v7191_v24  ;;  %v5322_v5 = vunpack.i.l.bf16 %v7210_v36  ;;  %v5318_v6 = vunpack.i.h.bf16 %v7191_v24  ;;  %v5323_v42 = vunpack.i.h.bf16 %v7210_v36  ;;  %541 = vst [vmem:[%s7768_s11 + $0x58] sm:$0xff] %v6706_v0  ;;  %537 = vst [vmem:[%s7768_s11] sm:$0xff] %v6706_v0 }
 0x1be   : > { %540 = vst [vmem:[%s7768_s11 + $0x50] sm:$0xff] %v6706_v0 }
 0x1bf   : > { %v606_v18 = vsel %vm605_vm5, %v5317_v26, %v5318_v6  ;;  %v607_v19 = vsel %vm605_vm5, %v5318_v6, %v5322_v5  ;;  %v543_v5 = vld [vmem:[#allocation9] sm:$0xff] }
 0x1c0   : > { %v7193_v25 = vpop.permute.xlu0 %5325  ;;  %v7225_v47 = vpop.permute.xlu1 %5330  ;;  %v5434_v22 = vpack.i.bf16 %v607_v19, %v606_v18 }
 0x1c1   : > { %v5327_v27 = vunpack.i.l.bf16 %v7193_v25  ;;  %v5328_v9 = vunpack.i.h.bf16 %v7193_v25  ;;  %v5332_v14 = vunpack.i.l.bf16 %v7225_v47 }
 0x1c3   : > { %v5379_v29 = vpack.i.bf16 %v5327_v27, %v5317_v26  ;;  %v615_v28 = vsel %vm614_vm6, %v5327_v27, %v5328_v9  ;;  %v616_v26 = vsel %vm614_vm6, %v5328_v9, %v5332_v14 }
 0x1c4   : > { %v7203_v30 = vpop.permute.xlu0 %5335  ;;  %v5341_v62 = vpop.permute.xlu1 %5340  ;;  %v5439_v25 = vpack.i.bf16 %v616_v26, %v615_v28 }
 0x1c5   : > { %5380 = vrot.lane.b32.xlu0 %v5379_v29, %s6705_s26  ;;  %v5342_v15 = vunpack.i.l.bf16 %v5341_v62  ;;  %v5337_v29 = vunpack.i.l.bf16 %v7203_v30  ;;  %v5338_v16 = vunpack.i.h.bf16 %v7203_v30  ;;  %v5343_v27 = vunpack.i.h.bf16 %v5341_v62 }
 0x1c7   : > { %v842_v31 = vsel %vm580_vm2, %v5293_v20, %v5342_v15  ;;  %v833_v45 = vsel %vm571_vm1, %v5338_v16, %v5288_v1 }
 0x1c8   : > { %v7207_v34 = vpop.permute.xlu0 %5345  ;;  %v5351_v10 = vpop.permute.xlu1 %5350  ;;  %v5449_v33 = vpack.i.bf16 %v5342_v15, %v842_v31 }
 0x1c9   : > { %v5347_v37 = vunpack.i.l.bf16 %v7207_v34  ;;  %v5348_v24 = vunpack.i.h.bf16 %v7207_v34  ;;  %v5352_v43 = vunpack.i.l.bf16 %v5351_v10  ;;  %v5353_v46 = vunpack.i.h.bf16 %v5351_v10 }
 0x1ca   : > { %v841_v34 = vsel %vm580_vm2, %v5343_v27, %v5293_v20 }
 0x1cb   : > { %v5384_v38 = vpack.i.bf16 %v5308_v35, %v5347_v37  ;;  %v847_v39 = vsel %vm587_vm3, %v5347_v37, %v5348_v24  ;;  %v5454_v37 = vpack.i.bf16 %v841_v34, %v833_v45  ;;  %v857_v36 = vsel %vm596_vm4, %v5308_v35, %v5352_v43 }
 0x1cc   : > { %v7217_v41 = vpop.permute.xlu0 %617  ;;  %v620_v32 = vpop.permute.xlu1 %619  ;;  %v5459_v30 = vpack.i.bf16 %v5348_v24, %v847_v39  ;;  %v858_v51 = vsel %vm596_vm4, %v5352_v43, %v5353_v46 }
 0x1cd   : > { %674 = vrot.lane.b32.xlu1 %v7217_v41, %s6705_s26  ;;  %5385 = vrot.lane.b32.xlu0 %v5384_v38, %s6705_s26  ;;  %v834_v38 = vsel %vm571_vm1, %v5288_v1, %v5337_v29  ;;  %v624_v50 = vsel %vm623_vm7, %v7217_v41, %v620_v32  ;;  %v5464_v23 = vpack.i.bf16 %v858_v51, %v857_v36 }
 0x1ce   : > { %v5444_v44 = vpack.i.bf16 %v5337_v29, %v834_v38 }
 0x1d0   : > { %v5356_v40 = vpop.permute.xlu1 %5355  ;;  %v622_v17 = vpop.permute.xlu0 %621 }
 0x1d1   : > { %5390 = vrot.lane.b32.xlu1 %v5389_v48, %s6705_s26  ;;  %5395 = vrot.lane.b32.xlu0 %v5394_v49, %s6705_s26  ;;  %v5358_v48 = vunpack.i.h.bf16 %v5356_v40  ;;  %v5357_v49 = vunpack.i.l.bf16 %v5356_v40  ;;  %v625_v61 = vsel %vm623_vm7, %v620_v32, %v622_v17 }
 0x1d3   : > { %v865_v52 = vsel %vm605_vm5, %v5323_v42, %v5357_v49  ;;  %v866_v53 = vsel %vm605_vm5, %v5357_v49, %v5358_v48 }
 0x1d4   : > { %v5361_v54 = vpop.permute.xlu0 %5360  ;;  %v5469_v57 = vpack.i.bf16 %v866_v53, %v865_v52 }
 0x1d5   : > { %5400 = vrot.lane.b32.xlu1 %v5399_v55, %s6705_s26  ;;  %5405 = vrot.lane.b32.xlu0 %v5404_v56, %s6705_s26  ;;  %v876_v55 = vpop.permute.xlu1 %875  ;;  %v5333_v56 = vunpack.i.h.bf16 %v7225_v47  ;;  %v5363_v35 = vunpack.i.h.bf16 %v5361_v54  ;;  %v5362_v58 = vunpack.i.l.bf16 %v5361_v54 }
 0x1d7   : > { %v5474_v41 = vpack.i.bf16 %v5333_v56, %v5323_v42  ;;  %v873_v62 = vsel %vm614_vm6, %v5333_v56, %v5362_v58  ;;  %v874_v63 = vsel %vm614_vm6, %v5362_v58, %v5363_v35 }
 0x1d8   : > { %v878_v60 = vpop.permute.xlu0 %877 }
 0x1d9   : > { %5410 = vrot.lane.b32.xlu1 %v5409_v2, %s6705_s26  ;;  %5415 = vrot.lane.b32.xlu0 %v5414_v3, %s6705_s26  ;;  %v880_v59 = vpop.permute.xlu1 %879  ;;  %v5479_v2 = vpack.i.bf16 %v874_v63, %v873_v62  ;;  %v6707_v3 = vmov 0   ;;  %v881_v4 = vsel %vm623_vm7, %v876_v55, %v878_v60 }
 0x1da   : > { %v882_v47 = vsel %vm623_vm7, %v878_v60, %v880_v59  ;;  %5484 = vset.pattern.permute.xlu0 %v6707_v3  ;;  %5705 = vset.pattern.permute.xlu1 %v6707_v3 }
 0x1dc   : > { %v5366_v6 = vpop.permute.xlu0 %5365 }
 0x1dd   : > { %5420 = vrot.lane.b32.xlu1 %v5419_v11, %s6705_s26  ;;  %5425 = vrot.lane.b32.xlu0 %v5424_v12, %s6705_s26  ;;  %v7309_v8 = vpop.permute.xlu1 %5370  ;;  %v5368_v12 = vunpack.i.h.bf16 %v5366_v6  ;;  %v5367_v13 = vunpack.i.l.bf16 %v5366_v6 }
 0x1de   : > { %v5372_v45 = vunpack.i.l.bf16 %v7309_v8 }
 0x1e1   : > { %5430 = vrot.lane.b32.xlu1 %v5429_v21, %s6705_s26  ;;  %5435 = vrot.lane.b32.xlu0 %v5434_v22, %s6705_s26  ;;  %v682_v22 = vsel %vm680_vm8, %v5367_v13, %v5368_v12 }
 0x1e5   : > { %5440 = vrot.lane.b32.xlu1 %v5439_v25, %s6705_s26  ;;  %5450 = vrot.lane.b32.xlu0 %v5449_v33, %s6705_s26 }
 0x1e9   : > { %5445 = vrot.lane.b32.xlu1 %v5444_v44, %s6705_s26  ;;  %5460 = vrot.lane.b32.xlu0 %v5459_v30, %s6705_s26  ;;  %v5373_v30 = vunpack.i.h.bf16 %v7309_v8 }
 0x1ed   : > { %5455 = vrot.lane.b32.xlu1 %v5454_v37, %s6705_s26  ;;  %676 = vrot.lane.b32.xlu0 %v624_v50, %s6705_s26 }
 0x1f1   : > { %5465 = vrot.lane.b32.xlu1 %v5464_v23, %s6705_s26  ;;  %5470 = vrot.lane.b32.xlu0 %v5469_v57, %s6705_s26  ;;  %v938_v57 = vsel %vm680_vm8, %v5372_v45, %v5373_v30 }
 0x1f5   : > { %678 = vrot.lane.b32.xlu1 %v625_v61, %s6705_s26  ;;  %5475 = vrot.lane.b32.xlu0 %v5474_v41, %s6705_s26 }
 0x1f9   : > { %5480 = vrot.lane.b32.xlu1 %v5479_v2, %s6705_s26  ;;  %935 = vrot.lane.b32.xlu0 %v882_v47, %s6705_s26 }
 0x1fd   : > { %933 = vrot.lane.b32.xlu1 %v881_v4, %s6705_s26  ;;  %546 = vperm.xlu0 %5484, %v543_v5  }
 0x201   : > { %931 = vrot.lane.b32.xlu1 %v876_v55, %s6705_s26 }
 0x22b   : > { %v5376_v7 = vpop.permute.xlu0 %5375 }
 0x22c   : > { %v5378_v37 = vunpack.i.h.bf16 %v5376_v7  ;;  %v5377_v36 = vunpack.i.l.bf16 %v5376_v7 }
 0x237   : > { %v7311_v9 = vpop.permute.xlu0 %5380 }
 0x238   : > { %v5382_v8 = vunpack.i.l.bf16 %v7311_v9 }
 0x23f   : > { %v7313_v10 = vpop.permute.xlu1 %674  ;;  %v7315_v11 = vpop.permute.xlu0 %5385 }
 0x243   : > { %v5391_v14 = vpop.permute.xlu1 %5390  ;;  %v5396_v15 = vpop.permute.xlu0 %5395 }
 0x244   : > { %v5393_v18 = vunpack.i.h.bf16 %v5391_v14  ;;  %v5392_v19 = vunpack.i.l.bf16 %v5391_v14  ;;  %v5398_v20 = vunpack.i.h.bf16 %v5396_v15  ;;  %v5397_v21 = vunpack.i.l.bf16 %v5396_v15 }
 0x245   : > { %v5383_v15 = vunpack.i.h.bf16 %v7311_v9 }
 0x246   : > { %v684_v28 = vsel %vm680_vm8, %v5392_v19, %v5393_v18  ;;  %v681_v29 = vsel %vm680_vm8, %v5397_v21, %v5367_v13  ;;  %v683_v24 = vsel %vm680_vm8, %v5398_v20, %v5392_v19 }
 0x247   : > { %v5401_v26 = vpop.permute.xlu1 %5400  ;;  %v5406_v31 = vpop.permute.xlu0 %5405  ;;  %v4860_v32 = vpack.c.bf16 %v684_v28, %v682_v22  ;;  %v4862_v1 = vpack.c.bf16 %v683_v24, %v681_v29 }
 0x248   : > { %v5403_v16 = vunpack.i.h.bf16 %v5401_v26  ;;  %v5402_v25 = vunpack.i.l.bf16 %v5401_v26  ;;  %v5408_v33 = vunpack.i.h.bf16 %v5406_v31  ;;  %v5407_v27 = vunpack.i.l.bf16 %v5406_v31 }
 0x249   : > { %4861 = vmatprep.subr.bf16.mxu0 %v4860_v32 }
 0x24a   : > { %4863 = vmatpush1.bf16.msra.mxu0 %v4862_v1  ;;  %v686_v38 = vsel %vm680_vm8, %v5402_v25, %v5403_v16  ;;  %v688_v39 = vsel %vm680_vm8, %v5407_v27, %v5408_v33 }
 0x24b   : > { %v5411_v40 = vpop.permute.xlu1 %5410  ;;  %v5416_v42 = vpop.permute.xlu0 %5415  ;;  %v4864_v43 = vpack.c.bf16 %v688_v39, %v686_v38 }
 0x24c   : > { %v5413_v17 = vunpack.i.h.bf16 %v5411_v40  ;;  %v5412_v44 = vunpack.i.l.bf16 %v5411_v40  ;;  %v5418_v46 = vunpack.i.h.bf16 %v5416_v42  ;;  %v5417_v48 = vunpack.i.l.bf16 %v5416_v42 }
 0x24d   : > { %4865 = vmatprep.subr.bf16.mxu0 %v4864_v43 }
 0x24e   : > { %v685_v49 = vsel %vm680_vm8, %v5412_v44, %v5402_v25  ;;  %v687_v34 = vsel %vm680_vm8, %v5413_v17, %v5407_v27  ;;  %v690_v23 = vsel %vm680_vm8, %v5417_v48, %v5418_v46  ;;  %v689_v41 = vsel %vm680_vm8, %v5377_v36, %v5417_v48 }
 0x24f   : > { %v5421_v50 = vpop.permute.xlu1 %5420  ;;  %v5426_v51 = vpop.permute.xlu0 %5425  ;;  %v4866_v52 = vpack.c.bf16 %v687_v34, %v685_v49  ;;  %v5388_v49 = vunpack.i.h.bf16 %v7315_v11  ;;  %v5387_v34 = vunpack.i.l.bf16 %v7315_v11 }
 0x250   : > { %v5423_v53 = vunpack.i.h.bf16 %v5421_v50  ;;  %v5422_v54 = vunpack.i.l.bf16 %v5421_v50  ;;  %v5428_v55 = vunpack.i.h.bf16 %v5426_v51  ;;  %v5427_v56 = vunpack.i.l.bf16 %v5426_v51 }
 0x251   : > { %4867 = vmatpush1.bf16.msra.mxu0 %v4866_v52 }
 0x252   : > { %v692_v35 = vsel %vm680_vm8, %v5422_v54, %v5423_v53  ;;  %v940_v58 = vsel %vm680_vm8, %v5427_v56, %v5428_v55  ;;  %v691_v59 = vsel %vm680_vm8, %v5378_v37, %v5422_v54 }
 0x253   : > { %v5431_v60 = vpop.permute.xlu1 %5430  ;;  %v5436_v61 = vpop.permute.xlu0 %5435  ;;  %v4868_v62 = vpack.c.bf16 %v692_v35, %v690_v23  ;;  %v4876_v63 = vpack.c.bf16 %v940_v58, %v938_v57  ;;  %v4870_v47 = vpack.c.bf16 %v691_v59, %v689_v41  ;;  %v542_v35 = vld [vmem:[#allocation7] sm:$0xff] }
 0x254   : > { %v5433_v2 = vunpack.i.h.bf16 %v5431_v60  ;;  %v5432_v3 = vunpack.i.l.bf16 %v5431_v60  ;;  %v5438_v4 = vunpack.i.h.bf16 %v5436_v61  ;;  %v5437_v5 = vunpack.i.l.bf16 %v5436_v61 }
 0x255   : > { %4869 = vmatprep.subr.bf16.mxu0 %v4868_v62  ;;  %4877 = vmatprep.subr.bf16.mxu1 %v4876_v63 }
 0x256   : > { %4871 = vmatpush1.bf16.msra.mxu0 %v4870_v47  ;;  %v937_v6 = vsel %vm680_vm8, %v5432_v3, %v5372_v45  ;;  %v939_v7 = vsel %vm680_vm8, %v5433_v2, %v5427_v56  ;;  %v694_v20 = vsel %vm680_vm8, %v5437_v5, %v5438_v4  ;;  %v693_v21 = vsel %vm680_vm8, %v5382_v8, %v5437_v5 }
 0x257   : > { %v5441_v12 = vpop.permute.xlu1 %5440  ;;  %v5451_v13 = vpop.permute.xlu0 %5450  ;;  %v4878_v14 = vpack.c.bf16 %v939_v7, %v937_v6 }
 0x258   : > { %v5443_v18 = vunpack.i.h.bf16 %v5441_v12  ;;  %v5442_v19 = vunpack.i.l.bf16 %v5441_v12  ;;  %v5453_v22 = vunpack.i.h.bf16 %v5451_v13  ;;  %v5452_v28 = vunpack.i.l.bf16 %v5451_v13 }
 0x259   : > { %4879 = vmatpush1.bf16.msra.mxu1 %v4878_v14 }
 0x25a   : > { %v696_v29 = vsel %vm680_vm8, %v5442_v19, %v5443_v18  ;;  %v695_v24 = vsel %vm680_vm8, %v5383_v15, %v5442_v19  ;;  %v944_v33 = vsel %vm680_vm8, %v5452_v28, %v5453_v22  ;;  %v796_v18 = vlaneseq }
 0x25b   : > { %v5446_v26 = vpop.permute.xlu1 %5445  ;;  %v5461_v31 = vpop.permute.xlu0 %5460  ;;  %v4872_v32 = vpack.c.bf16 %v696_v29, %v694_v20  ;;  %v4874_v1 = vpack.c.bf16 %v695_v24, %v693_v21 }
 0x25c   : > { %v5448_v16 = vunpack.i.h.bf16 %v5446_v26  ;;  %v5447_v25 = vunpack.i.l.bf16 %v5446_v26  ;;  %v5463_v43 = vunpack.i.h.bf16 %v5461_v31  ;;  %v5462_v17 = vunpack.i.l.bf16 %v5461_v31 }
 0x25d   : > { %4873 = vmatprep.subr.bf16.mxu0 %v4872_v32  ;;  %v797_v19 = vshrl.u32 %v796_v18, 7 }
 0x25e   : > { %4875 = vmatpush1.bf16.msra.mxu0 %v4874_v1  ;;  %v942_v9 = vsel %vm680_vm8, %v5447_v25, %v5448_v16  ;;  %v946_v50 = vsel %vm680_vm8, %v5462_v17, %v5463_v43  ;;  %v945_v52 = vsel %vm680_vm8, %v5387_v34, %v5462_v17 }
 0x25f   : > { %v5456_v27 = vpop.permute.xlu1 %5455  ;;  %v677_v38 = vpop.permute.xlu0 %676  ;;  %v4880_v39 = vpack.c.bf16 %v944_v33, %v942_v9  ;;  %v798_v20 = vsub.s32 0, %v797_v19  ;;  %v802_v22 = vsub.s32 1, %v797_v19  ;;  %v794_v9 = vld [vmem:[#allocation19] sm:$0x3] }
 0x260   : > { %v5458_v40 = vunpack.i.h.bf16 %v5456_v27  ;;  %v5457_v42 = vunpack.i.l.bf16 %v5456_v27  ;;  %v697_v11 = vsel %vm680_vm8, %v7313_v10, %v677_v38 }
 0x261   : > { %4881 = vmatprep.subr.bf16.mxu1 %v4880_v39  ;;  %v799_v39 = vrot.slane %v794_v9, %v798_v20  ;;  %v803_v17 = vrot.slane %v794_v9, %v802_v22 }
 0x262   : > { %v941_v44 = vsel %vm680_vm8, %v5457_v42, %v5447_v25  ;;  %v943_v30 = vsel %vm680_vm8, %v5458_v40, %v5452_v28  ;;  %v1046_v28 = vld [vmem:[#allocation19 + $0x2] sm:$0x3] }
 0x263   : > { %v5466_v45 = vpop.permute.xlu1 %5465  ;;  %v5471_v46 = vpop.permute.xlu0 %5470  ;;  %v4882_v48 = vpack.c.bf16 %v943_v30, %v941_v44  ;;  %v1051_v26 = vrot.slane %v1046_v28, %v798_v20  ;;  %v1055_v1 = vrot.slane %v1046_v28, %v802_v22 }
 0x264   : > { %v5468_v37 = vunpack.i.h.bf16 %v5466_v45  ;;  %v5467_v36 = vunpack.i.l.bf16 %v5466_v45  ;;  %v5473_v58 = vunpack.i.h.bf16 %v5471_v46  ;;  %v5472_v41 = vunpack.i.l.bf16 %v5471_v46 }
 0x265   : > { %4883 = vmatpush1.bf16.msra.mxu1 %v4882_v48 }
 0x266   : > { %v948_v51 = vsel %vm680_vm8, %v5467_v36, %v5468_v37  ;;  %v947_v53 = vsel %vm680_vm8, %v5388_v49, %v5467_v36  ;;  %v950_v47 = vsel %vm680_vm8, %v5472_v41, %v5473_v58 }
 0x267   : > { %v679_v54 = vpop.permute.xlu1 %678  ;;  %v5476_v55 = vpop.permute.xlu0 %5475  ;;  %v4884_v56 = vpack.c.bf16 %v948_v51, %v946_v50  ;;  %v4886_v23 = vpack.c.bf16 %v947_v53, %v945_v52 }
 0x268   : > { %v698_v57 = vsel %vm680_vm8, %v677_v38, %v679_v54  ;;  %v5477_v59 = vunpack.i.l.bf16 %v5476_v55  ;;  %v5478_v61 = vunpack.i.h.bf16 %v5476_v55 }
 0x269   : > { %737 = vmatprep.subr.mxu0 %v698_v57  ;;  %4885 = vmatprep.subr.bf16.mxu1 %v4884_v56 }
 0x26a   : > { %738 = vmatpush1.msra.mxu0 %v697_v11  ;;  %4887 = vmatpush1.bf16.msra.mxu1 %v4886_v23  ;;  %v949_v3 = vsel %vm680_vm8, %v5477_v59, %v5472_v41 }
 0x26b   : > { %v5481_v60 = vpop.permute.xlu1 %5480  ;;  %4559 = vmatmul.mubr.msk.f32.vlgmr.msra.gmra.mrb[0].mxu0 %vm717_vm9, %v542_v35  ;;  %v936_v5 = vpop.permute.xlu0 %935 }
 0x26c   : > { %v5483_v62 = vunpack.i.h.bf16 %v5481_v60  ;;  %v5482_v63 = vunpack.i.l.bf16 %v5481_v60  ;;  %1325 = vmatprep.mubr.f32.mxu0 %v6706_v0 }
 0x26e   : > { %v952_v2 = vsel %vm680_vm8, %v5482_v63, %v5483_v62  ;;  %v951_v10 = vsel %vm680_vm8, %v5478_v61, %v5482_v63 }
 0x26f   : > { %v934_v4 = vpop.permute.xlu1 %933  ;;  %v4888_v6 = vpack.c.bf16 %v952_v2, %v950_v47  ;;  %v4890_v7 = vpack.c.bf16 %v951_v10, %v949_v3 }
 0x270   : > { %v954_v8 = vsel %vm680_vm8, %v934_v4, %v936_v5 }
 0x271   : > { %4889 = vmatprep.subr.bf16.mxu1 %v4888_v6 }
 0x272   : > { %4891 = vmatpush1.bf16.msra.mxu1 %v4890_v7 }
 0x273   : > { %v932_v12 = vpop.permute.xlu1 %931  ;;  %989 = vmatprep.subr.mxu1 %v954_v8 }
 0x274   : > { %v953_v13 = vsel %vm680_vm8, %v932_v12, %v934_v4 }
 0x276   : > { %990 = vmatpush1.msra.mxu1 %v953_v13 }
 0x277   : > { %4560 = vmatmul.mubr.msk.f32.vlgmr.msra.gmra.mrb[0].mxu1 %vm717_vm9, %v542_v35 }
 0x278   : > { %1585 = vmatprep.mubr.f32.mxu1 %v6706_v0 }
 0x27c   : > { %v547_v21 = vpop.permute.xlu0 %546 }
 0x33e   : > { %v787_v14 = vpop.f32.mrb[0].mxu0 }
 0x33f   : > { %v789_v15 = vpop.f32.mrb[1].mxu0  ;;  %v788_v16 = vadd.f32 %v787_v14, %v547_v21 }
 0x340   : > { %v790_v25 = vadd.f32 %v789_v15, %v547_v21 }
 0x341   : > { %v792_v42 = vmax.f32 %v788_v16, 0.0 }
 0x342   : > { %v793_v43 = vmax.f32 %v790_v25, 0.0 }
 0x343   : > { %v806_v45 = vmul.f32 %v799_v39, %v792_v42 }
 0x344   : > { %v7369_v46 = vmul.f32 %v803_v17, %v793_v43 }
 0x346   : > { %v5510_v49 = vpack.i.bf16 %v7369_v46, %v806_v45 }
 0x34a   : > { %v1039_v29 = vpop.f32.mrb[0].mxu1 }
 0x34b   : > { %v1040_v24 = vadd.f32 %v1039_v29, %v547_v21  ;;  %v1041_v31 = vpop.f32.mrb[1].mxu1 }
 0x34c   : > { %v1042_v32 = vadd.f32 %v1041_v31, %v547_v21 }
 0x34d   : > { %v1044_v33 = vmax.f32 %v1040_v24, 0.0 }
 0x34e   : > { %v1045_v27 = vmax.f32 %v1042_v32, 0.0 }
 0x34f   : > { %v1058_v38 = vmul.f32 %v1051_v26, %v1044_v33 }
 0x350   : > { %v1059_v40 = vmul.f32 %v1055_v1, %v1045_v27 }
 0x351   : > { %v5490_v44 = vpack.i.bf16 %v1058_v38, %v6706_v0  ;;  %v5500_v48 = vpack.i.bf16 %v1058_v38, %v1058_v38 }
 0x352   : > { %v7367_v30 = vpack.i.bf16 %v1059_v40, %v1058_v38  ;;  %v5550_v34 = vpack.i.bf16 %v7369_v46, %v1059_v40  ;;  %v5570_v37 = vpack.i.bf16 %v6706_v0, %v1059_v40 }
 0x353   : > { %5491 = vrot.lane.b32.xlu0 %v5490_v44, %s8875_s24  ;;  %5486 = vrot.lane.b32.xlu1 %v5490_v44, %s8877_s3 }
 0x357   : > { %5501 = vrot.lane.b32.xlu0 %v5500_v48, %s6700_s25  ;;  %5496 = vrot.lane.b32.xlu1 %v5490_v44, %s6699_s1 }
 0x35b   : > { %5506 = vrot.lane.b32.xlu0 %v5500_v48, %s6702_s16  ;;  %5511 = vrot.lane.b32.xlu1 %v5510_v49, %s8877_s3 }
 0x35f   : > { %5516 = vrot.lane.b32.xlu0 %v5510_v49, %s8875_s24  ;;  %5521 = vrot.lane.b32.xlu1 %v5510_v49, %s6699_s1 }
 0x363   : > { %5526 = vrot.lane.b32.xlu0 %v5510_v49, %s6701_s12  ;;  %5536 = vrot.lane.b32.xlu1 %v5510_v49, %s6700_s25 }
 0x367   : > { %5531 = vrot.lane.b32.xlu0 %v5500_v48, %s6703_s14  ;;  %5541 = vrot.lane.b32.xlu1 %v5510_v49, %s6702_s16 }
 0x36b   : > { %1153 = vrot.lane.b32.xlu0 %v7369_v46, %s8866_s13  ;;  %5546 = vrot.lane.b32.xlu1 %v5510_v49, %s6703_s14 }
 0x36f   : > { %5551 = vrot.lane.b32.xlu0 %v5550_v34, %s8877_s3  ;;  %1151 = vrot.lane.b32.xlu1 %v806_v45, %s8866_s13 }
 0x373   : > { %5561 = vrot.lane.b32.xlu0 %v5550_v34, %s6699_s1  ;;  %1155 = vrot.lane.b32.xlu1 %v1058_v38, %s8866_s13 }
 0x377   : > { %5571 = vrot.lane.b32.xlu0 %v5570_v37, %s6700_s25  ;;  %1423 = vrot.lane.b32.xlu1 %v1058_v38, %s8866_s13 }
 0x37b   : > { %5581 = vrot.lane.b32.xlu0 %v5570_v37, %s6703_s14  ;;  %5556 = vrot.lane.b32.xlu1 %v5550_v34, %s8875_s24  ;;  %s6712_s14 = smov 58  }
 0x37f   : > { %1425 = vrot.lane.b32.xlu0 %v1059_v40, %s8866_s13  ;;  %5566 = vrot.lane.b32.xlu1 %v7367_v30, %s6701_s12  ;;  %s6711_s12 = smov 40  }
 0x383   : > { %5586 = vrot.lane.b32.xlu0 %v5510_v49, %s6705_s26  ;;  %5576 = vrot.lane.b32.xlu1 %v5570_v37, %s6702_s16 }
 0x387   : > { %1427 = vrot.lane.b32.xlu1 %v6706_v0, %s8866_s13  ;;  %s6716_s13 = smov 34  }
 0x3c5   : > { %v7402_v36 = vpop.permute.xlu0 %5491  ;;  %v7404_v50 = vpop.permute.xlu1 %5486 }
 0x3c6   : > { %v5493_v55 = vunpack.i.l.bf16 %v7402_v36  ;;  %v5488_v4 = vunpack.i.l.bf16 %v7404_v50 }
 0x3c9   : > { %v7406_v51 = vpop.permute.xlu0 %5501  ;;  %v7408_v52 = vpop.permute.xlu1 %5496 }
 0x3ca   : > { %v5498_v56 = vunpack.i.l.bf16 %v7408_v52  ;;  %v5503_v15 = vunpack.i.l.bf16 %v7406_v51 }
 0x3cd   : > { %v7410_v53 = vpop.permute.xlu0 %5506  ;;  %v5512_v54 = vpop.permute.xlu1 %5511 }
 0x3ce   : > { %v5514_v35 = vunpack.i.h.bf16 %v5512_v54  ;;  %v5513_v11 = vunpack.i.l.bf16 %v5512_v54  ;;  %v5508_v32 = vunpack.i.l.bf16 %v7410_v53 }
 0x3d0   : > { %v1104_v10 = vsel %vm562_vm0, %v5513_v11, %v5514_v35  ;;  %v1103_v12 = vsel %vm562_vm0, %v5488_v4, %v5513_v11 }
 0x3d1   : > { %v5517_v23 = vpop.permute.xlu0 %5516  ;;  %v5522_v57 = vpop.permute.xlu1 %5521  ;;  %v5605_v8 = vpack.i.bf16 %v5514_v35, %v1104_v10  ;;  %v5595_v18 = vpack.i.bf16 %v1103_v12, %v6706_v0  ;;  %v5489_v35 = vunpack.i.h.bf16 %v7404_v50 }
 0x3d2   : > { %v5518_v58 = vunpack.i.l.bf16 %v5517_v23  ;;  %v5523_v41 = vunpack.i.l.bf16 %v5522_v57  ;;  %v5519_v47 = vunpack.i.h.bf16 %v5517_v23  ;;  %v5524_v6 = vunpack.i.h.bf16 %v5522_v57 }
 0x3d4   : > { %v1111_v59 = vsel %vm571_vm1, %v5493_v55, %v5518_v58  ;;  %v1119_v60 = vsel %vm580_vm2, %v5498_v56, %v5523_v41  ;;  %v1112_v14 = vsel %vm571_vm1, %v5518_v58, %v5519_v47  ;;  %v1120_v28 = vsel %vm580_vm2, %v5523_v41, %v5524_v6 }
 0x3d5   : > { %v5527_v61 = vpop.permute.xlu0 %5526  ;;  %v5537_v62 = vpop.permute.xlu1 %5536  ;;  %v5600_v63 = vpack.i.bf16 %v1119_v60, %v1111_v59  ;;  %v5610_v22 = vpack.i.bf16 %v5519_v47, %v1112_v14  ;;  %v5615_v1 = vpack.i.bf16 %v5524_v6, %v1120_v28 }
 0x3d6   : > { %v5528_v2 = vunpack.i.l.bf16 %v5527_v61  ;;  %v5538_v3 = vunpack.i.l.bf16 %v5537_v62  ;;  %v5539_v13 = vunpack.i.h.bf16 %v5537_v62  ;;  %v5529_v19 = vunpack.i.h.bf16 %v5527_v61 }
 0x3d7   : > { %5601 = vrot.lane.b32.xlu1 %v5600_v63, %s6705_s26  ;;  %v5504_v61 = vunpack.i.h.bf16 %v7406_v51  ;;  %v5494_v63 = vunpack.i.h.bf16 %v7402_v36  ;;  %v5499_v51 = vunpack.i.h.bf16 %v7408_v52 }
 0x3d8   : > { %v5590_v5 = vpack.i.bf16 %v5538_v3, %v5528_v2  ;;  %v1133_v26 = vsel %vm596_vm4, %v5538_v3, %v5539_v13  ;;  %v1134_v31 = vsel %vm596_vm4, %v5539_v13, %v5503_v15  ;;  %v1125_v27 = vsel %vm587_vm3, %v5528_v2, %v5529_v19 }
 0x3d9   : > { %v5542_v7 = vpop.permute.xlu1 %5541  ;;  %v7425_v20 = vpop.permute.xlu0 %5531  ;;  %v5625_v33 = vpack.i.bf16 %v1134_v31, %v1133_v26  ;;  %v5620_v43 = vpack.i.bf16 %v5529_v19, %v1125_v27 }
 0x3da   : > { %5591 = vrot.lane.b32.xlu0 %v5590_v5, %s6705_s26  ;;  %v5544_v29 = vunpack.i.h.bf16 %v5542_v7  ;;  %v5543_v24 = vunpack.i.l.bf16 %v5542_v7  ;;  %v5533_v40 = vunpack.i.l.bf16 %v7425_v20 }
 0x3db   : > { %5606 = vrot.lane.b32.xlu1 %v5605_v8, %s6705_s26 }
 0x3dc   : > { %v1141_v38 = vsel %vm605_vm5, %v5543_v24, %v5544_v29  ;;  %v1142_v39 = vsel %vm605_vm5, %v5544_v29, %v5508_v32  ;;  %v5509_v32 = vunpack.i.h.bf16 %v7410_v53 }
 0x3dd   : > { %v5547_v21 = vpop.permute.xlu1 %5546  ;;  %v1154_v42 = vpop.permute.xlu0 %1153  ;;  %v5630_v44 = vpack.i.bf16 %v1142_v39, %v1141_v38 }
 0x3de   : > { %5596 = vrot.lane.b32.xlu0 %v5595_v18, %s6705_s26  ;;  %v5549_v16 = vunpack.i.h.bf16 %v5547_v21  ;;  %v5548_v25 = vunpack.i.l.bf16 %v5547_v21 }
 0x3df   : > { %5611 = vrot.lane.b32.xlu1 %v5610_v22, %s6705_s26 }
 0x3e0   : > { %v1149_v45 = vsel %vm614_vm6, %v5548_v25, %v5549_v16  ;;  %v1150_v48 = vsel %vm614_vm6, %v5549_v16, %v5533_v40  ;;  %v5635_v54 = vpack.i.bf16 %v5548_v25, %v5543_v24 }
 0x3e1   : > { %v1152_v9 = vpop.permute.xlu1 %1151  ;;  %v5640_v49 = vpack.i.bf16 %v1150_v48, %v1149_v45  ;;  %v5552_v34 = vpop.permute.xlu0 %5551  ;;  %v1066_v45 = vld [vmem:[#allocation12] sm:$0xff]  ;;  %v1069_v48 = vld [vmem:[#allocation12 + $0x18] sm:$0xff] }
 0x3e2   : > { %5616 = vrot.lane.b32.xlu0 %v5615_v1, %s6705_s26  ;;  %v5553_v55 = vunpack.i.l.bf16 %v5552_v34  ;;  %v1157_v23 = vsel %vm623_vm7, %v1152_v9, %v1154_v42  ;;  %v5554_v58 = vunpack.i.h.bf16 %v5552_v34  ;;  %v5534_v1 = vunpack.i.h.bf16 %v7425_v20 }
 0x3e3   : > { %5626 = vrot.lane.b32.xlu1 %v5625_v33, %s6705_s26 }
 0x3e4   : > { %v1374_v41 = vsel %vm562_vm0, %v5489_v35, %v5553_v55  ;;  %v1373_v2 = vsel %vm562_vm0, %v5554_v58, %v5489_v35  ;;  %v5695_v20 = vpack.i.bf16 %v5534_v1, %v5509_v32 }
 0x3e5   : > { %v1156_v17 = vpop.permute.xlu1 %1155  ;;  %v5562_v11 = vpop.permute.xlu0 %5561  ;;  %v5655_v47 = vpack.i.bf16 %v5553_v55, %v1374_v41  ;;  %v5660_v7 = vpack.i.bf16 %v1373_v2, %v7369_v46 }
 0x3e6   : > { %5621 = vrot.lane.b32.xlu0 %v5620_v43, %s6705_s26  ;;  %v1158_v57 = vsel %vm623_vm7, %v1154_v42, %v1156_v17  ;;  %v5563_v3 = vunpack.i.l.bf16 %v5562_v11  ;;  %v5564_v6 = vunpack.i.h.bf16 %v5562_v11 }
 0x3e7   : > { %5631 = vrot.lane.b32.xlu1 %v5630_v44, %s6705_s26  ;;  %v1068_v44 = vld [vmem:[#allocation12 + $0x10] sm:$0xff] }
 0x3e8   : > { %v1389_v18 = vsel %vm580_vm2, %v5564_v6, %v5499_v51 }
 0x3e9   : > { %v7443_v37 = vpop.permute.xlu1 %1423  ;;  %v5572_v10 = vpop.permute.xlu0 %5571 }
 0x3ea   : > { %5641 = vrot.lane.b32.xlu0 %v5640_v49, %s6705_s26  ;;  %v5574_v8 = vunpack.i.h.bf16 %v5572_v10  ;;  %v5573_v12 = vunpack.i.l.bf16 %v5572_v10  ;;  %v1067_v49 = vld [vmem:[#allocation12 + $0x8] sm:$0xff] }
 0x3eb   : > { %5636 = vrot.lane.b32.xlu1 %v5635_v54, %s6705_s26 }
 0x3ec   : > { %v1405_v22 = vsel %vm596_vm4, %v5504_v61, %v5573_v12  ;;  %v1406_v46 = vsel %vm596_vm4, %v5573_v12, %v5574_v8  ;;  %vm1923_vm4 = vcmask 343104  }
 0x3ed   : > { %v5557_v56 = vpop.permute.xlu1 %5556  ;;  %v5582_v19 = vpop.permute.xlu0 %5581  ;;  %v5685_v16 = vpack.i.bf16 %v1406_v46, %v1405_v22 }
 0x3ee   : > { %1209 = vrot.lane.b32.xlu0 %v1157_v23, %s6705_s26  ;;  %v5558_v59 = vunpack.i.l.bf16 %v5557_v56  ;;  %v5559_v4 = vunpack.i.h.bf16 %v5557_v56  ;;  %v5584_v24 = vunpack.i.h.bf16 %v5582_v19  ;;  %v5583_v26 = vunpack.i.l.bf16 %v5582_v19 }
 0x3ef   : > { %1211 = vrot.lane.b32.xlu1 %v1158_v57, %s6705_s26 }
 0x3f0   : > { %v1382_v5 = vsel %vm571_vm1, %v5494_v63, %v5558_v59  ;;  %v1381_v13 = vsel %vm571_vm1, %v5559_v4, %v5494_v63  ;;  %v1421_v27 = vsel %vm614_vm6, %v5534_v1, %v5583_v26  ;;  %v1422_v38 = vsel %vm614_vm6, %v5583_v26, %v5584_v24 }
 0x3f1   : > { %v5567_v60 = vpop.permute.xlu1 %5566  ;;  %v5665_v36 = vpack.i.bf16 %v5558_v59, %v1382_v5  ;;  %v5675_v21 = vpack.i.bf16 %v1389_v18, %v1381_v13  ;;  %v5700_v53 = vpack.i.bf16 %v1422_v38, %v1421_v27  ;;  %v1426_v40 = vpop.permute.xlu0 %1425  ;;  %vm1929_vm6 = vcmask 621904  }
 0x3f2   : > { %v5568_v62 = vunpack.i.l.bf16 %v5567_v60  ;;  %1207 = vrot.lane.b32.xlu0 %v1152_v9, %s6705_s26  ;;  %v5569_v14 = vunpack.i.h.bf16 %v5567_v60  ;;  %v1429_v43 = vsel %vm623_vm7, %v7443_v37, %v1426_v40 }
 0x3f3   : > { %5646 = vrot.lane.b32.xlu1 %v7367_v30, %s6705_s26  ;;  %v1390_v30 = vsel %vm580_vm2, %v5499_v51, %v5563_v3  ;;  %vm1909_vm2 = vcmask 835104  }
 0x3f4   : > { %v5650_v50 = vpack.i.bf16 %v5504_v61, %v5568_v62  ;;  %v5670_v52 = vpack.i.bf16 %v5563_v3, %v1390_v30  ;;  %v1395_v31 = vsel %vm587_vm3, %v5568_v62, %v5569_v14  ;;  %vm1915_vm3 = vcmask 1048368  }
 0x3f5   : > { %v5577_v15 = vpop.permute.xlu1 %5576  ;;  %v5680_v25 = vpack.i.bf16 %v5569_v14, %v1395_v31  ;;  %v5587_v34 = vpop.permute.xlu0 %5586 }
 0x3f6   : > { %5656 = vrot.lane.b32.xlu0 %v5655_v47, %s6705_s26  ;;  %v5579_v28 = vunpack.i.h.bf16 %v5577_v15  ;;  %v5578_v29 = vunpack.i.l.bf16 %v5577_v15  ;;  %v5589_v55 = vunpack.i.h.bf16 %v5587_v34  ;;  %v5588_v56 = vunpack.i.l.bf16 %v5587_v34 }
 0x3f7   : > { %5651 = vrot.lane.b32.xlu1 %v5650_v50, %s6705_s26 }
 0x3f8   : > { %v1413_v9 = vsel %vm605_vm5, %v5509_v32, %v5578_v29  ;;  %v1414_v33 = vsel %vm605_vm5, %v5578_v29, %v5579_v28  ;;  %v1214_v41 = vsel %vm680_vm8, %v5588_v56, %v5589_v55 }
 0x3f9   : > { %v5690_v39 = vpack.i.bf16 %v1414_v33, %v1413_v9  ;;  %v1428_v42 = vpop.permute.xlu1 %1427 }
 0x3fa   : > { %5666 = vrot.lane.b32.xlu0 %v5665_v36, %s6705_s26  ;;  %v1430_v17 = vsel %vm623_vm7, %v1426_v40, %v1428_v42  ;;  %vm1935_vm7 = vcmask 900704  }
 0x3fb   : > { %5661 = vrot.lane.b32.xlu1 %v5660_v7, %s6705_s26 }
 0x3fe   : > { %5676 = vrot.lane.b32.xlu0 %v5675_v21, %s6705_s26 }
 0x3ff   : > { %5671 = vrot.lane.b32.xlu1 %v5670_v52, %s6705_s26 }
 0x402   : > { %5686 = vrot.lane.b32.xlu0 %v5685_v16, %s6705_s26 }
 0x403   : > { %5681 = vrot.lane.b32.xlu1 %v5680_v25, %s6705_s26 }
 0x406   : > { %5691 = vrot.lane.b32.xlu0 %v5690_v39, %s6705_s26 }
 0x407   : > { %5701 = vrot.lane.b32.xlu1 %v5700_v53, %s6705_s26 }
 0x40a   : > { %5696 = vrot.lane.b32.xlu0 %v5695_v20, %s6705_s26 }
 0x40b   : > { %1481 = vrot.lane.b32.xlu1 %v1429_v43, %s6705_s26 }
 0x40e   : > { %1483 = vrot.lane.b32.xlu0 %v1430_v17, %s6705_s26 }
 0x40f   : > { %1479 = vrot.lane.b32.xlu1 %v7443_v37, %s6705_s26  ;;  %s8870_s26 = smov 60  }
 0x412   : > { %1082 = vperm.xlu0 %5484, %v1068_v44  }
 0x413   : > { %1087 = vperm.xlu1 %5705, %v1069_v48  }
 0x416   : > { %1072 = vperm.xlu0 %5484, %v1066_v45  }
 0x417   : > { %1077 = vperm.xlu1 %5705, %v1067_v49  }
 0x449   : > { %v5602_v54 = vpop.permute.xlu1 %5601 }
 0x44a   : > { %v5604_v4 = vunpack.i.h.bf16 %v5602_v54  ;;  %v5603_v5 = vunpack.i.l.bf16 %v5602_v54 }
 0x44c   : > { %v5592_v23 = vpop.permute.xlu0 %5591 }
 0x44d   : > { %v5607_v57 = vpop.permute.xlu1 %5606  ;;  %v5594_v15 = vunpack.i.h.bf16 %v5592_v23  ;;  %v5593_v21 = vunpack.i.l.bf16 %v5592_v23 }
 0x44e   : > { %v5609_v35 = vunpack.i.h.bf16 %v5607_v57  ;;  %v5608_v11 = vunpack.i.l.bf16 %v5607_v57 }
 0x450   : > { %v5597_v58 = vpop.permute.xlu0 %5596  ;;  %v1216_v37 = vsel %vm680_vm8, %v5608_v11, %v5609_v35 }
 0x451   : > { %v5599_v59 = vunpack.i.h.bf16 %v5597_v58  ;;  %v5598_v60 = vunpack.i.l.bf16 %v5597_v58  ;;  %v5612_v61 = vpop.permute.xlu1 %5611  ;;  %v4892_v62 = vpack.c.bf16 %v1216_v37, %v1214_v41  ;;  %v7515_v37 = vld [vmem:[#allocation10 + $0x8] sm:$0xff] }
 0x452   : > { %v5614_v50 = vunpack.i.h.bf16 %v5612_v61  ;;  %v5613_v2 = vunpack.i.l.bf16 %v5612_v61 }
 0x453   : > { %v1215_v63 = vsel %vm680_vm8, %v5599_v59, %v5608_v11  ;;  %v1213_v47 = vsel %vm680_vm8, %v5598_v60, %v5588_v56  ;;  %4893 = vmatprep.subr.bf16.mxu0 %v4892_v62  ;;  %v7510_v56 = vld [vmem:[#allocation10] sm:$0xff] }
 0x454   : > { %v5617_v3 = vpop.permute.xlu0 %5616  ;;  %v4894_v10 = vpack.c.bf16 %v1215_v63, %v1213_v47  ;;  %v1217_v8 = vsel %vm680_vm8, %v5603_v5, %v5613_v2  ;;  %v1218_v13 = vsel %vm680_vm8, %v5613_v2, %v5614_v50  ;;  %v7522_v47 = vld [vmem:[#allocation10 + $0x10] sm:$0xff] }
 0x455   : > { %v5619_v51 = vunpack.i.h.bf16 %v5617_v3  ;;  %v5618_v6 = vunpack.i.l.bf16 %v5617_v3  ;;  %v5627_v36 = vpop.permute.xlu1 %5626 }
 0x456   : > { %v5629_v7 = vunpack.i.h.bf16 %v5627_v36  ;;  %v5628_v30 = vunpack.i.l.bf16 %v5627_v36  ;;  %4895 = vmatpush1.bf16.msra.mxu0 %v4894_v10 }
 0x457   : > { %v1219_v12 = vsel %vm680_vm8, %v5604_v4, %v5618_v6  ;;  %v1220_v14 = vsel %vm680_vm8, %v5618_v6, %v5619_v51 }
 0x458   : > { %v5622_v18 = vpop.permute.xlu0 %5621  ;;  %v4896_v19 = vpack.c.bf16 %v1220_v14, %v1218_v13  ;;  %v4898_v52 = vpack.c.bf16 %v1219_v12, %v1217_v8  ;;  %v1223_v29 = vsel %vm680_vm8, %v5594_v15, %v5628_v30  ;;  %v1224_v24 = vsel %vm680_vm8, %v5628_v30, %v5629_v7  ;;  %v1065_v8 = vld [vmem:[#allocation10 + $0x18] sm:$0xff] }
 0x459   : > { %v5624_v22 = vunpack.i.h.bf16 %v5622_v18  ;;  %v5623_v46 = vunpack.i.l.bf16 %v5622_v18  ;;  %v5632_v28 = vpop.permute.xlu1 %5631 }
 0x45a   : > { %4897 = vmatprep.subr.bf16.mxu0 %v4896_v19  ;;  %v5634_v31 = vunpack.i.h.bf16 %v5632_v28  ;;  %v5633_v32 = vunpack.i.l.bf16 %v5632_v28 }
 0x45b   : > { %v1221_v26 = vsel %vm680_vm8, %v5593_v21, %v5623_v46  ;;  %4899 = vmatpush1.bf16.msra.mxu0 %v4898_v52  ;;  %v1222_v1 = vsel %vm680_vm8, %v5623_v46, %v5624_v22 }
 0x45c   : > { %v5642_v16 = vpop.permute.xlu0 %5641  ;;  %v4900_v25 = vpack.c.bf16 %v1224_v24, %v1222_v1  ;;  %v4902_v9 = vpack.c.bf16 %v1223_v29, %v1221_v26  ;;  %v1226_v40 = vsel %vm680_vm8, %v5633_v32, %v5634_v31 }
 0x45d   : > { %v5644_v33 = vunpack.i.h.bf16 %v5642_v16  ;;  %v5643_v27 = vunpack.i.l.bf16 %v5642_v16  ;;  %v5637_v38 = vpop.permute.xlu1 %5636 }
 0x45e   : > { %v5639_v39 = vunpack.i.h.bf16 %v5637_v38  ;;  %v5638_v53 = vunpack.i.l.bf16 %v5637_v38  ;;  %4901 = vmatprep.subr.bf16.mxu0 %v4900_v25 }
 0x45f   : > { %4903 = vmatpush1.bf16.msra.mxu0 %v4902_v9  ;;  %v1228_v20 = vsel %vm680_vm8, %v5643_v27, %v5644_v33 }
 0x460   : > { %v1225_v42 = vsel %vm680_vm8, %v5638_v53, %v5633_v32  ;;  %v1227_v43 = vsel %vm680_vm8, %v5639_v39, %v5643_v27  ;;  %v1210_v17 = vpop.permute.xlu0 %1209  ;;  %v4904_v44 = vpack.c.bf16 %v1228_v20, %v1226_v40 }
 0x461   : > { %v1212_v45 = vpop.permute.xlu1 %1211  ;;  %v4906_v48 = vpack.c.bf16 %v1227_v43, %v1225_v42 }
 0x462   : > { %4905 = vmatprep.subr.bf16.mxu0 %v4904_v44  ;;  %v1230_v49 = vsel %vm680_vm8, %v1210_v17, %v1212_v45 }
 0x463   : > { %4907 = vmatpush1.bf16.msra.mxu0 %v4906_v48 }
 0x464   : > { %v1208_v34 = vpop.permute.xlu0 %1207  ;;  %1277 = vmatprep.subr.mxu0 %v1230_v49 }
 0x465   : > { %v1229_v54 = vsel %vm680_vm8, %v1208_v34, %v1210_v17  ;;  %v5647_v55 = vpop.permute.xlu1 %5646 }
 0x466   : > { %v5649_v23 = vunpack.i.h.bf16 %v5647_v55  ;;  %v5648_v57 = vunpack.i.l.bf16 %v5647_v55 }
 0x467   : > { %1278 = vmatpush1.msra.mxu0 %v1229_v54 }
 0x468   : > { %v5657_v35 = vpop.permute.xlu0 %5656  ;;  %4561 = vmatmul.mubr.msk.f32.vlgmr.msra.gmra.mrb[2].mxu0 %vm717_vm9, %v7510_v56  ;;  %v1486_v59 = vsel %vm680_vm8, %v5648_v57, %v5649_v23 }
 0x469   : > { %v5659_v11 = vunpack.i.h.bf16 %v5657_v35  ;;  %v5658_v58 = vunpack.i.l.bf16 %v5657_v35  ;;  %v5652_v41 = vpop.permute.xlu1 %5651  ;;  %1331 = vmatprep.mubr.f32.mxu0 %v6706_v0 }
 0x46a   : > { %v5654_v15 = vunpack.i.h.bf16 %v5652_v41  ;;  %v5653_v26 = vunpack.i.l.bf16 %v5652_v41  ;;  %v1620_v41 = vld [vmem:[#allocation18] sm:$0xff] }
 0x46b   : > { %v1488_v60 = vsel %vm680_vm8, %v5658_v58, %v5659_v11 }
 0x46c   : > { %v5667_v61 = vpop.permute.xlu0 %5666  ;;  %4562 = vmatmul.mubr.msk.f32.gmra.mrb[4].mxu0 %vm717_vm9, %v7515_v37  ;;  %v4908_v62 = vpack.c.bf16 %v1488_v60, %v1486_v59  ;;  %v1621_v59 = vld [vmem:[#allocation18 + $0x8] sm:$0xff] }
 0x46d   : > { %v5662_v63 = vpop.permute.xlu1 %5661  ;;  %1337 = vmatprep.mubr.f32.mxu0 %v6706_v0  ;;  %v5669_v3 = vunpack.i.h.bf16 %v5667_v61  ;;  %v5668_v10 = vunpack.i.l.bf16 %v5667_v61  ;;  %v7554_v60 = vpack.c.bf16 %v1621_v59, %v1620_v41 }
 0x46e   : > { %v5664_v50 = vunpack.i.h.bf16 %v5662_v63  ;;  %v5663_v2 = vunpack.i.l.bf16 %v5662_v63  ;;  %4909 = vmatprep.subr.bf16.mxu1 %v4908_v62 }
 0x46f   : > { %v1490_v52 = vsel %vm680_vm8, %v5668_v10, %v5669_v3  ;;  %4925 = vmatprep.subr.bf16.mxu0 %v7554_v60 }
 0x470   : > { %v1485_v4 = vsel %vm680_vm8, %v5663_v2, %v5648_v57  ;;  %v1487_v5 = vsel %vm680_vm8, %v5664_v50, %v5658_v58  ;;  %v5677_v51 = vpop.permute.xlu0 %5676  ;;  %4563 = vmatmul.mubr.msk.f32.gmra.mrb[6].mxu0 %vm717_vm9, %v7522_v47 }
 0x471   : > { %v5679_v6 = vunpack.i.h.bf16 %v5677_v51  ;;  %v5678_v36 = vunpack.i.l.bf16 %v5677_v51  ;;  %v5672_v7 = vpop.permute.xlu1 %5671  ;;  %v4910_v30 = vpack.c.bf16 %v1487_v5, %v1485_v4  ;;  %1343 = vmatprep.mubr.f32.mxu0 %v6706_v0  ;;  %4927 = vmatpush3.bf16.msra.mxu0 %v7554_v60 }
 0x472   : > { %v5674_v12 = vunpack.i.h.bf16 %v5672_v7  ;;  %v5673_v13 = vunpack.i.l.bf16 %v5672_v7 }
 0x473   : > { %v1489_v14 = vsel %vm680_vm8, %v5678_v36, %v5668_v10  ;;  %4911 = vmatpush1.bf16.msra.mxu1 %v4910_v30 }
 0x474   : > { %v1491_v18 = vsel %vm680_vm8, %v5679_v6, %v5673_v13  ;;  %v5687_v19 = vpop.permute.xlu0 %5686  ;;  %v1492_v21 = vsel %vm680_vm8, %v5673_v13, %v5674_v12  ;;  %4564 = vmatmul.mubr.msk.f32.gmra.mrb[8].mxu0 %vm717_vm9, %v1065_v8 }
 0x475   : > { %v5689_v22 = vunpack.i.h.bf16 %v5687_v19  ;;  %v5688_v46 = vunpack.i.l.bf16 %v5687_v19  ;;  %v5682_v28 = vpop.permute.xlu1 %5681  ;;  %v4912_v29 = vpack.c.bf16 %v1492_v21, %v1490_v52  ;;  %v4914_v24 = vpack.c.bf16 %v1491_v18, %v1489_v14 }
 0x476   : > { %v5684_v31 = vunpack.i.h.bf16 %v5682_v28  ;;  %v5683_v32 = vunpack.i.l.bf16 %v5682_v28 }
 0x477   : > { %v1495_v1 = vsel %vm680_vm8, %v5654_v15, %v5688_v46  ;;  %4913 = vmatprep.subr.bf16.mxu1 %v4912_v29  ;;  %v1496_v16 = vsel %vm680_vm8, %v5688_v46, %v5689_v22 }
 0x478   : > { %v1493_v25 = vsel %vm680_vm8, %v5653_v26, %v5683_v32  ;;  %v5692_v9 = vpop.permute.xlu0 %5691  ;;  %4915 = vmatpush1.bf16.msra.mxu1 %v4914_v24  ;;  %v1494_v33 = vsel %vm680_vm8, %v5683_v32, %v5684_v31  ;;  %v1618_v31 = vld [vmem:[#allocation16] sm:$0xff]  ;;  %v1619_v32 = vld [vmem:[#allocation16 + $0x8] sm:$0xff] }
 0x479   : > { %v5694_v27 = vunpack.i.h.bf16 %v5692_v9  ;;  %v5693_v38 = vunpack.i.l.bf16 %v5692_v9  ;;  %v5702_v39 = vpop.permute.xlu1 %5701  ;;  %v4916_v53 = vpack.c.bf16 %v1496_v16, %v1494_v33  ;;  %v4918_v40 = vpack.c.bf16 %v1495_v1, %v1493_v25 }
 0x47a   : > { %v5704_v20 = vunpack.i.h.bf16 %v5702_v39  ;;  %v5703_v42 = vunpack.i.l.bf16 %v5702_v39  ;;  %v7688_v1 = vpack.c.bf16 %v1619_v32, %v1618_v31 }
 0x47b   : > { %4917 = vmatprep.subr.bf16.mxu1 %v4916_v53  ;;  %v1498_v43 = vsel %vm680_vm8, %v5693_v38, %v5694_v27 }
 0x47c   : > { %v5697_v17 = vpop.permute.xlu0 %5696  ;;  %4919 = vmatpush1.bf16.msra.mxu1 %v4918_v40  ;;  %v1500_v44 = vsel %vm680_vm8, %v5703_v42, %v5704_v20  ;;  %4929 = vmatprep.subr.bf16.mxu0 %v7688_v1 }
 0x47d   : > { %v5699_v45 = vunpack.i.h.bf16 %v5697_v17  ;;  %v5698_v48 = vunpack.i.l.bf16 %v5697_v17  ;;  %v1482_v49 = vpop.permute.xlu1 %1481  ;;  %v4920_v34 = vpack.c.bf16 %v1500_v44, %v1498_v43 }
 0x47f   : > { %v1499_v54 = vsel %vm680_vm8, %v5699_v45, %v5703_v42  ;;  %v1497_v55 = vsel %vm680_vm8, %v5698_v48, %v5693_v38  ;;  %4921 = vmatprep.subr.bf16.mxu1 %v4920_v34 }
 0x480   : > { %v1484_v23 = vpop.permute.xlu0 %1483  ;;  %v4922_v57 = vpack.c.bf16 %v1499_v54, %v1497_v55 }
 0x481   : > { %v1502_v35 = vsel %vm680_vm8, %v1482_v49, %v1484_v23  ;;  %v1480_v11 = vpop.permute.xlu1 %1479 }
 0x482   : > { %4923 = vmatpush1.bf16.msra.mxu1 %v4922_v57  ;;  %v1501_v58 = vsel %vm680_vm8, %v1480_v11, %v1482_v49  ;;  %vm1941_vm8 = vcmask 1048432  }
 0x483   : > { %1537 = vmatprep.subr.mxu1 %v1502_v35 }
 0x486   : > { %1538 = vmatpush1.msra.mxu1 %v1501_v58 }
 0x487   : > { %4565 = vmatmul.mubr.msk.f32.vlgmr.msra.gmra.mrb[2].mxu1 %vm717_vm9, %v7510_v56  ;;  %5036 = vmatprep.subr.bf16.mxu1 %v7554_v60 }
 0x488   : > { %1591 = vmatprep.mubr.f32.mxu1 %v6706_v0  ;;  %5037 = vmatpush3.bf16.msra.mxu1 %v7554_v60 }
 0x489   : > { %4933 = vmatprep.subr.bf16.mxu1 %v7554_v60 }
 0x48b   : > { %4566 = vmatmul.mubr.msk.f32.gmra.mrb[4].mxu1 %vm717_vm9, %v7515_v37 }
 0x48c   : > { %1597 = vmatprep.mubr.f32.mxu1 %v6706_v0 }
 0x48f   : > { %4567 = vmatmul.mubr.msk.f32.gmra.mrb[6].mxu1 %vm717_vm9, %v7522_v47 }
 0x490   : > { %1603 = vmatprep.mubr.f32.mxu1 %v6706_v0 }
 0x491   : > { %v1083_v56 = vpop.permute.xlu0 %1082 }
 0x492   : > { %v7573_v4 = vpop.permute.xlu1 %1087 }
 0x493   : > { %4568 = vmatmul.mubr.msk.f32.gmra.mrb[8].mxu1 %vm717_vm9, %v1065_v8 }
 0x495   : > { %v1073_v37 = vpop.permute.xlu0 %1072 }
 0x496   : > { %v1078_v15 = vpop.permute.xlu1 %1077 }
 0x53b   : > { %v1327_v61 = vpop.f32.mrb[2].mxu0 }
 0x53c   : > { %v7561_v62 = vadd.f32 %v1327_v61, %v1073_v37  ;;  %v1329_v63 = vpop.f32.mrb[3].mxu0 }
 0x53d   : > { %v7584_v12 = vadd.f32 %v1329_v63, %v1073_v37 }
 0x53e   : > { %1950 = vrot.lane.b32.xlu0 %v7561_v62, %s6699_s1 }
 0x53f   : > { %v1333_v47 = vpop.f32.mrb[4].mxu0 }
 0x540   : > { %v1335_v50 = vpop.f32.mrb[5].mxu0  ;;  %v7606_v46 = vadd.f32 %v1333_v47, %v1078_v15 }
 0x541   : > { %v7597_v22 = vadd.f32 %v1335_v50, %v1078_v15 }
 0x542   : > { %1954 = vrot.lane.b32.xlu0 %v7561_v62, %s6702_s16 }
 0x543   : > { %v1339_v2 = vpop.f32.mrb[6].mxu0 }
 0x544   : > { %v7567_v3 = vadd.f32 %v1339_v2, %v1083_v56  ;;  %v1341_v10 = vpop.f32.mrb[7].mxu0 }
 0x545   : > { %v7626_v29 = vadd.f32 %v1341_v10, %v1083_v56 }
 0x546   : > { %4736 = vmatprep.mubr.msk.f32.mxu0 %vm1654_vm10, %v7567_v3  ;;  %1960 = vrot.lane.b32.xlu0 %v7561_v62, %s8872_s30 }
 0x547   : > { %v1345_v5 = vpop.f32.mrb[8].mxu0 }
 0x548   : > { %v7576_v51 = vadd.f32 %v1345_v5, %v7573_v4  ;;  %v7578_v6 = vpop.f32.mrb[9].mxu0 }
 0x549   : > { %v7674_v26 = vadd.f32 %v7578_v6, %v7573_v4 }
 0x54a   : > { %4737 = vmatmul.mubr.msk.f32.vlgmr.msra.gmra.mrb[10].mxu0 %vm1654_vm10, %v7576_v51 }
 0x54b   : > { %4931 = vmatpush3.bf16.msra.mxu0 %v7688_v1 }
 0x54c   : > { %4941 = vmatprep.subr.bf16.mxu0 %v7554_v60 }
 0x55a   : > { %v1587_v36 = vpop.f32.mrb[2].mxu1 }
 0x55b   : > { %v1588_v7 = vadd.f32 %v1587_v36, %v1073_v37  ;;  %v1589_v30 = vpop.f32.mrb[3].mxu1 }
 0x55d   : > { %2695 = vrot.lane.b32.xlu1 %v1588_v7, %s6702_s16  ;;  %2703 = vrot.lane.b32.xlu0 %v1588_v7, %s8872_s30 }
 0x55e   : > { %v1593_v8 = vpop.f32.mrb[4].mxu1 }
 0x55f   : > { %v1595_v13 = vpop.f32.mrb[5].mxu1  ;;  %v1594_v19 = vadd.f32 %v1593_v8, %v1078_v15 }
 0x561   : > { %1626 = vrot.lane.b32.xlu1 %v7561_v62, %s6699_s1  ;;  %2327 = vrot.lane.b32.xlu0 %v7584_v12, %s6699_s1 }
 0x562   : > { %v1599_v14 = vpop.f32.mrb[6].mxu1 }
 0x563   : > { %v1601_v18 = vpop.f32.mrb[7].mxu1  ;;  %v1600_v28 = vadd.f32 %v1599_v14, %v1083_v56 }
 0x565   : > { %1962 = vrot.lane.b32.xlu1 %v7584_v12, %s8872_s30  ;;  %2331 = vrot.lane.b32.xlu0 %v7584_v12, %s6702_s16 }
 0x566   : > { %v1605_v52 = vpop.f32.mrb[8].mxu1 }
 0x567   : > { %v1607_v21 = vpop.f32.mrb[9].mxu1  ;;  %v1606_v24 = vadd.f32 %v1605_v52, %v7573_v4 }
 0x569   : > { %2699 = vrot.lane.b32.xlu1 %v1594_v19, %s6702_s16  ;;  %2335 = vrot.lane.b32.xlu0 %v7584_v12, %s8872_s30 }
 0x56d   : > { %2705 = vrot.lane.b32.xlu1 %v1594_v19, %s8872_s30  ;;  %2687 = vrot.lane.b32.xlu0 %v7584_v12, %s6699_s1 }
 0x571   : > { %1966 = vrot.lane.b32.xlu1 %v7597_v22, %s8872_s30  ;;  %2693 = vrot.lane.b32.xlu0 %v7584_v12, %s6702_s16 }
 0x575   : > { %2333 = vrot.lane.b32.xlu1 %v7597_v22, %s6702_s16  ;;  %1952 = vrot.lane.b32.xlu0 %v7606_v46, %s6699_s1 }
 0x579   : > { %2689 = vrot.lane.b32.xlu1 %v7597_v22, %s6699_s1  ;;  %1956 = vrot.lane.b32.xlu0 %v7606_v46, %s6702_s16 }
 0x57d   : > { %2721 = vrot.lane.b32.xlu1 %v1600_v28, %s6702_s16  ;;  %1964 = vrot.lane.b32.xlu0 %v7606_v46, %s8872_s30 }
 0x581   : > { %2729 = vrot.lane.b32.xlu1 %v1600_v28, %s8872_s30  ;;  %1628 = vrot.lane.b32.xlu0 %v7606_v46, %s6699_s1 }
 0x585   : > { %1650 = vrot.lane.b32.xlu1 %v7567_v3, %s8872_s30  ;;  %2329 = vrot.lane.b32.xlu0 %v7597_v22, %s6699_s1 }
 0x589   : > { %1989 = vrot.lane.b32.xlu1 %v7626_v29, %s8872_s30  ;;  %2337 = vrot.lane.b32.xlu0 %v7597_v22, %s8872_s30 }
 0x58d   : > { %2343 = vrot.lane.b32.xlu1 %v7626_v29, %s6699_s1  ;;  %2697 = vrot.lane.b32.xlu0 %v7597_v22, %s6702_s16 }
 0x591   : > { %2347 = vrot.lane.b32.xlu1 %v7626_v29, %s6702_s16  ;;  %1977 = vrot.lane.b32.xlu0 %v7567_v3, %s6699_s1 }
 0x595   : > { %2713 = vrot.lane.b32.xlu1 %v7626_v29, %s6699_s1  ;;  %1981 = vrot.lane.b32.xlu0 %v7567_v3, %s6702_s16 }
 0x599   : > { %1979 = vrot.lane.b32.xlu1 %v7576_v51, %s6699_s1  ;;  %1987 = vrot.lane.b32.xlu0 %v7567_v3, %s8872_s30 }
 0x59d   : > { %1983 = vrot.lane.b32.xlu1 %v7576_v51, %s6702_s16  ;;  %1646 = vrot.lane.b32.xlu0 %v7567_v3, %s6702_s16 }
 0x5a1   : > { %2355 = vrot.lane.b32.xlu1 %v7626_v29, %s6709_s2  ;;  %1642 = vrot.lane.b32.xlu0 %v7567_v3, %s6699_s1 }
 0x5a5   : > { %2731 = vrot.lane.b32.xlu1 %v1606_v24, %s8872_s30  ;;  %1997 = vrot.lane.b32.xlu0 %v7567_v3, %s8867_s22 }
 0x5a9   : > { %1648 = vrot.lane.b32.xlu1 %v7576_v51, %s6702_s16  ;;  %2351 = vrot.lane.b32.xlu0 %v7626_v29, %s8872_s30 }
 0x5ad   : > { %1652 = vrot.lane.b32.xlu1 %v7576_v51, %s8872_s30  ;;  %2719 = vrot.lane.b32.xlu0 %v7626_v29, %s6702_s16 }
 0x5b0   : > { %v1951_v16 = vpop.permute.xlu0 %1950 }
 0x5b1   : > { %1999 = vrot.lane.b32.xlu1 %v7576_v51, %s8867_s22  ;;  %1991 = vrot.lane.b32.xlu0 %v7576_v51, %s8872_s30 }
 0x5b4   : > { %v1955_v25 = vpop.permute.xlu0 %1954 }
 0x5b5   : > { %1993 = vrot.lane.b32.xlu1 %v7674_v26, %s8872_s30  ;;  %1630 = vrot.lane.b32.xlu0 %v7561_v62, %s6702_s16 }
 0x5b8   : > { %v1961_v9 = vpop.permute.xlu0 %1960 }
 0x5b9   : > { %2345 = vrot.lane.b32.xlu1 %v7674_v26, %s6699_s1  ;;  %1632 = vrot.lane.b32.xlu0 %v7606_v46, %s6702_s16 }
 0x5bd   : > { %2349 = vrot.lane.b32.xlu1 %v7674_v26, %s6702_s16  ;;  %1634 = vrot.lane.b32.xlu0 %v7561_v62, %s8872_s30 }
 0x5c1   : > { %2353 = vrot.lane.b32.xlu1 %v7674_v26, %s8872_s30  ;;  %1636 = vrot.lane.b32.xlu0 %v7606_v46, %s8872_s30  ;;  %s6720_s30 = smov 8  }
 0x5c5   : > { %2715 = vrot.lane.b32.xlu1 %v7674_v26, %s6699_s1  ;;  %2134 = vrot.lane.b32.xlu0 %v7561_v62, %s8867_s22 }
 0x5c9   : > { %2723 = vrot.lane.b32.xlu1 %v7674_v26, %s6702_s16  ;;  %2136 = vrot.lane.b32.xlu0 %v7606_v46, %s8867_s22 }
 0x5cd   : > { %2357 = vrot.lane.b32.xlu1 %v7674_v26, %s6709_s2  ;;  %2725 = vrot.lane.b32.xlu0 %v1606_v24, %s6702_s16 }
 0x5cf   : > { %v7708_v33 = vpop.permute.xlu1 %2695  ;;  %v7710_v27 = vpop.permute.xlu0 %2703 }
 0x5d1   : > { %1644 = vrot.lane.b32.xlu0 %v7576_v51, %s6699_s1 }
 0x5d3   : > { %v7714_v38 = vpop.permute.xlu1 %1626  ;;  %v2328_v39 = vpop.permute.xlu0 %2327 }
 0x5d5   : > { %2138 = vrot.lane.b32.xlu0 %v1951_v16, %s8867_s22 }
 0x5d7   : > { %v1963_v53 = vpop.permute.xlu1 %1962  ;;  %v7717_v40 = vpop.permute.xlu0 %2331 }
 0x5d8   : > { %v1969_v47 = vsel %vm1968_vm11, %v1961_v9, %v1963_v53 }
 0x5d9   : > { %2142 = vrot.lane.b32.xlu0 %v1955_v25, %s8867_s22 }
 0x5db   : > { %v7720_v20 = vpop.permute.xlu1 %2699  ;;  %v7722_v42 = vpop.permute.xlu0 %2335 }
 0x5df   : > { %v7724_v43 = vpop.permute.xlu1 %2705  ;;  %v7726_v17 = vpop.permute.xlu0 %2687 }
 0x5e3   : > { %v1967_v44 = vpop.permute.xlu1 %1966  ;;  %v7728_v45 = vpop.permute.xlu0 %2693 }
 0x5e7   : > { %v7730_v48 = vpop.permute.xlu1 %2333  ;;  %v1953_v49 = vpop.permute.xlu0 %1952 }
 0x5e8   : > { %2140 = vrot.lane.b32.xlu0 %v1953_v49, %s8867_s22 }
 0x5eb   : > { %v7733_v34 = vpop.permute.xlu1 %2689  ;;  %v1957_v54 = vpop.permute.xlu0 %1956 }
 0x5ec   : > { %2144 = vrot.lane.b32.xlu0 %v1957_v54, %s8867_s22 }
 0x5ef   : > { %v7736_v55 = vpop.permute.xlu1 %2721  ;;  %v1965_v23 = vpop.permute.xlu0 %1964 }
 0x5f0   : > { %v1970_v3 = vsel %vm1968_vm11, %v1965_v23, %v1967_v44 }
 0x5f3   : > { %v7738_v57 = vpop.permute.xlu1 %2729  ;;  %v7740_v35 = vpop.permute.xlu0 %1628 }
 0x5f7   : > { %v1651_v11 = vpop.permute.xlu1 %1650  ;;  %v2330_v58 = vpop.permute.xlu0 %2329 }
 0x5fb   : > { %v1990_v41 = vpop.permute.xlu1 %1989  ;;  %v2338_v59 = vpop.permute.xlu0 %2337 }
 0x5ff   : > { %v2344_v56 = vpop.permute.xlu1 %2343  ;;  %v7742_v37 = vpop.permute.xlu0 %2697 }
 0x603   : > { %v2348_v61 = vpop.permute.xlu1 %2347  ;;  %v1978_v63 = vpop.permute.xlu0 %1977 }
 0x604   : > { %2001 = vrot.lane.b32.xlu0 %v1978_v63, %s8867_s22 }
 0x607   : > { %v7746_v50 = vpop.permute.xlu1 %2713  ;;  %v1982_v2 = vpop.permute.xlu0 %1981 }
 0x608   : > { %2146 = vrot.lane.b32.xlu0 %v1969_v47, %s8867_s22  ;;  %2005 = vrot.lane.b32.xlu1 %v1982_v2, %s8867_s22 }
 0x60b   : > { %v1980_v10 = vpop.permute.xlu1 %1979  ;;  %v1988_v4 = vpop.permute.xlu0 %1987 }
 0x60c   : > { %2148 = vrot.lane.b32.xlu0 %v1970_v3, %s8867_s22  ;;  %2359 = vrot.lane.b32.xlu1 %v2344_v56, %s6709_s2  ;;  %v1995_v18 = vsel %vm1968_vm11, %v1988_v4, %v1990_v41 }
 0x60f   : > { %v1984_v5 = vpop.permute.xlu1 %1983  ;;  %v1647_v51 = vpop.permute.xlu0 %1646 }
 0x610   : > { %2492 = vrot.lane.b32.xlu0 %v7584_v12, %s6709_s2  ;;  %2363 = vrot.lane.b32.xlu1 %v2348_v61, %s6709_s2 }
 0x611   : > { %4742 = vmatprep.mubr.msk.f32.mxu1 %vm1654_vm10, %v1647_v51 }
 0x613   : > { %v7757_v6 = vpop.permute.xlu1 %2355  ;;  %v1643_v36 = vpop.permute.xlu0 %1642 }
 0x614   : > { %2494 = vrot.lane.b32.xlu0 %v7597_v22, %s6709_s2  ;;  %4739 = vmatprep.mubr.msk.f32.mxu0 %vm1654_vm10, %v1643_v36 }
 0x617   : > { %v7762_v7 = vpop.permute.xlu1 %2731  ;;  %v1998_v30 = vpop.permute.xlu0 %1997 }
 0x618   : > { %2496 = vrot.lane.b32.xlu0 %v2328_v39, %s6709_s2  ;;  %v2701_v39 = vsel %vm605_vm5, %v7728_v45, %v7708_v33  ;;  %v3060_v45 = vld [vmem:[#allocation15] sm:$0x7] }
 0x61b   : > { %v1649_v8 = vpop.permute.xlu1 %1648  ;;  %v2352_v13 = vpop.permute.xlu0 %2351 }
 0x61c   : > { %2498 = vrot.lane.b32.xlu0 %v2330_v58, %s6709_s2  ;;  %4743 = vmatmul.mubr.msk.f32.vlgmr.msra.gmra.mrb[10].mxu1 %vm1654_vm10, %v1649_v8 }
 0x61d   : > { %2367 = vrot.lane.b32.xlu1 %v2352_v13, %s6709_s2  ;;  %4745 = vmatprep.mubr.msk.f32.mxu1 %vm1654_vm10, %v1651_v11 }
 0x61e   : > { %4935 = vmatpush3.bf16.msra.mxu1 %v7554_v60 }
 0x61f   : > { %v1653_v14 = vpop.permute.xlu1 %1652  ;;  %v2720_v15 = vpop.permute.xlu0 %2719  ;;  %4937 = vmatprep.subr.bf16.mxu1 %v7688_v1 }
 0x620   : > { %2500 = vrot.lane.b32.xlu0 %v7717_v40, %s6709_s2  ;;  %4746 = vmatmul.mubr.msk.f32.gmra.mrb[12].mxu1 %vm1654_vm10, %v1653_v14 }
 0x621   : > { %2009 = vrot.lane.b32.xlu1 %v1995_v18, %s8867_s22  ;;  %4768 = vmatprep.mubr.msk.f32.mxu1 %vm1654_vm10, %v1998_v30 }
 0x623   : > { %v2000_v19 = vpop.permute.xlu1 %1999  ;;  %v1992_v52 = vpop.permute.xlu0 %1991 }
 0x624   : > { %2502 = vrot.lane.b32.xlu0 %v7730_v48, %s6709_s2  ;;  %4769 = vmatmul.mubr.msk.f32.vlgmr.msra.gmra.mrb[14].mxu1 %vm1654_vm10, %v2000_v19 }
 0x625   : > { %2003 = vrot.lane.b32.xlu1 %v1980_v10, %s8867_s22  ;;  %4939 = vmatpush3.bf16.msra.mxu1 %v7688_v1 }
 0x626   : > { %4949 = vmatprep.subr.bf16.mxu1 %v7554_v60 }
 0x627   : > { %v1994_v21 = vpop.permute.xlu1 %1993  ;;  %v1631_v28 = vpop.permute.xlu0 %1630 }
 0x628   : > { %2504 = vrot.lane.b32.xlu0 %v7722_v42, %s6709_s2  ;;  %v1996_v40 = vsel %vm1968_vm11, %v1992_v52, %v1994_v21  ;;  %vm2275_vm11 = vcmask 408704  }
 0x629   : > { %2007 = vrot.lane.b32.xlu1 %v1984_v5, %s8867_s22 }
 0x62b   : > { %v2346_v24 = vpop.permute.xlu1 %2345  ;;  %v1633_v31 = vpop.permute.xlu0 %1632 }
 0x62c   : > { %2506 = vrot.lane.b32.xlu0 %v2338_v59, %s6709_s2 }
 0x62d   : > { %2361 = vrot.lane.b32.xlu1 %v2346_v24, %s6709_s2 }
 0x62f   : > { %v2350_v32 = vpop.permute.xlu1 %2349  ;;  %v1635_v16 = vpop.permute.xlu0 %1634 }
 0x630   : > { %2870 = vrot.lane.b32.xlu0 %v7584_v12, %s6711_s12 }
 0x631   : > { %2365 = vrot.lane.b32.xlu1 %v2350_v32, %s6709_s2 }
 0x633   : > { %v2354_v25 = vpop.permute.xlu1 %2353  ;;  %v1637_v9 = vpop.permute.xlu0 %1636 }
 0x634   : > { %2874 = vrot.lane.b32.xlu0 %v7726_v17, %s6711_s12  ;;  %v2702_v17 = vsel %vm605_vm5, %v7742_v37, %v7720_v20 }
 0x635   : > { %2369 = vrot.lane.b32.xlu1 %v2354_v25, %s6709_s2  ;;  %s8868_s2 = smov 59  }
 0x637   : > { %v7806_v53 = vpop.permute.xlu0 %2134 }
 0x638   : > { %2878 = vrot.lane.b32.xlu0 %v2701_v39, %s6711_s12 }
 0x639   : > { %2011 = vrot.lane.b32.xlu1 %v1996_v40, %s8867_s22  ;;  %s6717_s22 = smov 102  }
 0x63b   : > { %v7811_v12 = vpop.permute.xlu0 %2136 }
 0x63c   : > { %2882 = vrot.lane.b32.xlu0 %v7710_v27, %s6711_s12  ;;  %v2716_v27 = vpop.permute.xlu1 %2715 }
 0x63d   : > { %2733 = vrot.lane.b32.xlu1 %v7626_v29, %s6711_s12  ;;  %v2727_v29 = vsel %vm605_vm5, %v2720_v15, %v7736_v55 }
 0x63f   : > { %v2726_v42 = vpop.permute.xlu0 %2725 }
 0x640   : > { %4130 = vrot.lane.b32.xlu0 %v6706_v0, %s6712_s14 }
 0x641   : > { %2735 = vrot.lane.b32.xlu1 %v7674_v26, %s6711_s12 }
 0x643   : > { %v1645_v33 = vpop.permute.xlu0 %1644 }
 0x644   : > { %4740 = vmatmul.mubr.msk.f32.gmra.mrb[12].mxu0 %vm1654_vm10, %v1645_v33 }
 0x645   : > { %2737 = vrot.lane.b32.xlu1 %v7746_v50, %s6711_s12  ;;  %4752 = vmatprep.mubr.msk.f32.mxu0 %vm1654_vm10, %v7561_v62  ;;  %v2724_v62 = vpop.permute.xlu1 %2723 }
 0x648   : > { %4753 = vmatmul.mubr.msk.f32.vlgmr.msra.gmra.mrb[10].mxu0 %vm1654_vm10, %v7606_v46  ;;  %v2728_v46 = vsel %vm605_vm5, %v2724_v62, %v2726_v42 }
 0x649   : > { %2739 = vrot.lane.b32.xlu1 %v2716_v27, %s6711_s12  ;;  %4755 = vmatprep.mubr.msk.f32.mxu0 %vm1654_vm10, %v7714_v38  ;;  %v2358_v26 = vpop.permute.xlu1 %2357  ;;  %v2139_v38 = vpop.permute.xlu0 %2138 }
 0x64a   : > { %4943 = vmatpush3.bf16.msra.mxu0 %v7554_v60 }
 0x64b   : > { %4945 = vmatprep.subr.bf16.mxu0 %v7688_v1 }
 0x64c   : > { %4756 = vmatmul.mubr.msk.f32.gmra.mrb[12].mxu0 %vm1654_vm10, %v7740_v35 }
 0x64d   : > { %2741 = vrot.lane.b32.xlu1 %v2727_v29, %s6711_s12  ;;  %4758 = vmatprep.mubr.msk.f32.mxu0 %vm1654_vm10, %v1631_v28  ;;  %v2143_v44 = vpop.permute.xlu0 %2142 }
 0x650   : > { %4759 = vmatmul.mubr.msk.f32.gmra.mrb[14].mxu0 %vm1654_vm10, %v1633_v31 }
 0x651   : > { %2745 = vrot.lane.b32.xlu1 %v7738_v57, %s6711_s12  ;;  %4761 = vmatprep.mubr.msk.f32.mxu0 %vm1654_vm10, %v1635_v16 }
 0x654   : > { %4762 = vmatmul.mubr.msk.f32.gmra.mrb[16].mxu0 %vm1654_vm10, %v1637_v9 }
 0x655   : > { %2743 = vrot.lane.b32.xlu1 %v2728_v46, %s6711_s12  ;;  %4800 = vmatprep.mubr.msk.f32.mxu0 %vm1654_vm10, %v7757_v6 }
 0x658   : > { %4801 = vmatmul.mubr.msk.f32.vlgmr.msra.gmra.mrb[18].mxu0 %vm1654_vm10, %v2358_v26 }
 0x659   : > { %2747 = vrot.lane.b32.xlu1 %v7762_v7, %s6711_s12  ;;  %4947 = vmatpush3.bf16.msra.mxu0 %v7688_v1 }
 0x65a   : > { %v2141_v48 = vpop.permute.xlu0 %2140 }
 0x65d   : > { %2872 = vrot.lane.b32.xlu1 %v7597_v22, %s6711_s12 }
 0x65e   : > { %v2145_v22 = vpop.permute.xlu0 %2144 }
 0x661   : > { %2876 = vrot.lane.b32.xlu1 %v7733_v34, %s6711_s12 }
 0x665   : > { %2880 = vrot.lane.b32.xlu1 %v2702_v17, %s6711_s12 }
 0x669   : > { %2884 = vrot.lane.b32.xlu1 %v7724_v43, %s6711_s12 }
 0x66d   : > { %3063 = vperm.xlu1 %5705, %v3060_v45  }
 0x671   : > { %4108 = vrot.lane.b32.xlu1 %v6706_v0, %s6702_s16 }
 0x675   : > { %4116 = vrot.lane.b32.xlu1 %v6706_v0, %s8870_s26  ;;  %s6719_s26 = smov 42  }
 0x676   : > { %v2002_v49 = vpop.permute.xlu0 %2001 }
 0x677   : > { %4771 = vmatprep.mubr.msk.f32.mxu1 %vm1654_vm10, %v2002_v49 }
 0x679   : > { %4124 = vrot.lane.b32.xlu1 %v6706_v0, %s8868_s2  ;;  %s6718_s2 = smov 68  }
 0x67a   : > { %v2006_v20 = vpop.permute.xlu1 %2005  ;;  %v2147_v34 = vpop.permute.xlu0 %2146 }
 0x67d   : > { %4132 = vrot.lane.b32.xlu1 %v6706_v0, %s6712_s14 }
 0x67e   : > { %v2360_v43 = vpop.permute.xlu1 %2359  ;;  %v2149_v54 = vpop.permute.xlu0 %2148 }
 0x67f   : > { %4803 = vmatprep.mubr.msk.f32.mxu0 %vm1654_vm10, %v2360_v43 }
 0x682   : > { %v2364_v55 = vpop.permute.xlu1 %2363  ;;  %v2493_v23 = vpop.permute.xlu0 %2492 }
 0x686   : > { %v2495_v35 = vpop.permute.xlu0 %2494 }
 0x68a   : > { %v2497_v41 = vpop.permute.xlu0 %2496 }
 0x68e   : > { %v2499_v56 = vpop.permute.xlu0 %2498 }
 0x68f   : > { %v2368_v57 = vpop.permute.xlu1 %2367 }
 0x692   : > { %v2501_v63 = vpop.permute.xlu0 %2500 }
 0x693   : > { %v2010_v11 = vpop.permute.xlu1 %2009 }
 0x696   : > { %v2503_v50 = vpop.permute.xlu0 %2502 }
 0x697   : > { %v2004_v58 = vpop.permute.xlu1 %2003 }
 0x698   : > { %4772 = vmatmul.mubr.msk.f32.gmra.mrb[16].mxu1 %vm1654_vm10, %v2004_v58 }
 0x699   : > { %4774 = vmatprep.mubr.msk.f32.mxu1 %vm1654_vm10, %v2006_v20 }
 0x69a   : > { %v2505_v10 = vpop.permute.xlu0 %2504 }
 0x69b   : > { %v2008_v59 = vpop.permute.xlu1 %2007 }
 0x69c   : > { %4775 = vmatmul.mubr.msk.f32.gmra.mrb[18].mxu1 %vm1654_vm10, %v2008_v59 }
 0x69d   : > { %4777 = vmatprep.mubr.msk.f32.mxu1 %vm1654_vm10, %v2010_v11 }
 0x69e   : > { %v2507_v5 = vpop.permute.xlu0 %2506 }
 0x69f   : > { %v2362_v37 = vpop.permute.xlu1 %2361 }
 0x6a0   : > { %4804 = vmatmul.mubr.msk.f32.gmra.mrb[20].mxu0 %vm1654_vm10, %v2362_v37 }
 0x6a1   : > { %4806 = vmatprep.mubr.msk.f32.mxu0 %vm1654_vm10, %v2364_v55 }
 0x6a2   : > { %v2871_v7 = vpop.permute.xlu0 %2870 }
 0x6a3   : > { %v2366_v61 = vpop.permute.xlu1 %2365 }
 0x6a4   : > { %4807 = vmatmul.mubr.msk.f32.gmra.mrb[22].mxu0 %vm1654_vm10, %v2366_v61 }
 0x6a5   : > { %4809 = vmatprep.mubr.msk.f32.mxu0 %vm1654_vm10, %v2368_v57 }
 0x6a6   : > { %v2875_v13 = vpop.permute.xlu0 %2874 }
 0x6a7   : > { %v2370_v47 = vpop.permute.xlu1 %2369 }
 0x6a8   : > { %4810 = vmatmul.mubr.msk.f32.gmra.mrb[24].mxu0 %vm1654_vm10, %v2370_v47 }
 0x6a9   : > { %4816 = vmatprep.mubr.msk.f32.mxu0 %vm1654_vm10, %v2493_v23 }
 0x6ab   : > { %v2012_v2 = vpop.permute.xlu1 %2011 }
 0x6ac   : > { %4778 = vmatmul.mubr.msk.f32.gmra.mrb[20].mxu1 %vm1654_vm10, %v2012_v2  ;;  %4817 = vmatmul.mubr.msk.f32.vlgmr.msra.gmra.mrb[18].mxu0 %vm1654_vm10, %v2495_v35 }
 0x6ad   : > { %4784 = vmatprep.mubr.msk.f32.mxu1 %vm1654_vm10, %v7806_v53  ;;  %4819 = vmatprep.mubr.msk.f32.mxu0 %vm1654_vm10, %v2497_v41 }
 0x6af   : > { %v2734_v3 = vpop.permute.xlu1 %2733 }
 0x6b0   : > { %4785 = vmatmul.mubr.msk.f32.vlgmr.msra.gmra.mrb[14].mxu1 %vm1654_vm10, %v7811_v12  ;;  %4820 = vmatmul.mubr.msk.f32.gmra.mrb[20].mxu0 %vm1654_vm10, %v2499_v56 }
 0x6b1   : > { %4787 = vmatprep.mubr.msk.f32.mxu1 %vm1654_vm10, %v2139_v38  ;;  %4822 = vmatprep.mubr.msk.f32.mxu0 %vm1654_vm10, %v2501_v63 }
 0x6b2   : > { %4951 = vmatpush3.bf16.msra.mxu1 %v7554_v60 }
 0x6b3   : > { %v2736_v4 = vpop.permute.xlu1 %2735  ;;  %4953 = vmatprep.subr.bf16.mxu1 %v7688_v1 }
 0x6b4   : > { %4788 = vmatmul.mubr.msk.f32.gmra.mrb[16].mxu1 %vm1654_vm10, %v2141_v48  ;;  %4823 = vmatmul.mubr.msk.f32.gmra.mrb[22].mxu0 %vm1654_vm10, %v2503_v50 }
 0x6b5   : > { %4790 = vmatprep.mubr.msk.f32.mxu1 %vm1654_vm10, %v2143_v44  ;;  %4825 = vmatprep.mubr.msk.f32.mxu0 %vm1654_vm10, %v2505_v10 }
 0x6b7   : > { %v2738_v51 = vpop.permute.xlu1 %2737 }
 0x6b8   : > { %4791 = vmatmul.mubr.msk.f32.gmra.mrb[18].mxu1 %vm1654_vm10, %v2145_v22  ;;  %4826 = vmatmul.mubr.msk.f32.gmra.mrb[24].mxu0 %vm1654_vm10, %v2507_v5 }
 0x6b9   : > { %4793 = vmatprep.mubr.msk.f32.mxu1 %vm1654_vm10, %v2147_v34  ;;  %3298 = vmatprep.mubr.f32.mxu0 %v6706_v0 }
 0x6bb   : > { %v2740_v60 = vpop.permute.xlu1 %2739 }
 0x6bc   : > { %4794 = vmatmul.mubr.msk.f32.gmra.mrb[20].mxu1 %vm1654_vm10, %v2149_v54 }
 0x6bd   : > { %4832 = vmatprep.mubr.msk.f32.mxu1 %vm1654_vm10, %v2734_v3 }
 0x6bf   : > { %v2742_v6 = vpop.permute.xlu1 %2741 }
 0x6c0   : > { %4833 = vmatmul.mubr.msk.f32.vlgmr.msra.gmra.mrb[22].mxu1 %vm1654_vm10, %v2736_v4 }
 0x6c1   : > { %4835 = vmatprep.mubr.msk.f32.mxu1 %vm1654_vm10, %v2738_v51  ;;  %4955 = vmatpush3.bf16.msra.mxu1 %v7688_v1  ;;  %v2879_v1 = vpop.permute.xlu0 %2878 }
 0x6c3   : > { %v2746_v36 = vpop.permute.xlu1 %2745 }
 0x6c4   : > { %4836 = vmatmul.mubr.msk.f32.gmra.mrb[24].mxu1 %vm1654_vm10, %v2740_v60 }
 0x6c5   : > { %4838 = vmatprep.mubr.msk.f32.mxu1 %vm1654_vm10, %v2742_v6  ;;  %v2883_v19 = vpop.permute.xlu0 %2882 }
 0x6c7   : > { %v2744_v30 = vpop.permute.xlu1 %2743 }
 0x6c8   : > { %4839 = vmatmul.mubr.msk.f32.gmra.mrb[26].mxu1 %vm1654_vm10, %v2744_v30 }
 0x6c9   : > { %4841 = vmatprep.mubr.msk.f32.mxu1 %vm1654_vm10, %v2746_v36  ;;  %v7929_v39 = vpop.permute.xlu0 %4130 }
 0x6cb   : > { %v2748_v8 = vpop.permute.xlu1 %2747 }
 0x6cc   : > { %4842 = vmatmul.mubr.msk.f32.gmra.mrb[28].mxu1 %vm1654_vm10, %v2748_v8 }
 0x6cd   : > { %4848 = vmatprep.mubr.msk.f32.mxu1 %vm1654_vm10, %v2871_v7 }
 0x6cf   : > { %v2873_v14 = vpop.permute.xlu1 %2872 }
 0x6d0   : > { %4849 = vmatmul.mubr.msk.f32.vlgmr.msra.gmra.mrb[22].mxu1 %vm1654_vm10, %v2873_v14 }
 0x6d1   : > { %4851 = vmatprep.mubr.msk.f32.mxu1 %vm1654_vm10, %v2875_v13 }
 0x6d3   : > { %v2877_v15 = vpop.permute.xlu1 %2876 }
 0x6d4   : > { %4852 = vmatmul.mubr.msk.f32.gmra.mrb[24].mxu1 %vm1654_vm10, %v2877_v15 }
 0x6d5   : > { %4854 = vmatprep.mubr.msk.f32.mxu1 %vm1654_vm10, %v2879_v1 }
 0x6d7   : > { %v2881_v18 = vpop.permute.xlu1 %2880 }
 0x6d8   : > { %4855 = vmatmul.mubr.msk.f32.gmra.mrb[26].mxu1 %vm1654_vm10, %v2881_v18 }
 0x6d9   : > { %4857 = vmatprep.mubr.msk.f32.mxu1 %vm1654_vm10, %v2883_v19 }
 0x6db   : > { %v2885_v52 = vpop.permute.xlu1 %2884 }
 0x6dc   : > { %4858 = vmatmul.mubr.msk.f32.gmra.mrb[28].mxu1 %vm1654_vm10, %v2885_v52 }
 0x6dd   : > { %3545 = vmatprep.mubr.f32.mxu1 %v6706_v0 }
 0x6ec   : > { %v7921_v21 = vpop.permute.xlu1 %3063 }
 0x6ef   : > { %v4744_v28 = vpop.f32.mrb[10].mxu1 }
 0x6f0   : > { %v1757_v24 = vpop.f32.mrb[11].mxu1  ;;  %v7923_v31 = vpop.permute.xlu1 %4108 }
 0x6f3   : > { %v4747_v32 = vpop.f32.mrb[12].mxu1 }
 0x6f4   : > { %v1767_v16 = vpop.f32.mrb[13].mxu1  ;;  %v7925_v25 = vpop.permute.xlu1 %4116 }
 0x6f8   : > { %v7927_v9 = vpop.permute.xlu1 %4124 }
 0x6fc   : > { %v4133_v53 = vpop.permute.xlu1 %4132 }
 0x6fd   : > { %v4135_v40 = vsel %vm3137_vm12, %v7929_v39, %v4133_v53 }
 0x6fe   : > { %4188 = vrot.lane.b32.xlu0 %v4135_v40, %s6715_s29 }
 0x71b   : > { %v4754_v12 = vpop.f32.mrb[10].mxu0 }
 0x71c   : > { %v1858_v42 = vpop.f32.mrb[11].mxu0  ;;  %1900 = vrot.lane.b32.xlu0 %v4754_v12, %s6716_s13  ;;  %s6721_s13 = smov 76  }
 0x71d   : > { %1898 = vst.msk [vmem:[%s7768_s11 + $0x8] sm:$0xff] %vm1897_vm13, %v1858_v42  ;;  %vm2281_vm13 = vcmask 687504  }
 0x71f   : > { %v4757_v33 = vpop.f32.mrb[12].mxu0 }
 0x720   : > { %v1868_v27 = vpop.f32.mrb[13].mxu0  ;;  %1912 = vrot.lane.b32.xlu0 %v4757_v33, %s6717_s22  ;;  %s6722_s22 = smov 50  }
 0x721   : > { %1906 = vrot.lane.b32.xlu1 %v1868_v27, %s6718_s2  ;;  %s6723_s2 = smov 16  }
 0x723   : > { %v4760_v29 = vpop.f32.mrb[14].mxu0 }
 0x724   : > { %v1884_v62 = vadd.f32 %v4760_v29, %v4744_v28  ;;  %v1878_v46 = vpop.f32.mrb[15].mxu0 }
 0x725   : > { %v1879_v26 = vadd.f32 %v1878_v46, %v1757_v24 }
 0x726   : > { %1926 = vrot.lane.b32.xlu0 %v1884_v62, %s6719_s26  ;;  %s6726_s26 = smov 118  }
 0x727   : > { %v4763_v38 = vpop.f32.mrb[16].mxu0  ;;  %1920 = vrot.lane.b32.xlu1 %v1879_v26, %s6720_s30  ;;  %s6725_s30 = smov 32  }
 0x728   : > { %v1894_v17 = vadd.f32 %v4763_v38, %v4747_v32  ;;  %v1888_v44 = vpop.f32.mrb[17].mxu0 }
 0x729   : > { %v1889_v45 = vadd.f32 %v1888_v44, %v1767_v16 }
 0x72a   : > { %1938 = vrot.lane.b32.xlu0 %v1894_v17, %s6699_s1  ;;  %s6724_s1 = smov 66  }
 0x72b   : > { %1932 = vrot.lane.b32.xlu1 %v1889_v45, %s6721_s13  ;;  %s6727_s13 = smov 84  }
 0x770   : > { %v7936_v54 = vpop.permute.xlu0 %4188 }
 0x77f   : > { %v4818_v48 = vpop.f32.mrb[18].mxu0 }
 0x780   : > { %v2590_v22 = vpop.f32.mrb[19].mxu0 }
 0x783   : > { %v4786_v49 = vpop.f32.mrb[14].mxu1  ;;  %v4821_v20 = vpop.f32.mrb[20].mxu0 }
 0x784   : > { %v2232_v43 = vpop.f32.mrb[15].mxu1  ;;  %v2600_v34 = vpop.f32.mrb[21].mxu0  ;;  %2278 = vrot.lane.b32.xlu0 %v4786_v49, %s6722_s22  ;;  %s6728_s22 = smov 6  }
 0x785   : > { %2272 = vrot.lane.b32.xlu1 %v2232_v43, %s6723_s2  ;;  %s6729_s2 = smov 100  }
 0x787   : > { %v4789_v55 = vpop.f32.mrb[16].mxu1  ;;  %v7938_v23 = vpop.f32.mrb[22].mxu0 }
 0x788   : > { %v2242_v57 = vpop.f32.mrb[17].mxu1  ;;  %v2610_v35 = vpop.f32.mrb[23].mxu0  ;;  %2636 = vrot.lane.b32.xlu0 %v4818_v48, %s6724_s1  ;;  %s6730_s1 = smov 24  }
 0x789   : > { %2630 = vrot.lane.b32.xlu1 %v2590_v22, %s6725_s30  ;;  %s8873_s30 = smov 94  }
 0x78b   : > { %v4792_v11 = vpop.f32.mrb[18].mxu1  ;;  %v7940_v58 = vpop.f32.mrb[24].mxu0 }
 0x78c   : > { %v2252_v41 = vpop.f32.mrb[19].mxu1  ;;  %v2620_v59 = vpop.f32.mrb[25].mxu0  ;;  %2290 = vrot.lane.b32.xlu0 %v4789_v55, %s6726_s26  ;;  %s8910_s26 = smov 60  }
 0x78d   : > { %2284 = vrot.lane.b32.xlu1 %v2242_v57, %s6727_s13  ;;  %s8911_s13 = smov 59  }
 0x78e   : > { %v1901_v56 = vpop.permute.xlu0 %1900 }
 0x78f   : > { %v4795_v37 = vpop.f32.mrb[20].mxu1  ;;  %1904 = vst.msk [vmem:[%s7768_s11 + $0x8] sm:$0xff] %vm1903_vm14, %v1901_v56  ;;  %vm2295_vm14 = vcmask 195584  }
 0x790   : > { %v2262_v61 = vpop.f32.mrb[21].mxu1  ;;  %2650 = vrot.lane.b32.xlu0 %v4821_v20, %s6728_s22  ;;  %s6732_s22 = smov 14  }
 0x791   : > { %2642 = vrot.lane.b32.xlu1 %v2600_v34, %s6729_s2  ;;  %s6734_s2 = smov 93  }
 0x792   : > { %v1913_v63 = vpop.permute.xlu0 %1912 }
 0x793   : > { %1918 = vst.msk [vmem:[%s7768_s11 + $0x10] sm:$0xff] %vm1917_vm15, %v1913_v63  ;;  %v1907_v47 = vpop.permute.xlu1 %1906  ;;  %vm2287_vm15 = vcmask 966304  }
 0x794   : > { %1910 = vst.msk [vmem:[%s7768_s11 + $0x8] sm:$0xff] %vm1909_vm2, %v1907_v47  ;;  %vm2293_vm2 = vcmask 1048496  }
 0x795   : > { %1916 = vst.msk [vmem:[%s7768_s11 + $0x8] sm:$0xff] %vm1915_vm3, %v1913_v63  ;;  %vm2647_vm3 = vcmask 48128  }
 0x798   : > { %v1927_v50 = vpop.permute.xlu0 %1926 }
 0x799   : > { %v1921_v2 = vpop.permute.xlu1 %1920 }
 0x79a   : > { %1924 = vst.msk [vmem:[%s7768_s11 + $0x10] sm:$0xff] %vm1923_vm4, %v1921_v2  ;;  %vm2653_vm4 = vcmask 326704  }
 0x79b   : > { %1930 = vst.msk [vmem:[%s7768_s11 + $0x10] sm:$0xff] %vm1929_vm6, %v1927_v50  ;;  %vm2301_vm6 = vcmask 474304  }
 0x79c   : > { %v1939_v3 = vpop.permute.xlu0 %1938  ;;  %v3067_v10 = vld [vmem:[%s7768_s11 + $0x8] sm:$0xff] }
 0x79d   : > { %1943 = vst.msk [vmem:[%s7768_s11 + $0x18] sm:$0xff] %vm1654_vm10, %v1939_v3  ;;  %v1933_v4 = vpop.permute.xlu1 %1932  ;;  %3131 = vrot.lane.b32.xlu1 %v3067_v10, %s6712_s14  ;;  %v5706_v5 = vpack.i.bf16 %v3067_v10, %v6706_v0  ;;  %vm538_vm10 = vcmask 1048064  }
 0x79e   : > { %1936 = vst.msk [vmem:[%s7768_s11 + $0x10] sm:$0xff] %vm1935_vm7, %v1933_v4  ;;  %vm2659_vm7 = vcmask 605504  }
 0x79f   : > { %1942 = vst.msk [vmem:[%s7768_s11 + $0x10] sm:$0xff] %vm1941_vm8, %v1939_v3  ;;  %5707 = vrot.lane.b32.xlu0 %v5706_v5, %s8877_s3  ;;  %s8913_s3 = smov 90   ;;  %vm2673_vm8 = vcmask 113664  }
 0x7a0   : > { %539 = vst.msk [vmem:[%s7768_s11 + $0x48] sm:$0xff] %vm538_vm10, %v6706_v0  ;;  %vm2307_vm10 = vcmask 753104  }
 0x7a1   : > { %2298 = vrot.lane.b32.xlu1 %v2252_v41, %s6730_s1  ;;  %s6735_s1 = smov 116  }
 0x7a3   : > { %v4850_v51 = vpop.f32.mrb[22].mxu1  ;;  %5712 = vrot.lane.b32.xlu0 %v5706_v5, %s8875_s24 }
 0x7a4   : > { %v2968_v60 = vpop.f32.mrb[23].mxu1 }
 0x7a5   : > { %2656 = vrot.lane.b32.xlu1 %v2610_v35, %s6711_s12  ;;  %s8909_s12 = smov 74  }
 0x7a6   : > { %v7962_v8 = vld [vmem:[%s7768_s11 + $0x10] sm:$0xff] }
 0x7a7   : > { %v4853_v6 = vpop.f32.mrb[24].mxu1  ;;  %5717 = vrot.lane.b32.xlu0 %v5706_v5, %s8873_s30  ;;  %v5731_v14 = vpack.i.bf16 %v7962_v8, %v3067_v10  ;;  %s6736_s30 = smov 82  }
 0x7a8   : > { %v2978_v36 = vpop.f32.mrb[25].mxu1 }
 0x7a9   : > { %2310 = vrot.lane.b32.xlu1 %v2262_v61, %s6702_s16 }
 0x7ab   : > { %v4856_v7 = vpop.f32.mrb[26].mxu1  ;;  %5722 = vrot.lane.b32.xlu0 %v5706_v5, %s6715_s29 }
 0x7ac   : > { %v2988_v30 = vpop.f32.mrb[27].mxu1 }
 0x7ad   : > { %2668 = vrot.lane.b32.xlu1 %v2620_v59, %s6700_s25  ;;  %s6733_s25 = smov 48  }
 0x7af   : > { %v4859_v13 = vpop.f32.mrb[28].mxu1  ;;  %2304 = vrot.lane.b32.xlu0 %v4792_v11, %s6712_s14 }
 0x7b0   : > { %v2998_v1 = vpop.f32.mrb[29].mxu1 }
 0x7b1   : > { %5732 = vrot.lane.b32.xlu1 %v5731_v14, %s6702_s16 }
 0x7b3   : > { %2662 = vrot.lane.b32.xlu0 %v7938_v23, %s8909_s12  ;;  %s8912_s12 = smov 56  }
 0x7b5   : > { %5737 = vrot.lane.b32.xlu1 %v5731_v14, %s8910_s26 }
 0x7b7   : > { %2316 = vrot.lane.b32.xlu0 %v4795_v37, %s8875_s24  ;;  %s6738_s24 = smov 22  }
 0x7b9   : > { %5742 = vrot.lane.b32.xlu1 %v5731_v14, %s8911_s13 }
 0x7bb   : > { %2676 = vrot.lane.b32.xlu0 %v7940_v58, %s6732_s22  ;;  %s6737_s22 = smov 124  }
 0x7bd   : > { %3008 = vrot.lane.b32.xlu1 %v2968_v60, %s6733_s25  ;;  %s6739_s25 = smov 30  }
 0x7bf   : > { %5727 = vrot.lane.b32.xlu0 %v5731_v14, %s6734_s2 }
 0x7c1   : > { %3020 = vrot.lane.b32.xlu1 %v2978_v36, %s6735_s1 }
 0x7c3   : > { %3133 = vrot.lane.b32.xlu0 %v7962_v8, %s6712_s14 }
 0x7c5   : > { %3034 = vrot.lane.b32.xlu1 %v2988_v30, %s8912_s12  ;;  %s6740_s12 = smov [#allocation21]  }
 0x7c7   : > { %3014 = vrot.lane.b32.xlu0 %v4850_v51, %s6736_s30  ;;  %s8916_s30 = smov 94  }
 0x7c9   : > { %3046 = vrot.lane.b32.xlu1 %v2998_v1, %s6737_s22  ;;  %s6569_s22 = sshll.u32 %s6740_s12, 4  ;;  %s6570_s22 = int_to_ptr.vmem [resolvable:$false] %s6569_s22 }
 0x7cb   : > { %3028 = vrot.lane.b32.xlu0 %v4853_v6, %s6738_s24  ;;  %s8914_s24 = smov 127  }
 0x7cf   : > { %3040 = vrot.lane.b32.xlu0 %v4856_v7, %s8913_s3  ;;  %s8915_s3 = smov 126  }
 0x7d3   : > { %3054 = vrot.lane.b32.xlu0 %v4859_v13, %s6739_s25  ;;  %s6571_s25 = scalar_lea.vmem %s6570_s22, 3072 }
 0x7f6   : > { %v2279_v15 = vpop.permute.xlu0 %2278 }
 0x7f7   : > { %v2273_v18 = vpop.permute.xlu1 %2272 }
 0x7f8   : > { %2276 = vst.msk [vmem:[%s7768_s11 + $0x18] sm:$0xff] %vm2275_vm11, %v2273_v18  ;;  %vm2313_vm11 = vcmask 1031904  }
 0x7f9   : > { %2282 = vst.msk [vmem:[%s7768_s11 + $0x18] sm:$0xff] %vm2281_vm13, %v2279_v15  ;;  %vm2665_vm13 = vcmask 884304  }
 0x7fa   : > { %v7983_v19 = vpop.permute.xlu0 %2636 }
 0x7fb   : > { %v7985_v52 = vpop.permute.xlu1 %2630 }
 0x7fe   : > { %v2291_v28 = vpop.permute.xlu0 %2290 }
 0x7ff   : > { %2296 = vst.msk [vmem:[%s7768_s11 + $0x20] sm:$0xff] %vm2295_vm14, %v2291_v28  ;;  %v2285_v24 = vpop.permute.xlu1 %2284  ;;  %vm2671_vm14 = vcmask 1048416  }
 0x800   : > { %2288 = vst.msk [vmem:[%s7768_s11 + $0x18] sm:$0xff] %vm2287_vm15, %v2285_v24  ;;  %vm2319_vm15 = vcmask 1048560  }
 0x801   : > { %2294 = vst.msk [vmem:[%s7768_s11 + $0x18] sm:$0xff] %vm2293_vm2, %v2291_v28  ;;  %vm2321_vm2 = vcmask 261120  }
 0x802   : > { %v2651_v16 = vpop.permute.xlu0 %2650 }
 0x803   : > { %v2643_v32 = vpop.permute.xlu1 %2642 }
 0x804   : > { %2648 = vst.msk [vmem:[%s7768_s11 + $0x30] sm:$0xff] %vm2647_vm3, %v2643_v32  ;;  %vm2633_vm3 = vcmask 539904  }
 0x805   : > { %2654 = vst.msk [vmem:[%s7768_s11 + $0x30] sm:$0xff] %vm2653_vm4, %v2651_v16  ;;  %vm2639_vm4 = vcmask 818704  }
 0x808   : > { %v7995_v40 = vld [vmem:[%s7768_s11 + $0x18] sm:$0xff] }
 0x809   : > { %v5766_v27 = vpack.i.bf16 %v7995_v40, %v7995_v40  ;;  %v5751_v44 = vpack.i.bf16 %v7995_v40, %v7962_v8 }
 0x80f   : > { %v7992_v53 = vpop.permute.xlu1 %3131 }
 0x810   : > { %3188 = vrot.lane.b32.xlu0 %v7992_v53, %s6715_s29 }
 0x811   : > { %v7999_v12 = vpop.permute.xlu0 %5707 }
 0x812   : > { %v5710_v42 = vunpack.i.h.bf16 %v7999_v12  ;;  %v5709_v33 = vunpack.i.l.bf16 %v7999_v12 }
 0x813   : > { %v2299_v29 = vpop.permute.xlu1 %2298 }
 0x814   : > { %v3079_v62 = vsel %vm562_vm0, %v5709_v33, %v5710_v42  ;;  %2302 = vst.msk [vmem:[%s7768_s11 + $0x20] sm:$0xff] %vm2301_vm6, %v2299_v29  ;;  %5767 = vrot.lane.b32.xlu0 %v5766_v27, %s6702_s16  ;;  %vm2645_vm6 = vcmask 1048352  }
 0x815   : > { %v8010_v46 = vpop.permute.xlu0 %5712  ;;  %v5746_v26 = vpack.i.bf16 %v3079_v62, %v7962_v8 }
 0x816   : > { %v5715_v60 = vunpack.i.h.bf16 %v8010_v46  ;;  %v5714_v6 = vunpack.i.l.bf16 %v8010_v46 }
 0x817   : > { %v2657_v38 = vpop.permute.xlu1 %2656  ;;  %5747 = vrot.lane.b32.xlu1 %v5746_v26, %s6715_s29 }
 0x818   : > { %2660 = vst.msk [vmem:[%s7768_s11 + $0x30] sm:$0xff] %vm2659_vm7, %v2657_v38  ;;  %5772 = vrot.lane.b32.xlu0 %v5766_v27, %s8910_s26  ;;  %vm2679_vm7 = vcmask 392304   ;;  %v3087_v14 = vsel %vm571_vm1, %v5714_v6, %v5715_v60 }
 0x819   : > { %v8016_v17 = vpop.permute.xlu0 %5717 }
 0x81a   : > { %v5720_v5 = vunpack.i.h.bf16 %v8016_v17  ;;  %v5719_v51 = vunpack.i.l.bf16 %v8016_v17 }
 0x81b   : > { %v2311_v45 = vpop.permute.xlu1 %2310  ;;  %5752 = vrot.lane.b32.xlu1 %v5751_v44, %s8914_s24 }
 0x81c   : > { %5777 = vrot.lane.b32.xlu0 %v5766_v27, %s8911_s13 }
 0x81d   : > { %v8022_v48 = vpop.permute.xlu0 %5722 }
 0x81f   : > { %v2669_v22 = vpop.permute.xlu1 %2668  ;;  %5757 = vrot.lane.b32.xlu1 %v5751_v44, %s8915_s3 }
 0x820   : > { %2674 = vst.msk [vmem:[%s7768_s11 + $0x38] sm:$0xff] %vm2673_vm8, %v2669_v22  ;;  %3383 = vrot.lane.b32.xlu0 %v7995_v40, %s6712_s14  ;;  %vm3011_vm8 = vcmask 671104  }
 0x821   : > { %v2305_v49 = vpop.permute.xlu0 %2304 }
 0x822   : > { %2308 = vst.msk [vmem:[%s7768_s11 + $0x20] sm:$0xff] %vm2307_vm10, %v2305_v49  ;;  %vm3025_vm10 = vcmask 179200  }
 0x823   : > { %v8029_v20 = vpop.permute.xlu1 %5732  ;;  %5762 = vrot.lane.b32.xlu1 %v5751_v44, %s8916_s30  ;;  %2314 = vst.msk [vmem:[%s7768_s11 + $0x20] sm:$0xff] %vm2313_vm11, %v2311_v45  ;;  %vm3017_vm11 = vcmask 949904  }
 0x824   : > { %v5734_v58 = vunpack.i.l.bf16 %v8029_v20 }
 0x825   : > { %v2663_v43 = vpop.permute.xlu0 %2662 }
 0x826   : > { %2666 = vst.msk [vmem:[%s7768_s11 + $0x30] sm:$0xff] %vm2665_vm13, %v2663_v43  ;;  %vm3023_vm13 = vcmask 1048480  }
 0x827   : > { %2672 = vst.msk [vmem:[%s7768_s11 + $0x30] sm:$0xff] %vm2671_vm14, %v2669_v22  ;;  %v8035_v34 = vpop.permute.xlu1 %5737  ;;  %3135 = vrot.lane.b32.xlu1 %v7995_v40, %s6712_s14  ;;  %vm3051_vm14 = vcmask 244736  }
 0x828   : > { %v5740_v24 = vunpack.i.h.bf16 %v8035_v34 }
 0x829   : > { %v2317_v55 = vpop.permute.xlu0 %2316 }
 0x82a   : > { %2320 = vst.msk [vmem:[%s7768_s11 + $0x20] sm:$0xff] %vm2319_vm15, %v2317_v55  ;;  %vm3031_vm15 = vcmask 457904  }
 0x82b   : > { %2322 = vst.msk [vmem:[%s7768_s11 + $0x28] sm:$0xff] %vm2321_vm2, %v2317_v55  ;;  %v8043_v23 = vpop.permute.xlu1 %5742  ;;  %vm3037_vm2 = vcmask 736704  }
 0x82c   : > { %2634 = vst.msk [vmem:[%s7768_s11 + $0x28] sm:$0xff] %vm2633_vm3, %v7985_v52  ;;  %vm3043_vm3 = vcmask 1015504  }
 0x82d   : > { %2640 = vst.msk [vmem:[%s7768_s11 + $0x28] sm:$0xff] %vm2639_vm4, %v7983_v19  ;;  %v2677_v57 = vpop.permute.xlu0 %2676  ;;  %vm3049_vm4 = vcmask 1048544  }
 0x82e   : > { %2646 = vst.msk [vmem:[%s7768_s11 + $0x28] sm:$0xff] %vm2645_vm6, %v2643_v32  ;;  %vm3057_vm6 = vcmask 523504   ;;  %v5739_v32 = vunpack.i.l.bf16 %v8035_v34  ;;  %v8102_v26 = vld [vmem:[%s7768_s11 + $0x30] sm:$0xff] }
 0x82f   : > { %2680 = vst.msk [vmem:[%s7768_s11 + $0x38] sm:$0xff] %vm2679_vm7, %v2677_v57  ;;  %v3009_v35 = vpop.permute.xlu1 %3008  ;;  %vm3095_vm7 = vcmask 769024   ;;  %v5826_v38 = vpack.i.bf16 %v7962_v8, %v8102_v26  ;;  %v5846_v44 = vpack.i.bf16 %v8102_v26, %v6706_v0 }
 0x830   : > { %3012 = vst.msk [vmem:[%s7768_s11 + $0x38] sm:$0xff] %vm3011_vm8, %v3009_v35  ;;  %v3096_v13 = vsel %vm3095_vm7, %v5719_v51, %v5720_v5  ;;  %vm3102_vm8 = vcmask 760832  }
 0x831   : > { %v8050_v11 = vpop.permute.xlu0 %5727  ;;  %v8121_v22 = vld [vmem:[%s7768_s11 + $0x20] sm:$0xff] }
 0x832   : > { %v5730_v41 = vunpack.i.h.bf16 %v8050_v11  ;;  %v5729_v18 = vunpack.i.l.bf16 %v8050_v11 }
 0x833   : > { %v3021_v59 = vpop.permute.xlu1 %3020 }
 0x834   : > { %v5786_v56 = vpack.i.bf16 %v5734_v58, %v5730_v41  ;;  %3026 = vst.msk [vmem:[%s7768_s11 + $0x40] sm:$0xff] %vm3025_vm10, %v3021_v59  ;;  %vm3119_vm10 = vcmask 490496  }
 0x835   : > { %v8057_v37 = vpop.permute.xlu0 %3133  ;;  %v3120_v29 = vsel %vm3119_vm10, %v5739_v32, %v5740_v24  ;;  %v3570_v45 = vld [vmem:[%s7768_s11 + $0x28] sm:$0xff] }
 0x836   : > { %5787 = vrot.lane.b32.xlu1 %v5786_v56, %s6715_s29  ;;  %v5811_v46 = vpack.i.bf16 %v3120_v29, %v5739_v32  ;;  %v3138_v17 = vsel %vm3137_vm12, %v7992_v53, %v8057_v37  ;;  %v5856_v49 = vpack.i.bf16 %v3570_v45, %v8121_v22  ;;  %v5831_v53 = vpack.i.bf16 %v8121_v22, %v7995_v40 }
 0x837   : > { %v3035_v61 = vpop.permute.xlu1 %3034  ;;  %v5881_v0 = vpack.i.bf16 %v8102_v26, %v3570_v45 }
 0x839   : > { %v3015_v63 = vpop.permute.xlu0 %3014 }
 0x83a   : > { %3018 = vst.msk [vmem:[%s7768_s11 + $0x38] sm:$0xff] %vm3017_vm11, %v3015_v63  ;;  %vm3194_vm11 = vcmask 285696  }
 0x83b   : > { %3024 = vst.msk [vmem:[%s7768_s11 + $0x38] sm:$0xff] %vm3023_vm13, %v3021_v59  ;;  %v3047_v47 = vpop.permute.xlu1 %3046  ;;  %v8174_v59 = vld [vmem:[%s7768_s11 + $0x58] sm:$0xff]  ;;  %vm3128_vm13 = vcmask 482304  }
 0x83c   : > { %3052 = vst.msk [vmem:[%s7768_s11 + $0x48] sm:$0xff] %vm3051_vm14, %v3047_v47 }
 0x83d   : > { %v3029_v50 = vpop.permute.xlu0 %3028 }
 0x83e   : > { %3032 = vst.msk [vmem:[%s7768_s11 + $0x40] sm:$0xff] %vm3031_vm15, %v3029_v50 }
 0x83f   : > { %3038 = vst.msk [vmem:[%s7768_s11 + $0x40] sm:$0xff] %vm3037_vm2, %v3035_v61 }
 0x841   : > { %v3041_v2 = vpop.permute.xlu0 %3040 }
 0x842   : > { %3044 = vst.msk [vmem:[%s7768_s11 + $0x40] sm:$0xff] %vm3043_vm3, %v3041_v2  ;;  %v3817_v40 = vld [vmem:[%s7768_s11 + $0x38] sm:$0xff]  ;;  %v5735_v2 = vunpack.i.h.bf16 %v8029_v20 }
 0x843   : > { %3050 = vst.msk [vmem:[%s7768_s11 + $0x40] sm:$0xff] %vm3049_vm4, %v3047_v47  ;;  %v5911_v43 = vpack.i.bf16 %v3817_v40, %v8121_v22  ;;  %v5926_v57 = vpack.i.bf16 %v3817_v40, %v3817_v40 }
 0x845   : > { %v3055_v3 = vpop.permute.xlu0 %3054 }
 0x846   : > { %3058 = vst.msk [vmem:[%s7768_s11 + $0x48] sm:$0xff] %vm3057_vm6, %v3055_v3 }
 0x84a   : > { %v8154_v55 = vld [vmem:[%s7768_s11 + $0x40] sm:$0xff] }
 0x84b   : > { %v5941_v61 = vpack.i.bf16 %v8154_v55, %v3817_v40 }
 0x84d   : > { %v4064_v35 = vld [vmem:[%s7768_s11 + $0x48] sm:$0xff] }
 0x84e   : > { %v5951_v11 = vpack.i.bf16 %v4064_v35, %v8154_v55  ;;  %v5976_v56 = vpack.i.bf16 %v8174_v59, %v4064_v35 }
 0x889   : > { %v8068_v10 = vpop.permute.xlu1 %5747 }
 0x88d   : > { %v8070_v4 = vpop.permute.xlu1 %5752 }
 0x88e   : > { %v5754_v36 = vunpack.i.l.bf16 %v8070_v4 }
 0x890   : > { %v3080_v19 = vsel %vm562_vm0, %v5710_v42, %v5754_v36  ;;  %v3103_v42 = vsel %vm3102_vm8, %v5729_v18, %v5730_v41  ;;  %v8171_v41 = vpop.permute.xlu0 %3188 }
 0x891   : > { %v8077_v7 = vpop.permute.xlu1 %5757  ;;  %v5791_v33 = vpack.i.bf16 %v5754_v36, %v3080_v19  ;;  %v5806_v62 = vpack.i.bf16 %v3103_v42, %v5729_v18  ;;  %v5725_v18 = vunpack.i.h.bf16 %v8022_v48  ;;  %v5724_v19 = vunpack.i.l.bf16 %v8022_v48 }
 0x892   : > { %v5759_v30 = vunpack.i.l.bf16 %v8077_v7 }
 0x894   : > { %v3088_v1 = vsel %vm571_vm1, %v5715_v60, %v5759_v30  ;;  %v5781_v15 = vpack.i.bf16 %v3096_v13, %v5759_v30  ;;  %v8180_v63 = vpop.permute.xlu0 %5767  ;;  %v3111_v60 = vsel %vm605_vm5, %v5734_v58, %v5735_v2  ;;  %v5744_v13 = vunpack.i.l.bf16 %v8043_v23 }
 0x895   : > { %v8087_v52 = vpop.permute.xlu1 %5762  ;;  %v5796_v28 = vpack.i.bf16 %v3088_v1, %v3087_v14  ;;  %v5769_v50 = vunpack.i.l.bf16 %v8180_v63 }
 0x896   : > { %v5764_v16 = vunpack.i.l.bf16 %v8087_v52  ;;  %5782 = vrot.lane.b32.xlu0 %v5781_v15, %s6715_s29 }
 0x897   : > { %5797 = vrot.lane.b32.xlu1 %v5796_v28, %s6715_s29  ;;  %v3112_v3 = vsel %vm605_vm5, %v5735_v2, %v5769_v50  ;;  %v5749_v28 = vunpack.i.l.bf16 %v8068_v10 }
 0x898   : > { %v3097_v12 = vsel %vm3095_vm7, %v5720_v5, %v5764_v16  ;;  %v8187_v47 = vpop.permute.xlu0 %5772  ;;  %v6016_v6 = vpack.i.bf16 %v3112_v3, %v3111_v60 }
 0x899   : > { %v5801_v27 = vpack.i.bf16 %v5764_v16, %v3097_v12  ;;  %v5774_v5 = vunpack.i.l.bf16 %v8187_v47  ;;  %v3136_v30 = vpop.permute.xlu1 %3135  ;;  %v3196_v48 = vsel %vm3194_vm11, %v5725_v18, %v5749_v28 }
 0x89a   : > { %5792 = vrot.lane.b32.xlu0 %v5791_v33, %s6715_s29  ;;  %v3139_v1 = vsel %vm3137_vm12, %v8057_v37, %v3136_v30  ;;  %v5750_v33 = vunpack.i.h.bf16 %v8068_v10 }
 0x89b   : > { %5802 = vrot.lane.b32.xlu1 %v5801_v27, %s6715_s29  ;;  %v3121_v36 = vsel %vm3119_vm10, %v5740_v24, %v5774_v5  ;;  %v3195_v27 = vsel %vm3194_vm11, %v5724_v19, %v5725_v18 }
 0x89c   : > { %v8195_v51 = vpop.permute.xlu0 %5777  ;;  %v6021_v20 = vpack.i.bf16 %v5744_v13, %v3121_v36 }
 0x89e   : > { %5807 = vrot.lane.b32.xlu0 %v5806_v62, %s6715_s29 }
 0x89f   : > { %5812 = vrot.lane.b32.xlu1 %v5811_v46, %s6715_s29 }
 0x8a0   : > { %v8208_v14 = vpop.permute.xlu0 %3383 }
 0x8a2   : > { %5827 = vrot.lane.b32.xlu0 %v5826_v38, %s8916_s30 }
 0x8a3   : > { %3190 = vrot.lane.b32.xlu1 %v3138_v17, %s6715_s29 }
 0x8a6   : > { %3632 = vrot.lane.b32.xlu0 %v8102_v26, %s6712_s14 }
 0x8a7   : > { %5817 = vrot.lane.b32.xlu1 %v5826_v38, %s8914_s24 }
 0x8a8   : > { %v8212_v58 = vpop.permute.xlu1 %5787 }
 0x8aa   : > { %5847 = vrot.lane.b32.xlu0 %v5846_v44, %s8916_s30 }
 0x8ab   : > { %5822 = vrot.lane.b32.xlu1 %v5826_v38, %s8915_s3 }
 0x8ae   : > { %5857 = vrot.lane.b32.xlu0 %v5856_v49, %s8914_s24 }
 0x8af   : > { %5832 = vrot.lane.b32.xlu1 %v5831_v53, %s6734_s2 }
 0x8b2   : > { %5867 = vrot.lane.b32.xlu0 %v5856_v49, %s8916_s30 }
 0x8b3   : > { %3385 = vrot.lane.b32.xlu1 %v8121_v22, %s6712_s14 }
 0x8b6   : > { %5872 = vrot.lane.b32.xlu0 %v5856_v49, %s6702_s16 }
 0x8b7   : > { %5837 = vrot.lane.b32.xlu1 %v5846_v44, %s8914_s24 }
 0x8ba   : > { %5882 = vrot.lane.b32.xlu0 %v5881_v0, %s6702_s16 }
 0x8bb   : > { %5842 = vrot.lane.b32.xlu1 %v5846_v44, %s8915_s3 }
 0x8be   : > { %5887 = vrot.lane.b32.xlu0 %v5856_v49, %s8910_s26 }
 0x8bf   : > { %5852 = vrot.lane.b32.xlu1 %v5831_v53, %s6715_s29 }
 0x8c2   : > { %5897 = vrot.lane.b32.xlu0 %v5881_v0, %s8910_s26 }
 0x8c3   : > { %5862 = vrot.lane.b32.xlu1 %v5856_v49, %s8915_s3 }
 0x8c6   : > { %5902 = vrot.lane.b32.xlu0 %v5881_v0, %s8911_s13 }
 0x8c7   : > { %5877 = vrot.lane.b32.xlu1 %v5881_v0, %s6734_s2 }
 0x8ca   : > { %3387 = vrot.lane.b32.xlu0 %v3570_v45, %s6712_s14 }
 0x8cb   : > { %5892 = vrot.lane.b32.xlu1 %v5856_v49, %s8911_s13 }
 0x8ce   : > { %5912 = vrot.lane.b32.xlu0 %v5911_v43, %s8914_s24 }
 0x8cf   : > { %3630 = vrot.lane.b32.xlu1 %v3570_v45, %s6712_s14 }
 0x8d2   : > { %5922 = vrot.lane.b32.xlu0 %v5911_v43, %s8916_s30 }
 0x8d3   : > { %5907 = vrot.lane.b32.xlu1 %v5881_v0, %s6715_s29 }
 0x8d6   : > { %3877 = vrot.lane.b32.xlu0 %v3817_v40, %s6712_s14 }
 0x8d7   : > { %5917 = vrot.lane.b32.xlu1 %v5911_v43, %s8915_s3 }
 0x8da   : > { %4072 = vrot.lane.b32.xlu0 %v8154_v55, %s8914_s24 }
 0x8db   : > { %5927 = vrot.lane.b32.xlu1 %v5926_v57, %s6702_s16 }
 0x8de   : > { %4088 = vrot.lane.b32.xlu0 %v8154_v55, %s8916_s30 }
 0x8df   : > { %5932 = vrot.lane.b32.xlu1 %v5926_v57, %s8910_s26 }
 0x8e2   : > { %5952 = vrot.lane.b32.xlu0 %v5951_v11, %s8914_s24 }
 0x8e3   : > { %5937 = vrot.lane.b32.xlu1 %v5926_v57, %s8911_s13 }
 0x8e6   : > { %5962 = vrot.lane.b32.xlu0 %v5951_v11, %s8916_s30 }
 0x8e7   : > { %3634 = vrot.lane.b32.xlu1 %v3817_v40, %s6712_s14 }
 0x8ea   : > { %5967 = vrot.lane.b32.xlu0 %v5951_v11, %s6702_s16 }
 0x8eb   : > { %4080 = vrot.lane.b32.xlu1 %v8154_v55, %s8915_s3 }
 0x8ee   : > { %5977 = vrot.lane.b32.xlu0 %v5976_v56, %s6702_s16  ;;  %s5075_s16 = smul.u32 1536, %s6823_s23 }
 0x8ef   : > { %5942 = vrot.lane.b32.xlu1 %v5941_v61, %s6734_s2 }
 0x8f2   : > { %5982 = vrot.lane.b32.xlu0 %v5951_v11, %s8910_s26 }
 0x8f3   : > { %3879 = vrot.lane.b32.xlu1 %v8154_v55, %s6712_s14 }
 0x8f6   : > { %5992 = vrot.lane.b32.xlu0 %v5976_v56, %s8910_s26 }
 0x8f7   : > { %5947 = vrot.lane.b32.xlu1 %v5941_v61, %s6715_s29 }
 0x8fa   : > { %5997 = vrot.lane.b32.xlu0 %v5976_v56, %s8911_s13 }
 0x8fb   : > { %5957 = vrot.lane.b32.xlu1 %v5951_v11, %s8915_s3 }
 0x8fe   : > { %3881 = vrot.lane.b32.xlu0 %v4064_v35, %s6712_s14 }
 0x8ff   : > { %5972 = vrot.lane.b32.xlu1 %v5976_v56, %s6734_s2  ;;  %s4315_s2 = scalar_lea.sflag [#allocation6], %s7107_s5 }
 0x902   : > { %6017 = vrot.lane.b32.xlu0 %v6016_v6, %s6715_s29  ;;  %v5755_v6 = vunpack.i.h.bf16 %v8070_v4  ;;  %v5765_v4 = vunpack.i.h.bf16 %v8087_v52  ;;  %v5779_v52 = vunpack.i.l.bf16 %v8195_v51 }
 0x903   : > { %5987 = vrot.lane.b32.xlu1 %v5951_v11, %s8911_s13  ;;  %s8761_s13 = scalar_lea.hbm %s8856_s10, %s5075_s16 }
 0x906   : > { %6022 = vrot.lane.b32.xlu0 %v6021_v20, %s6715_s29  ;;  %v5770_v20 = vunpack.i.h.bf16 %v8180_v63 }
 0x907   : > { %4128 = vrot.lane.b32.xlu1 %v4064_v35, %s6712_s14  ;;  %s4334_s14 = sshll.u32 %s7768_s11, 4  ;;  %s4335_s14 = int_to_ptr.vmem [resolvable:$true] %s4334_s14 }
 0x908   : > { %v5783_v34 = vpop.permute.xlu0 %5782  ;;  %s6565_s1 = scalar_lea.vmem %s4335_s14, 1536  ;;  %p6572_p6 = scmp.lt.s32.totalorder %s4335_s14, %s6570_s22 }
 0x909   : > { %v5798_v15 = vpop.permute.xlu1 %5797  ;;  %v5784_v24 = vunpack.i.l.bf16 %v5783_v34  ;;  %v5785_v46 = vunpack.i.h.bf16 %v5783_v34  ;;  %p6566_p4 = scmp.ne.s32.totalorder %s4335_s14, %s6565_s1  ;;  %p6573_p0 = scmp.lt.s32.totalorder %s6571_s25, %s6565_s1 }
 0x90a   : > { %3192 = vrot.lane.b32.xlu0 %v3139_v1, %s6715_s29  ;;  %v5800_v32 = vunpack.i.h.bf16 %v5798_v15  ;;  %v5799_v38 = vunpack.i.l.bf16 %v5798_v15  ;;  %v5780_v15 = vunpack.i.h.bf16 %v8195_v51 }
 0x90b   : > { %6002 = vrot.lane.b32.xlu1 %v5976_v56, %s6715_s29  ;;  %p6567_p3 = pnand %p6566_p4, %p8917_p1  ;;  %p6574_p2 = por %p6573_p0, %p6572_p6 }
 0x90c   : > { %v5793_v16 = vpop.permute.xlu0 %5792  ;;  %v3200_v10 = vsel %vm3194_vm11, %v5800_v32, %v5784_v24  ;;  %v3199_v35 = vsel %vm3194_vm11, %v5799_v38, %v5800_v32 }
 0x90d   : > { %v5795_v12 = vunpack.i.h.bf16 %v5793_v16  ;;  %v5794_v42 = vunpack.i.l.bf16 %v5793_v16  ;;  %v5803_v37 = vpop.permute.xlu1 %5802  ;;  %v5775_v16 = vunpack.i.h.bf16 %v8187_v47  ;;  %p6568_p9 = pneg %p6567_p3 }
 0x90e   : > { %v5805_v29 = vunpack.i.h.bf16 %v5803_v37  ;;  %v5804_v62 = vunpack.i.l.bf16 %v5803_v37 }
 0x90f   : > { %v3197_v17 = vsel %vm3194_vm11, %v5750_v33, %v5794_v42  ;;  %v3198_v44 = vsel %vm3194_vm11, %v5794_v42, %v5795_v12  ;;  %v6011_v12 = vpack.i.bf16 %v5780_v15, %v5775_v16  ;;  %p6575_p8 = pnand %p6574_p2, %p6568_p9 }
 0x910   : > { %v8228_v45 = vpop.permute.xlu0 %5807  ;;  %v4956_v49 = vpack.c.bf16 %v3198_v44, %v3196_v48  ;;  %v4958_v53 = vpack.c.bf16 %v3197_v17, %v3195_v27  ;;  %v3202_v0 = vsel %vm3194_vm11, %v5804_v62, %v5805_v29  ;;  %v3201_v57 = vsel %vm3194_vm11, %v5785_v46, %v5804_v62 }
 0x911   : > { %v8232_v40 = vpop.permute.xlu1 %5812  ;;  %v4960_v43 = vpack.c.bf16 %v3202_v0, %v3200_v10  ;;  %v4962_v61 = vpack.c.bf16 %v3201_v57, %v3199_v35  ;;  %v5745_v29 = vunpack.i.h.bf16 %v8043_v23 }
 0x912   : > { %4957 = vmatprep.subr.bf16.mxu0 %v4956_v49 }
 0x913   : > { %4959 = vmatpush1.bf16.msra.mxu0 %v4958_v53  ;;  %v3130_v48 = vsel %vm3128_vm13, %v5745_v29, %v5779_v52  ;;  %v3129_v17 = vsel %vm3128_vm13, %v5744_v13, %v5745_v29 }
 0x914   : > { %v8236_v11 = vpop.permute.xlu0 %5827  ;;  %4961 = vmatprep.subr.bf16.mxu0 %v4960_v43  ;;  %v6026_v49 = vpack.i.bf16 %v3130_v48, %v3129_v17  ;;  %v5760_v43 = vunpack.i.h.bf16 %v8077_v7 }
 0x915   : > { %v8238_v56 = vpop.permute.xlu1 %3190  ;;  %v5830_v57 = vunpack.i.h.bf16 %v8236_v11 }
 0x917   : > { %4963 = vmatpush1.bf16.msra.mxu0 %v4962_v61 }
 0x918   : > { %v8240_v50 = vpop.permute.xlu0 %3632 }
 0x919   : > { %v8242_v2 = vpop.permute.xlu1 %5817 }
 0x91a   : > { %v5820_v46 = vunpack.i.h.bf16 %v8242_v2 }
 0x91c   : > { %v8244_v3 = vpop.permute.xlu0 %5847  ;;  %v3335_v53 = vsel %vm562_vm0, %v5820_v46, %v5755_v6 }
 0x91d   : > { %v8246_v5 = vpop.permute.xlu1 %5822  ;;  %v6031_v23 = vpack.i.bf16 %v3335_v53, %v7962_v8 }
 0x91e   : > { %v5825_v10 = vunpack.i.h.bf16 %v8246_v5 }
 0x920   : > { %v8248_v60 = vpop.permute.xlu0 %5857  ;;  %v3343_v13 = vsel %vm571_vm1, %v5825_v10, %v5760_v43 }
 0x921   : > { %v5859_v36 = vunpack.i.l.bf16 %v8248_v60  ;;  %v8252_v30 = vpop.permute.xlu1 %5832  ;;  %v5860_v46 = vunpack.i.h.bf16 %v8248_v60 }
 0x922   : > { %v5834_v34 = vunpack.i.l.bf16 %v8252_v30  ;;  %v5835_v7 = vunpack.i.h.bf16 %v8252_v30 }
 0x923   : > { %v3336_v1 = vsel %vm562_vm0, %v5755_v6, %v5859_v36 }
 0x924   : > { %v6041_v18 = vpack.i.bf16 %v5859_v36, %v3336_v1  ;;  %v6006_v19 = vpack.i.bf16 %v5770_v20, %v5834_v34  ;;  %v8260_v28 = vpop.permute.xlu0 %5867  ;;  %v3351_v36 = vsel %vm3095_vm7, %v5830_v57, %v5765_v4  ;;  %v3357_v29 = vsel %vm3102_vm8, %v5834_v34, %v5835_v7 }
 0x925   : > { %v5869_v24 = vunpack.i.l.bf16 %v8260_v28  ;;  %v8264_v32 = vpop.permute.xlu1 %3385  ;;  %v6056_v17 = vpack.i.bf16 %v5835_v7, %v3357_v29  ;;  %v5824_v57 = vunpack.i.l.bf16 %v8246_v5  ;;  %v5870_v5 = vunpack.i.h.bf16 %v8260_v28 }
 0x926   : > { %6007 = vrot.lane.b32.xlu1 %v6006_v19, %s6715_s29  ;;  %6042 = vrot.lane.b32.xlu0 %v6041_v18, %s6715_s29  ;;  %v6036_v18 = vpack.i.bf16 %v3351_v36, %v3343_v13 }
 0x927   : > { %v3352_v33 = vsel %vm3095_vm7, %v5765_v4, %v5869_v24 }
 0x928   : > { %v6051_v42 = vpack.i.bf16 %v5869_v24, %v3352_v33  ;;  %v8274_v37 = vpop.permute.xlu0 %5872 }
 0x929   : > { %v8277_v27 = vpop.permute.xlu1 %5837 }
 0x92a   : > { %6012 = vrot.lane.b32.xlu1 %v6011_v12, %s6715_s29  ;;  %6052 = vrot.lane.b32.xlu0 %v6051_v42, %s6715_s29 }
 0x92c   : > { %v8282_v62 = vpop.permute.xlu0 %5882 }
 0x92d   : > { %v8286_v38 = vpop.permute.xlu1 %5842  ;;  %v5884_v8 = vunpack.i.l.bf16 %v8282_v62 }
 0x92e   : > { %3439 = vrot.lane.b32.xlu1 %v8208_v14, %s6715_s29 }
 0x930   : > { %v8293_v44 = vpop.permute.xlu0 %5887 }
 0x931   : > { %v8297_v0 = vpop.permute.xlu1 %5852 }
 0x932   : > { %6027 = vrot.lane.b32.xlu1 %v6026_v49, %s6715_s29 }
 0x934   : > { %v8302_v35 = vpop.permute.xlu0 %5897 }
 0x935   : > { %v8306_v61 = vpop.permute.xlu1 %5862  ;;  %v5899_v30 = vunpack.i.l.bf16 %v8302_v35 }
 0x936   : > { %v5864_v6 = vunpack.i.l.bf16 %v8306_v61  ;;  %6032 = vrot.lane.b32.xlu1 %v6031_v23, %s6715_s29  ;;  %v5865_v34 = vunpack.i.h.bf16 %v8306_v61 }
 0x938   : > { %v8311_v1 = vpop.permute.xlu0 %5902  ;;  %v3344_v19 = vsel %vm571_vm1, %v5760_v43, %v5864_v6  ;;  %v5819_v43 = vunpack.i.l.bf16 %v8242_v2  ;;  %v3591_v13 = vsel %vm571_vm1, %v5865_v34, %v5824_v57  ;;  %v3389_v2 = vsel %vm3137_vm12, %v8208_v14, %v8264_v32 }
 0x939   : > { %v5878_v24 = vpop.permute.xlu1 %5877  ;;  %v6046_v12 = vpack.i.bf16 %v5864_v6, %v3344_v19  ;;  %v5904_v42 = vunpack.i.l.bf16 %v8311_v1  ;;  %v6081_v61 = vpack.i.bf16 %v5824_v57, %v3591_v13  ;;  %v5829_v14 = vunpack.i.l.bf16 %v8236_v11 }
 0x93a   : > { %v5879_v33 = vunpack.i.l.bf16 %v5878_v24  ;;  %6037 = vrot.lane.b32.xlu1 %v6036_v18, %s6715_s29  ;;  %v3583_v60 = vsel %vm562_vm0, %v5860_v46, %v5819_v43  ;;  %v5880_v6 = vunpack.i.h.bf16 %v5878_v24  ;;  %v5890_v24 = vunpack.i.h.bf16 %v8293_v44 }
 0x93b   : > { %v6066_v49 = vpack.i.bf16 %v5904_v42, %v5899_v30  ;;  %v6071_v19 = vpack.i.bf16 %v5819_v43, %v3583_v60  ;;  %v3599_v57 = vsel %vm3095_vm7, %v5870_v5, %v5829_v14  ;;  %v5874_v11 = vunpack.i.l.bf16 %v8274_v37 }
 0x93c   : > { %v6061_v52 = vpack.i.bf16 %v5884_v8, %v5879_v33  ;;  %v8320_v4 = vpop.permute.xlu0 %3387  ;;  %v6086_v47 = vpack.i.bf16 %v5829_v14, %v3599_v57 }
 0x93d   : > { %v8323_v48 = vpop.permute.xlu1 %5892  ;;  %v3390_v51 = vsel %vm3137_vm12, %v8264_v32, %v8320_v4 }
 0x93e   : > { %6062 = vrot.lane.b32.xlu0 %v6061_v52, %s6715_s29  ;;  %6047 = vrot.lane.b32.xlu1 %v6046_v12, %s6715_s29  ;;  %v5889_v12 = vunpack.i.l.bf16 %v8293_v44  ;;  %v3604_v52 = vsel %vm3102_vm8, %v5879_v33, %v5880_v6 }
 0x93f   : > { %v6101_v28 = vpack.i.bf16 %v5880_v6, %v3604_v52 }
 0x940   : > { %v8333_v53 = vpop.permute.xlu0 %5912  ;;  %v3373_v44 = vsel %vm3119_vm10, %v5775_v16, %v5889_v12  ;;  %v3374_v33 = vsel %vm3119_vm10, %v5889_v12, %v5890_v24  ;;  %v5875_v16 = vunpack.i.h.bf16 %v8274_v37  ;;  %v5895_v37 = vunpack.i.h.bf16 %v8323_v48 }
 0x941   : > { %v3631_v10 = vpop.permute.xlu1 %3630  ;;  %v5914_v36 = vunpack.i.l.bf16 %v8333_v53  ;;  %v6106_v13 = vpack.i.bf16 %v3374_v33, %v3373_v44  ;;  %v5885_v33 = vunpack.i.h.bf16 %v8282_v62 }
 0x942   : > { %6067 = vrot.lane.b32.xlu0 %v6066_v49, %s6715_s29  ;;  %6057 = vrot.lane.b32.xlu1 %v6056_v17, %s6715_s29  ;;  %v3366_v52 = vsel %vm605_vm5, %v5874_v11, %v5875_v16 }
 0x943   : > { %v3582_v29 = vsel %vm562_vm0, %v5914_v36, %v5860_v46  ;;  %v3612_v16 = vsel %vm605_vm5, %v5884_v8, %v5885_v33  ;;  %v5900_v8 = vunpack.i.h.bf16 %v8302_v35  ;;  %v5845_v35 = vunpack.i.h.bf16 %v8286_v38 }
 0x944   : > { %v8341_v23 = vpop.permute.xlu0 %5922  ;;  %v6076_v49 = vpack.i.bf16 %v3582_v29, %v8121_v22  ;;  %v3636_v29 = vsel %vm3137_vm12, %v3631_v10, %v8240_v50 }
 0x945   : > { %v8345_v18 = vpop.permute.xlu1 %5907  ;;  %v5924_v22 = vunpack.i.l.bf16 %v8341_v23 }
 0x946   : > { %3686 = vrot.lane.b32.xlu0 %v3631_v10, %s6715_s29  ;;  %3441 = vrot.lane.b32.xlu1 %v3389_v2, %s6715_s29 }
 0x948   : > { %v8353_v7 = vpop.permute.xlu0 %3877 }
 0x949   : > { %v8359_v17 = vpop.permute.xlu1 %5917 }
 0x94a   : > { %6072 = vrot.lane.b32.xlu0 %v6071_v19, %s6715_s29  ;;  %6082 = vrot.lane.b32.xlu1 %v6081_v61, %s6715_s29  ;;  %v5919_v46 = vunpack.i.l.bf16 %v8359_v17  ;;  %v3598_v61 = vsel %vm3095_vm7, %v5924_v22, %v5870_v5  ;;  %v3365_v19 = vsel %vm605_vm5, %v5770_v20, %v5874_v11 }
 0x94b   : > { %v6096_v20 = vpack.i.bf16 %v3366_v52, %v3365_v19 }
 0x94c   : > { %v8365_v43 = vpop.permute.xlu0 %4072  ;;  %v3590_v36 = vsel %vm571_vm1, %v5919_v46, %v5865_v34  ;;  %v5894_v34 = vunpack.i.l.bf16 %v8323_v48 }
 0x94d   : > { %v8373_v60 = vpop.permute.xlu1 %5927  ;;  %v6091_v24 = vpack.i.bf16 %v3598_v61, %v3590_v36  ;;  %v5905_v36 = vunpack.i.h.bf16 %v8311_v1  ;;  %v5840_v1 = vunpack.i.h.bf16 %v8277_v27 }
 0x94e   : > { %6077 = vrot.lane.b32.xlu0 %v6076_v49, %s6715_s29  ;;  %6102 = vrot.lane.b32.xlu1 %v6101_v28, %s6715_s29  ;;  %v3381_v5 = vsel %vm3128_vm13, %v5780_v15, %v5894_v34  ;;  %v3382_v28 = vsel %vm3128_vm13, %v5894_v34, %v5895_v37  ;;  %v5929_v57 = vunpack.i.l.bf16 %v8373_v60 }
 0x94f   : > { %v6111_v48 = vpack.i.bf16 %v3382_v28, %v3381_v5  ;;  %v3628_v34 = vsel %vm3128_vm13, %v5904_v42, %v5905_v36  ;;  %v3620_v42 = vsel %vm3119_vm10, %v5899_v30, %v5900_v8  ;;  %v5925_v30 = vunpack.i.h.bf16 %v8341_v23 }
 0x950   : > { %v8379_v6 = vpop.permute.xlu0 %4088  ;;  %v3613_v15 = vsel %vm605_vm5, %v5885_v33, %v5929_v57 }
 0x951   : > { %v8383_v2 = vpop.permute.xlu1 %5932  ;;  %v6126_v61 = vpack.i.bf16 %v3613_v15, %v3612_v16 }
 0x952   : > { %6107 = vrot.lane.b32.xlu1 %v6106_v13, %s6715_s29  ;;  %6087 = vrot.lane.b32.xlu0 %v6086_v47, %s6715_s29  ;;  %v5930_v13 = vunpack.i.h.bf16 %v8373_v60  ;;  %v5935_v62 = vunpack.i.h.bf16 %v8383_v2 }
 0x954   : > { %v8391_v12 = vpop.permute.xlu0 %5952 }
 0x955   : > { %v8398_v14 = vpop.permute.xlu1 %5937  ;;  %v5954_v57 = vunpack.i.l.bf16 %v8391_v12 }
 0x956   : > { %3688 = vrot.lane.b32.xlu1 %v3636_v29, %s6715_s29  ;;  %6092 = vrot.lane.b32.xlu0 %v6091_v24, %s6715_s29  ;;  %v5939_v22 = vunpack.i.l.bf16 %v8398_v14  ;;  %v5940_v32 = vunpack.i.h.bf16 %v8398_v14  ;;  %v5934_v24 = vunpack.i.l.bf16 %v8383_v2  ;;  %v5915_v29 = vunpack.i.h.bf16 %v8333_v53 }
 0x958   : > { %v8402_v63 = vpop.permute.xlu0 %5962  ;;  %v3629_v52 = vsel %vm3128_vm13, %v5905_v36, %v5939_v22  ;;  %v3829_v53 = vsel %vm562_vm0, %v5840_v1, %v5915_v29  ;;  %v5920_v22 = vunpack.i.h.bf16 %v8359_v17  ;;  %v3830_v16 = vsel %vm562_vm0, %v5915_v29, %v5954_v57 }
 0x959   : > { %v3635_v49 = vpop.permute.xlu1 %3634  ;;  %v6136_v5 = vpack.i.bf16 %v3629_v52, %v3628_v34  ;;  %v5964_v36 = vunpack.i.l.bf16 %v8402_v63  ;;  %v6151_v17 = vpack.i.bf16 %v5954_v57, %v3830_v16 }
 0x95a   : > { %6097 = vrot.lane.b32.xlu0 %v6096_v20, %s6715_s29  ;;  %v6121_v20 = vpack.i.bf16 %v5940_v32, %v5935_v62  ;;  %v3837_v34 = vsel %vm571_vm1, %v5845_v35, %v5920_v22 }
 0x95c   : > { %v8409_v10 = vpop.permute.xlu0 %5967 }
 0x95d   : > { %v8412_v44 = vpop.permute.xlu1 %4080 }
 0x95e   : > { %6112 = vrot.lane.b32.xlu0 %v6111_v48, %s6715_s29  ;;  %v3621_v48 = vsel %vm3119_vm10, %v5900_v8, %v5934_v24  ;;  %v6141_v24 = vpack.i.bf16 %v3829_v53, %v8102_v26  ;;  %v5850_v8 = vunpack.i.h.bf16 %v8244_v3  ;;  %v5790_v26 = vunpack.i.h.bf16 %v8212_v58 }
 0x960   : > { %v8416_v46 = vpop.permute.xlu0 %5977  ;;  %v3845_v23 = vsel %vm3095_vm7, %v5850_v8, %v5925_v30 }
 0x961   : > { %v8423_v11 = vpop.permute.xlu1 %5942  ;;  %v6146_v57 = vpack.i.bf16 %v3845_v23, %v3837_v34 }
 0x962   : > { %v5944_v47 = vunpack.i.l.bf16 %v8423_v11  ;;  %3443 = vrot.lane.b32.xlu0 %v3390_v51, %s6715_s29  ;;  %v6131_v51 = vpack.i.bf16 %v3621_v48, %v3620_v42  ;;  %v5789_v48 = vunpack.i.l.bf16 %v8212_v58 }
 0x964   : > { %v6116_v4 = vpack.i.bf16 %v5930_v13, %v5944_v47  ;;  %v8437_v19 = vpop.permute.xlu0 %5982 }
 0x965   : > { %v8441_v37 = vpop.permute.xlu1 %3879 }
 0x966   : > { %6117 = vrot.lane.b32.xlu1 %v6116_v4, %s6715_s29  ;;  %6127 = vrot.lane.b32.xlu0 %v6126_v61, %s6715_s29  ;;  %v3637_v61 = vsel %vm3137_vm12, %v8240_v50, %v3635_v49  ;;  %v3846_v50 = vsel %vm3095_vm7, %v5925_v30, %v5964_v36 }
 0x967   : > { %v6161_v1 = vpack.i.bf16 %v5964_v36, %v3846_v50 }
 0x968   : > { %v8455_v28 = vpop.permute.xlu0 %5992 }
 0x969   : > { %v8459_v33 = vpop.permute.xlu1 %5947 }
 0x96a   : > { %6122 = vrot.lane.b32.xlu1 %v6121_v20, %s6715_s29  ;;  %6137 = vrot.lane.b32.xlu0 %v6136_v5, %s6715_s29  ;;  %v5810_v20 = vunpack.i.h.bf16 %v8228_v45  ;;  %v5809_v5 = vunpack.i.l.bf16 %v8228_v45 }
 0x96c   : > { %v8468_v15 = vpop.permute.xlu0 %5997  ;;  %v3203_v35 = vsel %vm3194_vm11, %v5809_v5, %v5810_v20  ;;  %v3204_v30 = vsel %vm3194_vm11, %v5810_v20, %v5789_v48  ;;  %v5955_v5 = vunpack.i.h.bf16 %v8391_v12  ;;  %v5839_v20 = vunpack.i.l.bf16 %v8277_v27 }
 0x96d   : > { %v8475_v4 = vpop.permute.xlu1 %5957  ;;  %v5999_v58 = vunpack.i.l.bf16 %v8468_v15 }
 0x96e   : > { %6132 = vrot.lane.b32.xlu1 %v6131_v51, %s6715_s29  ;;  %3690 = vrot.lane.b32.xlu0 %v3637_v61, %s6715_s29  ;;  %v5959_v49 = vunpack.i.l.bf16 %v8475_v4  ;;  %v5945_v51 = vunpack.i.h.bf16 %v8423_v11  ;;  %v4079_v12 = vsel %vm562_vm0, %v5955_v5, %v5839_v20  ;;  %v5960_v11 = vunpack.i.h.bf16 %v8475_v4 }
 0x96f   : > { %v6181_v48 = vpack.i.bf16 %v5839_v20, %v4079_v12  ;;  %v4078_v27 = vsel %vm562_vm0, %v8365_v43, %v5955_v5 }
 0x970   : > { %v8482_v52 = vpop.permute.xlu0 %3881  ;;  %v3838_v16 = vsel %vm571_vm1, %v5920_v22, %v5959_v49  ;;  %v3851_v23 = vsel %vm3102_vm8, %v5944_v47, %v5945_v51  ;;  %v5844_v47 = vunpack.i.l.bf16 %v8286_v38  ;;  %v5849_v38 = vunpack.i.l.bf16 %v8244_v3 }
 0x971   : > { %v8488_v29 = vpop.permute.xlu1 %5972  ;;  %v6156_v8 = vpack.i.bf16 %v5959_v49, %v3838_v16  ;;  %v6166_v49 = vpack.i.bf16 %v5945_v51, %v3851_v23  ;;  %v6186_v16 = vpack.i.bf16 %v4078_v27, %v8154_v55  ;;  %v5969_v3 = vunpack.i.l.bf16 %v8409_v10 }
 0x972   : > { %6142 = vrot.lane.b32.xlu1 %v6141_v24, %s6715_s29  ;;  %6152 = vrot.lane.b32.xlu0 %v6151_v17, %s6715_s29  ;;  %v5974_v42 = vunpack.i.l.bf16 %v8488_v29  ;;  %v5979_v24 = vunpack.i.l.bf16 %v8416_v46  ;;  %v4087_v51 = vsel %vm571_vm1, %v5960_v11, %v5844_v47  ;;  %v5975_v4 = vunpack.i.h.bf16 %v8488_v29 }
 0x973   : > { %v3859_v2 = vsel %vm605_vm5, %v5930_v13, %v5969_v3 }
 0x974   : > { %v6018_v53 = vpop.permute.xlu0 %6017  ;;  %v6171_v22 = vpack.i.bf16 %v5979_v24, %v5974_v42 }
 0x975   : > { %v6020_v45 = vunpack.i.h.bf16 %v6018_v53  ;;  %v6019_v61 = vunpack.i.l.bf16 %v6018_v53  ;;  %v3883_v53 = vsel %vm3137_vm12, %v8353_v7, %v8441_v37  ;;  %v5988_v55 = vpop.permute.xlu1 %5987 }
 0x976   : > { %6147 = vrot.lane.b32.xlu1 %v6146_v57, %s6715_s29  ;;  %6162 = vrot.lane.b32.xlu0 %v6161_v1, %s6715_s29  ;;  %v5994_v57 = vunpack.i.l.bf16 %v8455_v28  ;;  %v5965_v1 = vunpack.i.h.bf16 %v8402_v63  ;;  %v5985_v63 = vunpack.i.h.bf16 %v8437_v19 }
 0x977   : > { %v3205_v36 = vsel %vm3194_vm11, %v5790_v26, %v6019_v61  ;;  %v3206_v17 = vsel %vm3194_vm11, %v6019_v61, %v6020_v45  ;;  %v6191_v45 = vpack.i.bf16 %v5844_v47, %v4087_v51  ;;  %v5984_v61 = vunpack.i.l.bf16 %v8437_v19 }
 0x978   : > { %v4966_v34 = vpack.c.bf16 %v3205_v36, %v3203_v35  ;;  %v4964_v50 = vpack.c.bf16 %v3206_v17, %v3204_v30  ;;  %v6176_v26 = vpack.i.bf16 %v5999_v58, %v5994_v57  ;;  %v4095_v43 = vsel %vm3095_vm7, %v5965_v1, %v5849_v38  ;;  %v6023_v5 = vpop.permute.xlu0 %6022 }
 0x979   : > { %v4100_v35 = vsel %vm3102_vm8, %v5974_v42, %v5975_v4  ;;  %v6196_v29 = vpack.i.bf16 %v5849_v38, %v4095_v43  ;;  %v5970_v36 = vunpack.i.h.bf16 %v8409_v10  ;;  %v3867_v17 = vsel %vm3119_vm10, %v5935_v62, %v5984_v61  ;;  %v4129_v23 = vpop.permute.xlu1 %4128 }
 0x97a   : > { %6157 = vrot.lane.b32.xlu1 %v6156_v8, %s6715_s29  ;;  %6172 = vrot.lane.b32.xlu0 %v6171_v22, %s6715_s29  ;;  %v6211_v30 = vpack.i.bf16 %v5975_v4, %v4100_v35  ;;  %v3868_v8 = vsel %vm3119_vm10, %v5984_v61, %v5985_v63  ;;  %v5995_v19 = vunpack.i.h.bf16 %v8455_v28  ;;  %v4086_v42 = vsel %vm571_vm1, %v8412_v44, %v5960_v11 }
 0x97b   : > { %4965 = vmatprep.subr.bf16.mxu0 %v4964_v50  ;;  %v4094_v10 = vsel %vm3095_vm7, %v8379_v6, %v5965_v1  ;;  %v6221_v22 = vpack.i.bf16 %v3868_v8, %v3867_v17  ;;  %v5980_v28 = vunpack.i.h.bf16 %v8416_v46  ;;  %v6000_v11 = vunpack.i.h.bf16 %v8468_v15 }
 0x97c   : > { %4967 = vmatpush1.bf16.msra.mxu0 %v4966_v34  ;;  %v6201_v62 = vpack.i.bf16 %v4094_v10, %v4086_v42  ;;  %v3860_v34 = vsel %vm605_vm5, %v5969_v3, %v5970_v36  ;;  %v4119_v44 = vsel %vm3119_vm10, %v5995_v19, %v7925_v25  ;;  %v4118_v50 = vsel %vm3119_vm10, %v5994_v57, %v5995_v19  ;;  %v3193_v57 = vpop.permute.xlu0 %3192 }
 0x97d   : > { %v6206_v60 = vpack.i.bf16 %v3860_v34, %v3859_v2  ;;  %v6231_v6 = vpack.i.bf16 %v4119_v44, %v4118_v50  ;;  %v4111_v13 = vsel %vm605_vm5, %v5980_v28, %v7923_v31  ;;  %v4110_v20 = vsel %vm605_vm5, %v5979_v24, %v5980_v28  ;;  %v8573_v12 = vpop.permute.xlu1 %6002  ;;  %v8618_v34 = vld [vmem:[#allocation13] sm:$0x7] }
 0x97e   : > { %6167 = vrot.lane.b32.xlu1 %v6166_v49, %s6715_s29  ;;  %6177 = vrot.lane.b32.xlu0 %v6176_v26, %s6715_s29  ;;  %v5990_v49 = vunpack.i.h.bf16 %v5988_v55  ;;  %v5989_v26 = vunpack.i.l.bf16 %v5988_v55  ;;  %v6216_v25 = vpack.i.bf16 %v4111_v13, %v4110_v20  ;;  %v4134_v24 = vsel %vm3137_vm12, %v4129_v23, %v7929_v39 }
 0x97f   : > { %v5855_v47 = vunpack.i.h.bf16 %v8297_v0  ;;  %v4127_v14 = vsel %vm3128_vm13, %v6000_v11, %v7927_v9  ;;  %v3884_v15 = vsel %vm3137_vm12, %v8441_v37, %v8482_v52  ;;  %v6024_v43 = vunpack.i.l.bf16 %v6023_v5 }
 0x980   : > { %v3875_v31 = vsel %vm3128_vm13, %v5940_v32, %v5989_v26  ;;  %v3876_v46 = vsel %vm3128_vm13, %v5989_v26, %v5990_v49  ;;  %v4126_v32 = vsel %vm3128_vm13, %v5999_v58, %v6000_v11  ;;  %v5814_v58 = vunpack.i.l.bf16 %v8232_v40 }
 0x981   : > { %v6226_v27 = vpack.i.bf16 %v3876_v46, %v3875_v31  ;;  %v6236_v38 = vpack.i.bf16 %v4127_v14, %v4126_v32  ;;  %v6025_v61 = vunpack.i.h.bf16 %v6023_v5  ;;  %v3212_v10 = vsel %vm3194_vm11, %v8238_v56, %v3193_v57 }
 0x982   : > { %3935 = vrot.lane.b32.xlu1 %v3883_v53, %s6715_s29  ;;  %6182 = vrot.lane.b32.xlu0 %v6181_v48, %s6715_s29  ;;  %v5854_v48 = vunpack.i.l.bf16 %v8297_v0  ;;  %v3211_v28 = vsel %vm3194_vm11, %v8171_v41, %v8238_v56 }
 0x984   : > { %v3446_v0 = vsel %vm3194_vm11, %v5854_v48, %v5855_v47  ;;  %v5909_v47 = vunpack.i.l.bf16 %v8345_v18 }
 0x986   : > { %6192 = vrot.lane.b32.xlu1 %v6191_v45, %s6715_s29  ;;  %6187 = vrot.lane.b32.xlu0 %v6186_v16, %s6715_s29 }
 0x98a   : > { %6212 = vrot.lane.b32.xlu1 %v6211_v30, %s6715_s29  ;;  %6197 = vrot.lane.b32.xlu0 %v6196_v29, %s6715_s29 }
 0x98e   : > { %6222 = vrot.lane.b32.xlu1 %v6221_v22, %s6715_s29  ;;  %6202 = vrot.lane.b32.xlu0 %v6201_v62, %s6715_s29 }
 0x992   : > { %6232 = vrot.lane.b32.xlu1 %v6231_v6, %s6715_s29  ;;  %6207 = vrot.lane.b32.xlu0 %v6206_v60, %s6715_s29 }
 0x996   : > { %4186 = vrot.lane.b32.xlu1 %v4134_v24, %s6715_s29  ;;  %6217 = vrot.lane.b32.xlu0 %v6216_v25, %s6715_s29 }
 0x998   : > { %v8586_v1 = vpop.permute.xlu1 %6007  ;;  %v6043_v53 = vpop.permute.xlu0 %6042 }
 0x999   : > { %v6045_v39 = vunpack.i.h.bf16 %v6043_v53  ;;  %v6044_v51 = vunpack.i.l.bf16 %v6043_v53 }
 0x99a   : > { %3933 = vrot.lane.b32.xlu1 %v8353_v7, %s6715_s29  ;;  %6227 = vrot.lane.b32.xlu0 %v6226_v27, %s6715_s29  ;;  %v5815_v7 = vunpack.i.h.bf16 %v8232_v40 }
 0x99b   : > { %v3448_v4 = vsel %vm3194_vm11, %v6044_v51, %v6045_v39 }
 0x99c   : > { %v8598_v16 = vpop.permute.xlu1 %6012  ;;  %v4972_v45 = vpack.c.bf16 %v3448_v4, %v3446_v0  ;;  %v3207_v36 = vsel %vm3194_vm11, %v5814_v58, %v5815_v7  ;;  %v3208_v30 = vsel %vm3194_vm11, %v5815_v7, %v6024_v43  ;;  %v6053_v2 = vpop.permute.xlu0 %6052 }
 0x99d   : > { %v6055_v44 = vunpack.i.h.bf16 %v6053_v2  ;;  %v6054_v50 = vunpack.i.l.bf16 %v6053_v2 }
 0x99e   : > { %4973 = vmatprep.subr.bf16.mxu1 %v4972_v45  ;;  %6237 = vrot.lane.b32.xlu0 %v6236_v38, %s6715_s29 }
 0x99f   : > { %v3452_v56 = vsel %vm3194_vm11, %v6054_v50, %v6055_v44 }
 0x9a0   : > { %v8601_v9 = vpop.permute.xlu1 %3439 }
 0x9a2   : > { %3937 = vrot.lane.b32.xlu0 %v3884_v15, %s6715_s29 }
 0x9a4   : > { %v6028_v63 = vpop.permute.xlu1 %6027 }
 0x9a5   : > { %v6030_v35 = vunpack.i.h.bf16 %v6028_v63  ;;  %v6029_v29 = vunpack.i.l.bf16 %v6028_v63 }
 0x9a6   : > { %4184 = vrot.lane.b32.xlu0 %v4129_v23, %s6715_s29 }
 0x9a7   : > { %v3209_v3 = vsel %vm3194_vm11, %v6025_v61, %v6029_v29  ;;  %v3210_v37 = vsel %vm3194_vm11, %v6029_v29, %v6030_v35 }
 0x9a8   : > { %v4970_v52 = vpack.c.bf16 %v3209_v3, %v3207_v36  ;;  %v6033_v55 = vpop.permute.xlu1 %6032  ;;  %v4968_v17 = vpack.c.bf16 %v3210_v37, %v3208_v30 }
 0x9a9   : > { %v6035_v8 = vunpack.i.h.bf16 %v6033_v55  ;;  %v6034_v40 = vunpack.i.l.bf16 %v6033_v55 }
 0x9aa   : > { %4969 = vmatprep.subr.bf16.mxu0 %v4968_v17 }
 0x9ab   : > { %v3445_v19 = vsel %vm3194_vm11, %v6034_v40, %v5854_v48  ;;  %v3447_v42 = vsel %vm3194_vm11, %v6035_v8, %v6044_v51  ;;  %4971 = vmatpush1.bf16.msra.mxu0 %v4970_v52 }
 0x9ac   : > { %v4974_v22 = vpack.c.bf16 %v3447_v42, %v3445_v19  ;;  %v6038_v62 = vpop.permute.xlu1 %6037  ;;  %3250 = vmatprep.subr.mxu0 %v3212_v10  ;;  %v6009_v19 = vunpack.i.l.bf16 %v8586_v1 }
 0x9ad   : > { %v6040_v5 = vunpack.i.h.bf16 %v6038_v62  ;;  %v6039_v6 = vunpack.i.l.bf16 %v6038_v62 }
 0x9ae   : > { %4975 = vmatpush1.bf16.msra.mxu1 %v4974_v22  ;;  %v6010_v22 = vunpack.i.h.bf16 %v8586_v1  ;;  %v6014_v1 = vunpack.i.l.bf16 %v8598_v16 }
 0x9af   : > { %3251 = vmatpush1.msra.mxu0 %v3211_v28  ;;  %v3451_v49 = vsel %vm3194_vm11, %v6040_v5, %v6054_v50 }
 0x9b0   : > { %v8623_v23 = vpop.permute.xlu0 %6062  ;;  %v6048_v60 = vpop.permute.xlu1 %6047  ;;  %4633 = vmatmul.mubr.msk.f32.vlgmr.msra.gmra.mrb[26].mxu0 %vm717_vm9, %v8618_v34 }
 0x9b1   : > { %v6050_v13 = vunpack.i.h.bf16 %v6048_v60  ;;  %v6049_v20 = vunpack.i.l.bf16 %v6048_v60  ;;  %3792 = vmatprep.mubr.f32.mxu0 %v8174_v59  ;;  %v5910_v59 = vunpack.i.h.bf16 %v8345_v18 }
 0x9b3   : > { %v3449_v26 = vsel %vm3194_vm11, %v6039_v6, %v6049_v20  ;;  %v3450_v41 = vsel %vm3194_vm11, %v6049_v20, %v6050_v13  ;;  %v3693_v14 = vsel %vm3194_vm11, %v5909_v47, %v5910_v59 }
 0x9b4   : > { %v4978_v25 = vpack.c.bf16 %v3451_v49, %v3449_v26  ;;  %v8632_v57 = vpop.permute.xlu0 %6067  ;;  %v6058_v11 = vpop.permute.xlu1 %6057  ;;  %v4976_v31 = vpack.c.bf16 %v3452_v56, %v3450_v41  ;;  %v6015_v41 = vunpack.i.h.bf16 %v8598_v16 }
 0x9b5   : > { %v6060_v55 = vunpack.i.h.bf16 %v6058_v11  ;;  %v6059_v17 = vunpack.i.l.bf16 %v6058_v11 }
 0x9b6   : > { %4977 = vmatprep.subr.bf16.mxu1 %v4976_v31 }
 0x9b7   : > { %4979 = vmatpush1.bf16.msra.mxu1 %v4978_v25  ;;  %v3453_v44 = vsel %vm3194_vm11, %v6009_v19, %v6059_v17  ;;  %v3454_v50 = vsel %vm3194_vm11, %v6059_v17, %v6060_v55 }
 0x9b8   : > { %v8634_v46 = vpop.permute.xlu0 %3686  ;;  %v8636_v24 = vpop.permute.xlu1 %3441 }
 0x9bc   : > { %v6073_v48 = vpop.permute.xlu0 %6072  ;;  %v6083_v39 = vpop.permute.xlu1 %6082 }
 0x9bd   : > { %v6075_v27 = vunpack.i.h.bf16 %v6073_v48  ;;  %v6074_v53 = vunpack.i.l.bf16 %v6073_v48  ;;  %v6085_v45 = vunpack.i.h.bf16 %v6083_v39  ;;  %v6084_v15 = vunpack.i.l.bf16 %v6083_v39 }
 0x9bf   : > { %v3695_v32 = vsel %vm3194_vm11, %v6074_v53, %v6075_v27  ;;  %v3697_v29 = vsel %vm3194_vm11, %v6084_v15, %v6085_v45 }
 0x9c0   : > { %v6078_v51 = vpop.permute.xlu0 %6077  ;;  %v4988_v0 = vpack.c.bf16 %v3695_v32, %v3693_v14  ;;  %v6103_v35 = vpop.permute.xlu1 %6102 }
 0x9c1   : > { %v6080_v4 = vunpack.i.h.bf16 %v6078_v51  ;;  %v6079_v38 = vunpack.i.l.bf16 %v6078_v51  ;;  %v6105_v32 = vunpack.i.h.bf16 %v6103_v35  ;;  %v6104_v16 = vunpack.i.l.bf16 %v6103_v35 }
 0x9c2   : > { %4989 = vmatprep.subr.bf16.mxu0 %v4988_v0 }
 0x9c3   : > { %v3692_v7 = vsel %vm3194_vm11, %v6079_v38, %v5909_v47  ;;  %v3694_v58 = vsel %vm3194_vm11, %v6080_v4, %v6074_v53  ;;  %v6065_v4 = vunpack.i.h.bf16 %v8623_v23  ;;  %v6064_v38 = vunpack.i.l.bf16 %v8623_v23 }
 0x9c4   : > { %v4990_v18 = vpack.c.bf16 %v3694_v58, %v3692_v7  ;;  %v6088_v43 = vpop.permute.xlu0 %6087  ;;  %v6108_v42 = vpop.permute.xlu1 %6107  ;;  %v3461_v7 = vsel %vm3194_vm11, %v8601_v9, %v8636_v24 }
 0x9c5   : > { %v6090_v63 = vunpack.i.h.bf16 %v6088_v43  ;;  %v6089_v61 = vunpack.i.l.bf16 %v6088_v43  ;;  %v6110_v5 = vunpack.i.h.bf16 %v6108_v42  ;;  %v6109_v60 = vunpack.i.l.bf16 %v6108_v42 }
 0x9c6   : > { %4991 = vmatpush1.bf16.msra.mxu0 %v4990_v18  ;;  %v3700_v58 = vsel %vm3194_vm11, %v6064_v38, %v6104_v16  ;;  %v3701_v43 = vsel %vm3194_vm11, %v6104_v16, %v6105_v32 }
 0x9c7   : > { %v3699_v36 = vsel %vm3194_vm11, %v6089_v61, %v6090_v63  ;;  %v3457_v11 = vsel %vm3194_vm11, %v6014_v1, %v6109_v60  ;;  %v3458_v59 = vsel %vm3194_vm11, %v6109_v60, %v6110_v5 }
 0x9c8   : > { %v6093_v3 = vpop.permute.xlu0 %6092  ;;  %v4992_v30 = vpack.c.bf16 %v3699_v36, %v3697_v29  ;;  %v8660_v48 = vpop.permute.xlu1 %3688  ;;  %v6282_v36 = vld [vmem:[%s7768_s11 + $0x58] sm:$0xff] }
 0x9c9   : > { %v6095_v37 = vunpack.i.h.bf16 %v6093_v3  ;;  %v6094_v52 = vunpack.i.l.bf16 %v6093_v3 }
 0x9ca   : > { %4993 = vmatprep.subr.bf16.mxu0 %v4992_v30 }
 0x9cb   : > { %v3696_v8 = vsel %vm3194_vm11, %v6094_v52, %v6084_v15  ;;  %v3698_v40 = vsel %vm3194_vm11, %v6095_v37, %v6089_v61  ;;  %v6070_v37 = vunpack.i.h.bf16 %v8632_v57  ;;  %v6069_v52 = vunpack.i.l.bf16 %v8632_v57 }
 0x9cc   : > { %v4994_v10 = vpack.c.bf16 %v3698_v40, %v3696_v8  ;;  %v6098_v2 = vpop.permute.xlu0 %6097  ;;  %v5950_v8 = vunpack.i.h.bf16 %v8459_v33  ;;  %v5949_v40 = vunpack.i.l.bf16 %v8459_v33 }
 0x9cd   : > { %v6100_v62 = vunpack.i.h.bf16 %v6098_v2  ;;  %v6099_v28 = vunpack.i.l.bf16 %v6098_v2 }
 0x9ce   : > { %4995 = vmatpush1.bf16.msra.mxu0 %v4994_v10 }
 0x9cf   : > { %v3455_v6 = vsel %vm3194_vm11, %v6010_v22, %v6099_v28  ;;  %v3456_v13 = vsel %vm3194_vm11, %v6099_v28, %v6100_v62 }
 0x9d0   : > { %v4982_v20 = vpack.c.bf16 %v3455_v6, %v3453_v44  ;;  %v6113_v49 = vpop.permute.xlu0 %6112  ;;  %v4980_v26 = vpack.c.bf16 %v3456_v13, %v3454_v50  ;;  %v3940_v6 = vsel %vm3194_vm11, %v5949_v40, %v5950_v8 }
 0x9d1   : > { %v6115_v56 = vunpack.i.h.bf16 %v6113_v49  ;;  %v6114_v25 = vunpack.i.l.bf16 %v6113_v49 }
 0x9d2   : > { %4981 = vmatprep.subr.bf16.mxu1 %v4980_v26 }
 0x9d3   : > { %v3459_v31 = vsel %vm3194_vm11, %v6015_v41, %v6114_v25  ;;  %4983 = vmatpush1.bf16.msra.mxu1 %v4982_v20  ;;  %v3460_v47 = vsel %vm3194_vm11, %v6114_v25, %v6115_v56  ;;  %v3708_v25 = vsel %vm3194_vm11, %v8634_v46, %v8660_v48 }
 0x9d4   : > { %v4986_v27 = vpack.c.bf16 %v3459_v31, %v3457_v11  ;;  %v3444_v53 = vpop.permute.xlu0 %3443  ;;  %v4984_v14 = vpack.c.bf16 %v3460_v47, %v3458_v59 }
 0x9d5   : > { %v3462_v39 = vsel %vm3194_vm11, %v8636_v24, %v3444_v53 }
 0x9d6   : > { %4985 = vmatprep.subr.bf16.mxu1 %v4984_v14 }
 0x9d7   : > { %4987 = vmatpush1.bf16.msra.mxu1 %v4986_v27 }
 0x9d8   : > { %v8664_v51 = vpop.permute.xlu1 %6117  ;;  %v6128_v0 = vpop.permute.xlu0 %6127  ;;  %3497 = vmatprep.subr.mxu1 %v3462_v39 }
 0x9d9   : > { %v6130_v45 = vunpack.i.h.bf16 %v6128_v0  ;;  %v6129_v15 = vunpack.i.l.bf16 %v6128_v0 }
 0x9db   : > { %v3702_v18 = vsel %vm3194_vm11, %v6065_v4, %v6129_v15  ;;  %3498 = vmatpush1.msra.mxu1 %v3461_v7  ;;  %v3703_v63 = vsel %vm3194_vm11, %v6129_v15, %v6130_v45  ;;  %v6005_v15 = vunpack.i.h.bf16 %v8573_v12  ;;  %v6004_v7 = vunpack.i.l.bf16 %v8573_v12 }
 0x9dc   : > { %v4998_v61 = vpack.c.bf16 %v3702_v18, %v3700_v58  ;;  %v8675_v35 = vpop.permute.xlu1 %6122  ;;  %v6138_v29 = vpop.permute.xlu0 %6137  ;;  %4636 = vmatmul.mubr.msk.f32.vlgmr.msra.gmra.mrb[30].mxu1 %vm717_vm9, %v8618_v34  ;;  %v4996_v23 = vpack.c.bf16 %v3703_v63, %v3701_v43 }
 0x9dd   : > { %4039 = vmatprep.mubr.f32.mxu1 %v6282_v36  ;;  %v6140_v9 = vunpack.i.h.bf16 %v6138_v29  ;;  %v6139_v24 = vunpack.i.l.bf16 %v6138_v29 }
 0x9de   : > { %4997 = vmatprep.subr.bf16.mxu0 %v4996_v23 }
 0x9df   : > { %4999 = vmatpush1.bf16.msra.mxu0 %v4998_v61  ;;  %v3706_v19 = vsel %vm3194_vm11, %v6070_v37, %v6139_v24  ;;  %v3707_v2 = vsel %vm3194_vm11, %v6139_v24, %v6140_v9  ;;  %v4191_v61 = vsel %vm3194_vm11, %v6004_v7, %v6005_v15 }
 0x9e0   : > { %v6133_v3 = vpop.permute.xlu1 %6132  ;;  %v3691_v30 = vpop.permute.xlu0 %3690 }
 0x9e1   : > { %v6135_v55 = vunpack.i.h.bf16 %v6133_v3  ;;  %v6134_v17 = vunpack.i.l.bf16 %v6133_v3  ;;  %v3709_v20 = vsel %vm3194_vm11, %v8660_v48, %v3691_v30 }
 0x9e3   : > { %v3704_v42 = vsel %vm3194_vm11, %v6069_v52, %v6134_v17  ;;  %v3705_v10 = vsel %vm3194_vm11, %v6134_v17, %v6135_v55 }
 0x9e4   : > { %v5002_v22 = vpack.c.bf16 %v3706_v19, %v3704_v42  ;;  %v6143_v62 = vpop.permute.xlu1 %6142  ;;  %v6153_v28 = vpop.permute.xlu0 %6152  ;;  %v5000_v44 = vpack.c.bf16 %v3707_v2, %v3705_v10 }
 0x9e5   : > { %v6145_v50 = vunpack.i.h.bf16 %v6143_v62  ;;  %v6144_v57 = vunpack.i.l.bf16 %v6143_v62  ;;  %v6155_v5 = vunpack.i.h.bf16 %v6153_v28  ;;  %v6154_v60 = vunpack.i.l.bf16 %v6153_v28 }
 0x9e6   : > { %5001 = vmatprep.subr.bf16.mxu0 %v5000_v44 }
 0x9e7   : > { %v3939_v33 = vsel %vm3194_vm11, %v6144_v57, %v5949_v40  ;;  %v3941_v13 = vsel %vm3194_vm11, %v6145_v50, %v6154_v60  ;;  %5003 = vmatpush1.bf16.msra.mxu0 %v5002_v22  ;;  %v3942_v49 = vsel %vm3194_vm11, %v6154_v60, %v6155_v5 }
 0x9e8   : > { %v5006_v26 = vpack.c.bf16 %v3941_v13, %v3939_v33  ;;  %v6148_v41 = vpop.permute.xlu1 %6147  ;;  %v6163_v1 = vpop.permute.xlu0 %6162  ;;  %3744 = vmatprep.subr.mxu0 %v3709_v20  ;;  %v5004_v56 = vpack.c.bf16 %v3942_v49, %v3940_v6  ;;  %v6119_v6 = vunpack.i.l.bf16 %v8664_v51  ;;  %v6120_v20 = vunpack.i.h.bf16 %v8664_v51 }
 0x9e9   : > { %v6150_v11 = vunpack.i.h.bf16 %v6148_v41  ;;  %v6165_v31 = vunpack.i.h.bf16 %v6163_v1  ;;  %v6164_v59 = vunpack.i.l.bf16 %v6163_v1  ;;  %v6149_v53 = vunpack.i.l.bf16 %v6148_v41 }
 0x9ea   : > { %5005 = vmatprep.subr.bf16.mxu1 %v5004_v56 }
 0x9eb   : > { %3745 = vmatpush1.msra.mxu0 %v3708_v25  ;;  %5007 = vmatpush1.bf16.msra.mxu1 %v5006_v26  ;;  %v3945_v16 = vsel %vm3194_vm11, %v6150_v11, %v6164_v59  ;;  %v3946_v39 = vsel %vm3194_vm11, %v6164_v59, %v6165_v31 }
 0x9ec   : > { %v6158_v47 = vpop.permute.xlu1 %6157  ;;  %v8697_v27 = vpop.permute.xlu0 %6172  ;;  %4639 = vmatmul.mubr.msk.f32.vlgmr.msra.gmra.mrb[28].mxu0 %vm717_vm9, %v8618_v34 }
 0x9ed   : > { %v6160_v14 = vunpack.i.h.bf16 %v6158_v47  ;;  %v6159_v32 = vunpack.i.l.bf16 %v6158_v47  ;;  %4290 = vmatprep.mubr.f32.mxu0 %v6282_v36  ;;  %v6174_v51 = vunpack.i.l.bf16 %v8697_v27 }
 0x9ef   : > { %v3943_v46 = vsel %vm3194_vm11, %v6149_v53, %v6159_v32  ;;  %v3944_v48 = vsel %vm3194_vm11, %v6159_v32, %v6160_v14  ;;  %v6175_v32 = vunpack.i.h.bf16 %v8697_v27  ;;  %v6125_v27 = vunpack.i.h.bf16 %v8675_v35 }
 0x9f0   : > { %v5010_v0 = vpack.c.bf16 %v3945_v16, %v3943_v46  ;;  %v6168_v4 = vpop.permute.xlu1 %6167  ;;  %v8705_v38 = vpop.permute.xlu0 %6177  ;;  %v5008_v45 = vpack.c.bf16 %v3946_v39, %v3944_v48 }
 0x9f1   : > { %v6170_v50 = vunpack.i.h.bf16 %v6168_v4  ;;  %v6169_v57 = vunpack.i.l.bf16 %v6168_v4 }
 0x9f2   : > { %5009 = vmatprep.subr.bf16.mxu1 %v5008_v45 }
 0x9f3   : > { %5011 = vmatpush1.bf16.msra.mxu1 %v5010_v0  ;;  %v3947_v41 = vsel %vm3194_vm11, %v6119_v6, %v6169_v57  ;;  %v3948_v1 = vsel %vm3194_vm11, %v6169_v57, %v6170_v50 }
 0x9f4   : > { %v8709_v58 = vpop.permute.xlu1 %3935  ;;  %v6183_v18 = vpop.permute.xlu0 %6182 }
 0x9f5   : > { %v6185_v43 = vunpack.i.h.bf16 %v6183_v18  ;;  %v6184_v63 = vunpack.i.l.bf16 %v6183_v18 }
 0x9f7   : > { %v4193_v29 = vsel %vm3194_vm11, %v6184_v63, %v6185_v43 }
 0x9f8   : > { %v6193_v23 = vpop.permute.xlu1 %6192  ;;  %v6188_v36 = vpop.permute.xlu0 %6187  ;;  %v5020_v9 = vpack.c.bf16 %v4193_v29, %v4191_v61 }
 0x9f9   : > { %v6190_v24 = vunpack.i.h.bf16 %v6188_v36  ;;  %v6189_v3 = vunpack.i.l.bf16 %v6188_v36  ;;  %v6195_v30 = vunpack.i.h.bf16 %v6193_v23  ;;  %v6194_v37 = vunpack.i.l.bf16 %v6193_v23 }
 0x9fa   : > { %5021 = vmatprep.subr.bf16.mxu0 %v5020_v9 }
 0x9fb   : > { %v4190_v12 = vsel %vm3194_vm11, %v6189_v3, %v6004_v7  ;;  %v4192_v52 = vsel %vm3194_vm11, %v6190_v24, %v6184_v63  ;;  %v4195_v42 = vsel %vm3194_vm11, %v6194_v37, %v6195_v30  ;;  %v6124_v7 = vunpack.i.l.bf16 %v8675_v35 }
 0x9fc   : > { %v5022_v55 = vpack.c.bf16 %v4192_v52, %v4190_v12  ;;  %v6213_v17 = vpop.permute.xlu1 %6212  ;;  %v6198_v8 = vpop.permute.xlu0 %6197  ;;  %v6180_v35 = vunpack.i.h.bf16 %v8705_v38 }
 0x9fd   : > { %v6200_v40 = vunpack.i.h.bf16 %v6198_v8  ;;  %v6199_v19 = vunpack.i.l.bf16 %v6198_v8  ;;  %v6215_v56 = vunpack.i.h.bf16 %v6213_v17  ;;  %v6214_v25 = vunpack.i.l.bf16 %v6213_v17 }
 0x9fe   : > { %5023 = vmatpush1.bf16.msra.mxu0 %v5022_v55  ;;  %v6179_v17 = vunpack.i.l.bf16 %v8705_v38 }
 0x9ff   : > { %v4197_v10 = vsel %vm3194_vm11, %v6199_v19, %v6200_v40  ;;  %v4198_v0 = vsel %vm3194_vm11, %v6174_v51, %v6214_v25  ;;  %v4199_v45 = vsel %vm3194_vm11, %v6214_v25, %v6215_v56 }
 0xa00   : > { %v6203_v2 = vpop.permute.xlu0 %6202  ;;  %v5024_v22 = vpack.c.bf16 %v4197_v10, %v4195_v42  ;;  %v6223_v62 = vpop.permute.xlu1 %6222 }
 0xa01   : > { %v6205_v28 = vunpack.i.h.bf16 %v6203_v2  ;;  %v6204_v44 = vunpack.i.l.bf16 %v6203_v2  ;;  %v6225_v48 = vunpack.i.h.bf16 %v6223_v62  ;;  %v6224_v39 = vunpack.i.l.bf16 %v6223_v62 }
 0xa02   : > { %5025 = vmatprep.subr.bf16.mxu0 %v5024_v22 }
 0xa03   : > { %v4194_v5 = vsel %vm3194_vm11, %v6204_v44, %v6194_v37  ;;  %v4196_v60 = vsel %vm3194_vm11, %v6205_v28, %v6199_v19  ;;  %v3951_v36 = vsel %vm3194_vm11, %v6124_v7, %v6224_v39  ;;  %v3952_v9 = vsel %vm3194_vm11, %v6224_v39, %v6225_v48 }
 0xa04   : > { %v5026_v33 = vpack.c.bf16 %v4196_v60, %v4194_v5  ;;  %v6208_v13 = vpop.permute.xlu0 %6207  ;;  %v6233_v11 = vpop.permute.xlu1 %6232 }
 0xa05   : > { %v6210_v49 = vunpack.i.h.bf16 %v6208_v13  ;;  %v6209_v26 = vunpack.i.l.bf16 %v6208_v13  ;;  %v6235_v24 = vunpack.i.h.bf16 %v6233_v11  ;;  %v6234_v3 = vunpack.i.l.bf16 %v6233_v11 }
 0xa06   : > { %5027 = vmatpush1.bf16.msra.mxu0 %v5026_v33 }
 0xa07   : > { %v3949_v31 = vsel %vm3194_vm11, %v6120_v20, %v6209_v26  ;;  %v3950_v59 = vsel %vm3194_vm11, %v6209_v26, %v6210_v49  ;;  %v4202_v19 = vsel %vm3194_vm11, %v6179_v17, %v6234_v3  ;;  %v4203_v2 = vsel %vm3194_vm11, %v6234_v3, %v6235_v24 }
 0xa08   : > { %v5014_v47 = vpack.c.bf16 %v3949_v31, %v3947_v41  ;;  %v6218_v53 = vpop.permute.xlu0 %6217  ;;  %v5012_v14 = vpack.c.bf16 %v3950_v59, %v3948_v1  ;;  %v4187_v61 = vpop.permute.xlu1 %4186 }
 0xa09   : > { %v6220_v16 = vunpack.i.h.bf16 %v6218_v53  ;;  %v6219_v46 = vunpack.i.l.bf16 %v6218_v53  ;;  %v4207_v57 = vsel %vm3194_vm11, %v4187_v61, %v7936_v54 }
 0xa0a   : > { %5013 = vmatprep.subr.bf16.mxu1 %v5012_v14 }
 0xa0b   : > { %v4200_v4 = vsel %vm3194_vm11, %v6175_v32, %v6219_v46  ;;  %5015 = vmatpush1.bf16.msra.mxu1 %v5014_v47  ;;  %v4201_v15 = vsel %vm3194_vm11, %v6219_v46, %v6220_v16 }
 0xa0c   : > { %v5030_v18 = vpack.c.bf16 %v4200_v4, %v4198_v0  ;;  %v6228_v43 = vpop.permute.xlu0 %6227  ;;  %v5028_v63 = vpack.c.bf16 %v4201_v15, %v4199_v45  ;;  %v3934_v42 = vpop.permute.xlu1 %3933 }
 0xa0d   : > { %v6230_v29 = vunpack.i.h.bf16 %v6228_v43  ;;  %v6229_v23 = vunpack.i.l.bf16 %v6228_v43  ;;  %v3955_v38 = vsel %vm3194_vm11, %v3934_v42, %v8709_v58 }
 0xa0e   : > { %5029 = vmatprep.subr.bf16.mxu0 %v5028_v63 }
 0xa0f   : > { %v3953_v30 = vsel %vm3194_vm11, %v6125_v27, %v6229_v23  ;;  %5031 = vmatpush1.bf16.msra.mxu0 %v5030_v18  ;;  %v3954_v37 = vsel %vm3194_vm11, %v6229_v23, %v6230_v29 }
 0xa10   : > { %v5018_v12 = vpack.c.bf16 %v3953_v30, %v3951_v36  ;;  %v6238_v52 = vpop.permute.xlu0 %6237  ;;  %v5016_v55 = vpack.c.bf16 %v3954_v37, %v3952_v9 }
 0xa11   : > { %v6240_v8 = vunpack.i.h.bf16 %v6238_v52  ;;  %v6239_v40 = vunpack.i.l.bf16 %v6238_v52 }
 0xa12   : > { %5017 = vmatprep.subr.bf16.mxu1 %v5016_v55 }
 0xa13   : > { %v4204_v10 = vsel %vm3194_vm11, %v6180_v35, %v6239_v40  ;;  %5019 = vmatpush1.bf16.msra.mxu1 %v5018_v12  ;;  %v4205_v22 = vsel %vm3194_vm11, %v6239_v40, %v6240_v8 }
 0xa14   : > { %v5034_v62 = vpack.c.bf16 %v4204_v10, %v4202_v19  ;;  %v3938_v28 = vpop.permute.xlu0 %3937  ;;  %v5032_v44 = vpack.c.bf16 %v4205_v22, %v4203_v2 }
 0xa15   : > { %v3956_v50 = vsel %vm3194_vm11, %v8709_v58, %v3938_v28 }
 0xa16   : > { %3991 = vmatprep.subr.mxu1 %v3956_v50  ;;  %5033 = vmatprep.subr.bf16.mxu0 %v5032_v44 }
 0xa17   : > { %3992 = vmatpush1.msra.mxu1 %v3955_v38  ;;  %5035 = vmatpush1.bf16.msra.mxu0 %v5034_v62 }
 0xa18   : > { %v4185_v5 = vpop.permute.xlu0 %4184  ;;  %4642 = vmatmul.mubr.msk.f32.vlgmr.msra.gmra.mrb[32].mxu1 %vm717_vm9, %v8618_v34  ;;  %4242 = vmatprep.subr.mxu0 %v4207_v57 }
 0xa19   : > { %v4206_v60 = vsel %vm3194_vm11, %v4185_v5, %v4187_v61 }
 0xa1b   : > { %4243 = vmatpush1.msra.mxu0 %v4206_v60 }
 0xa1c   : > { %4645 = vmatmul.mubr.msk.f32.vlgmr.msra.gmra.mrb[30].mxu0 %vm717_vm9, %v8618_v34 }
 0xa83   : > { %v3300_v58 = vpop.f32.mrb[26].mxu0 }
 0xa84   : > { %v3301_v6 = vadd.f32 %v3300_v58, %v7921_v21  ;;  %v3302_v33 = vpop.f32.mrb[27].mxu0 }
 0xa85   : > { %v3303_v54 = vadd.f32 %v3302_v33, %v7921_v21 }
 0xa86   : > { %v4634_v13 = vmul.f32 -1.442695, %v3301_v6 }
 0xa87   : > { %v4635_v20 = vmul.f32 -1.442695, %v3303_v54 }
 0xa88   : > { %6241 = vpow2.f32 %v4634_v13 }
 0xa89   : > { %6243 = vpow2.f32 %v4635_v20 }
 0xa8a   : > { %6578 = shalt.err (!%p6575_p8)
}
 0xa8b   : > { %s6579_s11 = scalar_lea.hbm %s8761_s13, 1536  ;;  %s6583_s30 = scalar_lea.hbm %s8856_s10, 3072 }
 0xa8c   : > { %p6580_p10 = scmp.ne.s32.totalorder %s8761_s13, %s6579_s11  ;;  %p6584_p13 = scmp.lt.u32.totalorder %s8761_s13, %s8856_s10 }
 0xa8d   : > { %p6585_p5 = scmp.lt.u32.totalorder %s6583_s30, %s6579_s11  ;;  %p6587_p4 = scmp.lt.u32.totalorder %s6579_s11, %s8761_s13 }
 0xa8e   : > { %p6581_p12 = pnand %p6580_p10, %p8917_p1 }
 0xa8f   : > { %p6586_p7 = por %p6585_p5, %p6584_p13 }
 0xa90   : > { %p6582_p11 = pneg %p6581_p12 }
 0xa91   : > { %p6588_p3 = por %p6587_p4, %p6586_p7 }
 0xa93   : > { %p6589_p9 = pnand %p6588_p3, %p6582_p11 }
 0xa95   : > { %6592 = shalt.err (!%p6589_p9)
}
 0xa96   : > { %5115 = dma.vmem_to_hbm [thread:$0]  (%p8917_p1), %s4335_s14, 1536, %s8761_s13, %s4315_s2   ;;  %v6242_v34 = vpop.eup %6241 }
 0xa97   : > { %v6244_v49 = vpop.eup %6243  ;;  %v3311_v26 = vadd.f32 1.0, %v6242_v34  ;;  %s5074_s26 = smul.u32 40, %s7107_s5  ;;  %s8918_s22 = sld [smem:[#allocation36_spill]] }
 0xa98   : > { %v3312_v41 = vadd.f32 1.0, %v6244_v49  ;;  %s5076_s14 = smul.u32 640, %s6823_s23  ;;  %s4320_s11 = scalar_lea.sflag [#allocation23], %s7107_s5 }
 0xa99   : > { %6245 = vrcp.f32 %v3311_v26  ;;  %s8782_s1 = scalar_lea.vmem [#allocation22], %s5074_s26  ;;  %s6741_s23 = smov [#allocation22]  }
 0xa9a   : > { %6247 = vrcp.f32 %v3312_v41  ;;  %s4348_s13 = sshll.u32 %s8782_s1, 4  ;;  %s6597_s3 = sshll.u32 %s6741_s23, 4  ;;  %s8803_s13 = int_to_ptr.vmem [resolvable:$true] %s4348_s13  ;;  %s6598_s3 = int_to_ptr.vmem [resolvable:$false] %s6597_s3 }
 0xa9b   : > { %s6593_s24 = scalar_lea.vmem %s8803_s13, 640  ;;  %s6599_s30 = scalar_lea.vmem %s6598_s3, 1280 }
 0xa9c   : > { %p6594_p6 = scmp.ne.s32.totalorder %s8803_s13, %s6593_s24  ;;  %p6600_p8 = scmp.lt.s32.totalorder %s8803_s13, %s6598_s3 }
 0xa9d   : > { %s8801_s25 = scalar_lea.hbm %s8918_s22, %s5076_s14  ;;  %p6601_p10 = scmp.lt.s32.totalorder %s6599_s30, %s6593_s24 }
 0xa9e   : > { %p6595_p0 = pnand %p6594_p6, %p8917_p1 }
 0xa9f   : > { %p6602_p12 = por %p6601_p10, %p6600_p8 }
 0xaa0   : > { %p6596_p2 = pneg %p6595_p0 }
 0xaa2   : > { %p6603_p11 = pnand %p6602_p12, %p6596_p2 }
 0xaa3   : > { %v6246_v1 = vpop.eup %6245 }
 0xaa4   : > { %v6248_v56 = vpop.eup %6247 }
 0xaa5   : > { %v3319_v25 = vcombine.low %v6246_v1, %v6248_v56 }
 0xaa7   : > { %3321 = vst [vmem:[%s8782_s1] sm:$0x77] %v3319_v25 }
 0xaaf   : > { %v3547_v11 = vpop.f32.mrb[30].mxu1 }
 0xab0   : > { %v3548_v31 = vadd.f32 %v3547_v11, %v7921_v21  ;;  %v3549_v59 = vpop.f32.mrb[31].mxu1 }
 0xab1   : > { %v3550_v47 = vadd.f32 %v3549_v59, %v7921_v21 }
 0xab2   : > { %v4637_v53 = vmul.f32 -1.442695, %v3548_v31 }
 0xab3   : > { %v4638_v14 = vmul.f32 -1.442695, %v3550_v47 }
 0xab4   : > { %6249 = vpow2.f32 %v4637_v53 }
 0xab5   : > { %6251 = vpow2.f32 %v4638_v14 }
 0xabe   : > { %v6250_v32 = vpop.eup %6249 }
 0xabf   : > { %v6252_v51 = vpop.eup %6251  ;;  %v3558_v16 = vadd.f32 1.0, %v6250_v32  ;;  %v3794_v46 = vpop.f32.mrb[28].mxu0 }
 0xac0   : > { %v3559_v48 = vadd.f32 1.0, %v6252_v51  ;;  %v3795_v39 = vadd.f32 %v3794_v46, %v7921_v21  ;;  %v3796_v0 = vpop.f32.mrb[29].mxu0 }
 0xac1   : > { %6253 = vrcp.f32 %v3558_v16  ;;  %v3797_v4 = vadd.f32 %v3796_v0, %v7921_v21 }
 0xac2   : > { %6255 = vrcp.f32 %v3559_v48  ;;  %v4640_v45 = vmul.f32 -1.442695, %v3795_v39 }
 0xac3   : > { %v4641_v15 = vmul.f32 -1.442695, %v3797_v4 }
 0xac4   : > { %6257 = vpow2.f32 %v4640_v45 }
 0xac5   : > { %6259 = vpow2.f32 %v4641_v15 }
 0xacb   : > { %v6254_v7 = vpop.eup %6253 }
 0xacc   : > { %v6256_v18 = vpop.eup %6255 }
 0xacd   : > { %v3566_v43 = vcombine.low %v6254_v7, %v6256_v18 }
 0xace   : > { %v6258_v63 = vpop.eup %6257 }
 0xacf   : > { %v6260_v27 = vpop.eup %6259  ;;  %v3805_v61 = vadd.f32 1.0, %v6258_v63  ;;  %3568 = vst [vmem:[%s8782_s1 + $0x8] sm:$0x77] %v3566_v43 }
 0xad0   : > { %v3806_v29 = vadd.f32 1.0, %v6260_v27 }
 0xad1   : > { %6261 = vrcp.f32 %v3805_v61 }
 0xad2   : > { %6263 = vrcp.f32 %v3806_v29 }
 0xadb   : > { %v6262_v23 = vpop.eup %6261 }
 0xadc   : > { %v6264_v36 = vpop.eup %6263 }
 0xadd   : > { %v3813_v9 = vcombine.low %v6262_v23, %v6264_v36 }
 0xadf   : > { %3815 = vst [vmem:[%s8782_s1 + $0x10] sm:$0x77] %v3813_v9 }
 0xaeb   : > { %v4041_v24 = vpop.f32.mrb[32].mxu1 }
 0xaec   : > { %v4042_v3 = vadd.f32 %v4041_v24, %v7921_v21  ;;  %v4043_v30 = vpop.f32.mrb[33].mxu1 }
 0xaed   : > { %v4044_v37 = vadd.f32 %v4043_v30, %v7921_v21 }
 0xaee   : > { %v4643_v12 = vmul.f32 -1.442695, %v4042_v3 }
 0xaef   : > { %v4644_v52 = vmul.f32 -1.442695, %v4044_v37  ;;  %v4292_v55 = vpop.f32.mrb[30].mxu0 }
 0xaf0   : > { %6265 = vpow2.f32 %v4643_v12  ;;  %v4293_v35 = vadd.f32 %v4292_v55, %v7921_v21  ;;  %v4294_v17 = vpop.f32.mrb[31].mxu0 }
 0xaf1   : > { %6267 = vpow2.f32 %v4644_v52  ;;  %v4295_v8 = vadd.f32 %v4294_v17, %v7921_v21 }
 0xaf2   : > { %v4646_v40 = vmul.f32 -1.442695, %v4293_v35 }
 0xaf3   : > { %v4647_v19 = vmul.f32 -1.442695, %v4295_v8 }
 0xaf4   : > { %6269 = vpow2.f32 %v4646_v40 }
 0xaf5   : > { %6271 = vpow2.f32 %v4647_v19 }
 0xafa   : > { %v6266_v42 = vpop.eup %6265 }
 0xafb   : > { %v6268_v10 = vpop.eup %6267  ;;  %v4052_v2 = vadd.f32 1.0, %v6266_v42 }
 0xafc   : > { %v4053_v22 = vadd.f32 1.0, %v6268_v10 }
 0xafd   : > { %6273 = vrcp.f32 %v4052_v2 }
 0xafe   : > { %v6270_v62 = vpop.eup %6269  ;;  %6275 = vrcp.f32 %v4053_v22 }
 0xaff   : > { %v6272_v28 = vpop.eup %6271  ;;  %v4303_v44 = vadd.f32 1.0, %v6270_v62 }
 0xb00   : > { %v4304_v50 = vadd.f32 1.0, %v6272_v28 }
 0xb01   : > { %6277 = vrcp.f32 %v4303_v44 }
 0xb02   : > { %6279 = vrcp.f32 %v4304_v50 }
 0xb07   : > { %v6274_v21 = vpop.eup %6273 }
 0xb08   : > { %v6276_v38 = vpop.eup %6275 }
 0xb09   : > { %v4060_v57 = vcombine.low %v6274_v21, %v6276_v38 }
 0xb0b   : > { %v6278_v5 = vpop.eup %6277  ;;  %4062 = vst [vmem:[%s8782_s1 + $0x18] sm:$0x77] %v4060_v57 }
 0xb0c   : > { %v6280_v60 = vpop.eup %6279 }
 0xb0d   : > { %v4311_v58 = vcombine.low %v6278_v5, %v6280_v60 }
 0xb0f   : > { %4313 = vst [vmem:[%s8782_s1 + $0x20] sm:$0x77] %v4311_v58 }
 0xb10   : > { %6606 = shalt.err (!%p6603_p11)
}
 0xb11   : > { %s6607_s5 = scalar_lea.hbm %s8801_s25, 640  ;;  %s6611_s26 = scalar_lea.hbm %s8918_s22, 1280 }
 0xb12   : > { %p6608_p13 = scmp.ne.s32.totalorder %s8801_s25, %s6607_s5  ;;  %p6612_p4 = scmp.lt.u32.totalorder %s8801_s25, %s8918_s22 }
 0xb13   : > { %p6613_p3 = scmp.lt.u32.totalorder %s6611_s26, %s6607_s5  ;;  %p6615_p6 = scmp.lt.u32.totalorder %s6607_s5, %s8801_s25 }
 0xb14   : > { %p6609_p5 = pnand %p6608_p13, %p8917_p1 }
 0xb15   : > { %p6614_p9 = por %p6613_p3, %p6612_p4 }
 0xb16   : > { %p6610_p7 = pneg %p6609_p5 }
 0xb17   : > { %p6616_p0 = por %p6615_p6, %p6614_p9 }
 0xb19   : > { %p6617_p2 = pnand %p6616_p0, %p6610_p7 }
 0xb1b   : > { %6620 = shalt.err (!%p6617_p2)
}
 0xb1c   : > { %5116 = dma.vmem_to_hbm [thread:$0]  (%p8917_p1), %s8803_s13, 640, %s8801_s25, %s4320_s11  }
 0xb1d PF: > { %s4360_s2 = sand.u32 1, %s6671_s17   ;;  %p8919_p8 = scmp.ne.s32.totalorder %s8896_s28, 0 }
 0xb1e   : > { %p8920_p10 = scmp.ge.s32.totalorder %s6683_s20, 2  ;;  %s4361_s12 = scalar_lea.sflag [#allocation6], %s4360_s2 }
 0xb20   : > { %p5152_p12 = pnand %p8920_p10, %p8919_p8 }
 0xb22   : > { %6662 = dma.done.wait (!%p5152_p12), %s4361_s12, 1536  }
 0xb23   : > { %6664 = vsyncadd (!%p5152_p12), %s4361_s12, 4294965760  ;;  %s4370_s24 = scalar_lea.sflag [#allocation23], %s4360_s2 }
 0xb24   : > { %6666 = dma.done.wait (!%p5152_p12), %s4370_s24, 640  }
 0xb25   : > { %6668 = vsyncadd (!%p5152_p12), %s4370_s24, 4294966656  ;;  %p33_p1 = scmp.ge.s32.totalorder %s7037_s27, 4   ;;  %s8921_s17 = smov %s6675_s18 }
 0xb26   : > { %s8922_s18 = smov %s6679_s19  ;;  %s8923_s19 = smov %s7049_s21 }
 0xb27   : > { %s8924_s20 = smov %s7037_s27  ;;  %35 = sbr.rel (!%p33_p1) target bundleno = 18 (0x12), region = 158 }
 0xb2e   :  { %4375 = vsyncpa [#allocation5], 1 }
 0xb2f   :  { %4377 = vsyncpa [#allocation5 + $0x1], 1 }
 0xb30   :  { %4378 = vsyncpa [#allocation8], 1 }
 0xb31   :  { %4379 = vsyncpa [#allocation11], 1 }
 0xb32   :  { %4380 = vsyncpa [#allocation14], 1 }
 0xb33   :  { %4381 = vsyncpa [#allocation17], 1 }
 0xb34   :  { %4382 = vsyncpa [#allocation20], 1 }
 0xb35   :  { %4383 = vsyncpa [#allocation6], 1 }
 0xb36   :  { %4385 = vsyncpa [#allocation6 + $0x1], 1 }
 0xb37   :  { %4386 = vsyncpa [#allocation23], 1 }
 0xb38   :  { %4388 = vsyncpa [#allocation23 + $0x1], 1 }

</bundles_post_ra>
